<compile_context>
chip_gen: v7x
topology: tpu7x:2x2x1
jax: 0.10.0
libtpu: 0.0.40
codegen_flags: <defaults>
</compile_context>

<pallas_src>
import math
from functools import partial

import jax
import jax.numpy as jnp
from jax import lax
from jax.experimental import pallas as pl
from jax.experimental.pallas import tpu as pltpu

_NEG_BIG = -1e30  # finite "-inf": keeps fully-masked rows NaN-free.


def _mhca_kernel(q_ref, k_ref, v_ref,
                 wq_ref, bq_ref, wk_ref, bk_ref, wv_ref, bv_ref,
                 woh_ref, bo_ref,
                 o_ref,
                 *, num_heads: int, head_dim: int, scale: float, causal: bool):
    """One batch block per grid step: fused QKV projections + multi-head
    causal attention + output projection, fully VMEM/vreg resident."""
    b_blk, q_len, _ = q_ref.shape
    _, t_len, _ = k_ref.shape
    d_model = num_heads * head_dim

    # ---- QKV projections: fold the batch block into the MXU M dimension ----
    # (b_blk*len, d_in) @ (d_in, d_model); bf16 operands, f32 accumulation.
    # Attention scale folded into Q once (applies to the bias too, matching
    # scores = (q_proj(q) @ k_proj(k)^T) * scale).
    # TODO(synk): when key is value (common cross-attn case), fuse K/V into a
    # single (M, d_key) @ (d_key, 2*d_model) matmul with wk|wv concatenated.
    q2 = q_ref[...].reshape(b_blk * q_len, -1)
    k2 = k_ref[...].reshape(b_blk * t_len, -1)
    v2 = v_ref[...].reshape(b_blk * t_len, -1)

    qp = (jnp.dot(q2, wq_ref[...], preferred_element_type=jnp.float32)
          + bq_ref[...]) * scale
    kp = jnp.dot(k2, wk_ref[...], preferred_element_type=jnp.float32) + bk_ref[...]
    vp = jnp.dot(v2, wv_ref[...], preferred_element_type=jnp.float32) + bv_ref[...]

    # bf16 copies for the attention matmuls; softmax math stays f32.
    q3 = qp.reshape(b_blk, q_len, d_model).astype(jnp.bfloat16)
    k3 = kp.reshape(b_blk, t_len, d_model).astype(jnp.bfloat16)
    v3 = vp.reshape(b_blk, t_len, d_model).astype(jnp.bfloat16)

    # ---- gather heads into the leading batch dim: (H*b_blk, len, head_dim) --
    # Static lane slices + one major-axis stack per tensor; after this, heads
    # ride through a single batched score einsum, a single softmax and a
    # single PV einsum (rank-3, leading batch dim -- the proven Mosaic form).
    # TODO(synk): collapse to jnp.einsum('bqhd,bkhd->bhqk', ...) once Mosaic
    # dot_general supports multiple / non-leading batch dims.
    def head_stack(x, length):
        parts = [x[:, :, h * head_dim:(h + 1) * head_dim]
                 for h in range(num_heads)]
        return jnp.stack(parts, axis=0).reshape(
            num_heads * b_blk, length, head_dim)

    qh = head_stack(q3, q_len)        # (H*b, q, hd)
    kh = head_stack(k3, t_len)        # (H*b, t, hd)
    vh = head_stack(v3, t_len)        # (H*b, t, hd)

    # ---- scores + softmax (one shot over all heads and the batch block) ----
    s = jnp.einsum('bqd,bkd->bqk', qh, kh,
                   preferred_element_type=jnp.float32)        # (H*b, q, t)
    if causal:
        rows = lax.broadcasted_iota(jnp.int32, (q_len, t_len), 0)
        cols = lax.broadcasted_iota(jnp.int32, (q_len, t_len), 1)
        s = jnp.where((cols > rows)[None], _NEG_BIG, s)       # top-left triu

    m = jnp.max(s, axis=-1, keepdims=True)
    e = jnp.exp(s - m)
    p = e * pl.reciprocal(jnp.sum(e, axis=-1, keepdims=True), approx=True)

    ctx = jnp.einsum('bqk,bkd->bqd', p.astype(jnp.bfloat16), vh,
                     preferred_element_type=jnp.float32)      # (H*b, q, hd)

    # ---- output projection with head-major weights ------------------------
    # out[m, n] = sum_h ctx[h, m, :] @ wo_h[h, :, n]; per-head partials are
    # summed over the leading axis, so the context never needs to be
    # re-concatenated into 256 lanes or staged through a VMEM scratch.
    ctx_h = ctx.reshape(num_heads, b_blk * q_len, head_dim).astype(jnp.bfloat16)
    out_parts = jnp.einsum('hmd,hdn->hmn', ctx_h, woh_ref[...],
                           preferred_element_type=jnp.float32)
    out = jnp.sum(out_parts, axis=0) + bo_ref[...]
    o_ref[...] = out.reshape(b_blk, q_len, d_model).astype(o_ref.dtype)


def prepare_params(params, *, num_heads: int):
    """One-time parameter prep (do NOT call per step): cast projection weights
    to bf16 and reshape the output projection to head-major (H, hd, d_model)."""
    d_model = params["wq"].shape[1]
    assert d_model % num_heads == 0
    head_dim = d_model // num_heads
    return {
        "wq": params["wq"].astype(jnp.bfloat16),
        "wk": params["wk"].astype(jnp.bfloat16),
        "wv": params["wv"].astype(jnp.bfloat16),
        # wo rows are head-major (h*hd + d) so this reshape is a pure regroup.
        "wo_h": params["wo"].astype(jnp.bfloat16).reshape(num_heads, head_dim,
                                                          d_model),
        "bq": params["bq"].astype(jnp.float32),
        "bk": params["bk"].astype(jnp.float32),
        "bv": params["bv"].astype(jnp.float32),
        "bo": params["bo"].astype(jnp.float32),
    }


def multi_head_cross_attention(query, key, value, kparams, *,
                               num_heads: int, temperature: float = 1.0,
                               causal: bool = True, b_block: int | None = None,
                               out_dtype=jnp.bfloat16):
    """Pallas forward pass of MultiHeadCrossAttention (eval mode, no masks,
    window_size=None, return_attention=False).  `kparams` = prepare_params()."""
    B, q_len, d_query = query.shape
    Bk, t_len, d_key = key.shape
    assert B == Bk, "batch mismatch"
    d_value = value.shape[-1]
    d_model = kparams["wq"].shape[1]
    assert d_model % num_heads == 0
    head_dim = d_model // num_heads
    scale = (head_dim * temperature) ** -0.5       # matches torch module

    if b_block is None:
        # Single grid step by default: v5e/v6e have one TensorCore, and at
        # small per-block work the ~600-cycle per-step overhead outweighs the
        # v7x 2-TC split.  Pass b_block explicitly (e.g. B//2) on v7x once
        # per-block work is large enough to amortize it.
        b_block = B
    assert B % b_block == 0
    n_blocks = B // b_block

    # bf16 kernel boundary: halves input DMA bytes; no-op if caller holds bf16.
    query = query.astype(jnp.bfloat16)
    key = key.astype(jnp.bfloat16)
    value = value.astype(jnp.bfloat16)

    kernel = partial(_mhca_kernel, num_heads=num_heads, head_dim=head_dim,
                     scale=scale, causal=causal)

    # Grid-invariant weights/biases: constant index map (block == full array).
    # TODO(synk): pipeline_mode=pl.Buffered(1) on these once d_model grows
    # (matters for v7x's 64 MiB VMEM); negligible at d_model=256.
    def wspec(shape):
        return pl.BlockSpec(shape, lambda *_: (0,) * len(shape))

    # TODO(synk): for long T (esp. v7x, 64 MiB VMEM / 32 MiB scoped default),
    # tile over t_len flash-style (running max/sum) and set
    # CompilerParams(vmem_limit_bytes=...) instead of full K/V residency.
    return pl.pallas_call(
        kernel,
        out_shape=jax.ShapeDtypeStruct((B, q_len, d_model), out_dtype),
        grid=(n_blocks,),
        in_specs=[
            pl.BlockSpec((b_block, q_len, d_query), lambda i: (i, 0, 0)),
            pl.BlockSpec((b_block, t_len, d_key),   lambda i: (i, 0, 0)),
            pl.BlockSpec((b_block, t_len, d_value), lambda i: (i, 0, 0)),
            wspec((d_query, d_model)), wspec((1, d_model)),          # wq, bq
            wspec((d_key, d_model)),   wspec((1, d_model)),          # wk, bk
            wspec((d_value, d_model)), wspec((1, d_model)),          # wv, bv
            wspec((num_heads, head_dim, d_model)), wspec((1, d_model)),  # wo_h, bo
        ],
        out_specs=pl.BlockSpec((b_block, q_len, d_model), lambda i: (i, 0, 0)),
        compiler_params=pltpu.CompilerParams(
            dimension_semantics=("parallel",)),
    )(query, key, value,
      kparams["wq"], kparams["bq"], kparams["wk"], kparams["bk"],
      kparams["wv"], kparams["bv"], kparams["wo_h"], kparams["bo"])


def _xavier_uniform(key, fan_in, fan_out, dtype=jnp.float32):
    # Matches nn.init.xavier_uniform_ bound; stored as (in, out) = torch_W.T
    bound = math.sqrt(6.0 / (fan_in + fan_out))
    return jax.random.uniform(key, (fan_in, fan_out), dtype, -bound, bound)


def _reference(query, key, value, params, *, num_heads, temperature=1.0,
               causal=True):
    """Pure-JAX f32 reference mirroring the torch forward (eval mode)."""
    B, q_len, _ = query.shape
    t_len = key.shape[1]
    d_model = params["wq"].shape[1]
    hd = d_model // num_heads
    scale = (hd * temperature) ** -0.5

    Q = query @ params["wq"] + params["bq"]
    K = key @ params["wk"] + params["bk"]
    V = value @ params["wv"] + params["bv"]
    Q = Q.reshape(B, q_len, num_heads, hd).transpose(0, 2, 1, 3)
    K = K.reshape(B, t_len, num_heads, hd).transpose(0, 2, 1, 3)
    V = V.reshape(B, t_len, num_heads, hd).transpose(0, 2, 1, 3)
    scores = jnp.einsum("bhqd,bhkd->bhqk", Q, K) * scale
    if causal:
        mask = jnp.triu(jnp.ones((q_len, t_len), dtype=bool), k=1)
        scores = jnp.where(mask[None, None], -jnp.inf, scores)
    attn = jax.nn.softmax(scores, axis=-1)
    out = jnp.einsum("bhqk,bhkd->bhqd", attn, V)
    out = out.transpose(0, 2, 1, 3).reshape(B, q_len, d_model)
    return out @ params["wo"] + params["bo"]


if __name__ == "__main__":
    # Module defaults: d_query=128, d_key=d_value=d_model=256, num_heads=8.
    B, Q_LEN, T_LEN = 4, 8, 16
    D_QUERY, D_KEY, D_VALUE, D_MODEL, NUM_HEADS = 128, 256, 256, 256, 8

    root = jax.random.PRNGKey(0)
    ks = jax.random.split(root, 8)

    raw_params = {
        "wq": _xavier_uniform(ks[0], D_QUERY, D_MODEL),
        "bq": jnp.zeros((1, D_MODEL), jnp.float32),
        "wk": _xavier_uniform(ks[1], D_KEY, D_MODEL),
        "bk": jnp.zeros((1, D_MODEL), jnp.float32),
        "wv": _xavier_uniform(ks[2], D_VALUE, D_MODEL),
        "bv": jnp.zeros((1, D_MODEL), jnp.float32),
        "wo": _xavier_uniform(ks[3], D_MODEL, D_MODEL),
        "bo": jnp.zeros((1, D_MODEL), jnp.float32),
    }

    query = jax.random.normal(ks[4], (B, Q_LEN, D_QUERY), jnp.float32)
    key = jax.random.normal(ks[5], (B, T_LEN, D_KEY), jnp.float32)
    value = jax.random.normal(ks[6], (B, T_LEN, D_VALUE), jnp.float32)

    # One-time setup (bf16 weights, head-major wo) -- not per call.
    kparams = prepare_params(raw_params, num_heads=NUM_HEADS)

    out = multi_head_cross_attention(query, key, value, kparams,
                                     num_heads=NUM_HEADS, causal=True)
    out = jax.block_until_ready(out)

    ref = _reference(query, key, value, raw_params, num_heads=NUM_HEADS,
                     causal=True)
    assert out.shape == (B, Q_LEN, D_MODEL)
    assert out.dtype == jnp.bfloat16
    # Kernel runs MXU matmuls in bf16 (f32 accumulate) and emits a bf16
    # output; compare against the full-f32 reference with a tolerance sized
    # for bf16 operands + bf16 output rounding.
    max_err = float(jnp.max(jnp.abs(out.astype(jnp.float32) - ref)))
    assert max_err < 7.5e-2, f"max abs error too large: {max_err}"

    # TODO(synk): dropout is a no-op here (eval mode); key_padding_mask /
    # attn_mask / window_size paths are not exercised (defaults are None) and
    # return_attention=False.
    print("KERNEL_OK")
</pallas_src>

<mosaic_0001>
module attributes {stable_mosaic.version = 11 : i64} {
  func.func @_mhca_kernel(%arg0: i32, %arg1: memref<4x8x128xbf16, #tpu.memory_space<vmem>>, %arg2: memref<4x16x256xbf16, #tpu.memory_space<vmem>>, %arg3: memref<4x16x256xbf16, #tpu.memory_space<vmem>>, %arg4: memref<128x256xbf16, #tpu.memory_space<vmem>>, %arg5: memref<1x256xf32, #tpu.memory_space<vmem>>, %arg6: memref<256x256xbf16, #tpu.memory_space<vmem>>, %arg7: memref<1x256xf32, #tpu.memory_space<vmem>>, %arg8: memref<256x256xbf16, #tpu.memory_space<vmem>>, %arg9: memref<1x256xf32, #tpu.memory_space<vmem>>, %arg10: memref<8x32x256xbf16, #tpu.memory_space<vmem>>, %arg11: memref<1x256xf32, #tpu.memory_space<vmem>>, %arg12: memref<4x8x256xbf16, #tpu.memory_space<vmem>>) attributes {dimension_semantics = [#tpu.dimension_semantics<parallel>], iteration_bounds = array<i64: 1>, scalar_prefetch = 0 : i64, scratch_operands = 0 : i64, tpu.core_type = #tpu.core_type<tc>, window_params = [{transform_indices = @transform_0, window_bounds = array<i64: 4, 8, 128>}, {transform_indices = @transform_1, window_bounds = array<i64: 4, 16, 256>}, {transform_indices = @transform_2, window_bounds = array<i64: 4, 16, 256>}, {pipeline_mode = #tpu.pipeline_mode<synchronous>, transform_indices = @transform_3, window_bounds = array<i64: 128, 256>}, {pipeline_mode = #tpu.pipeline_mode<synchronous>, transform_indices = @transform_4, window_bounds = array<i64: 1, 256>}, {pipeline_mode = #tpu.pipeline_mode<synchronous>, transform_indices = @transform_5, window_bounds = array<i64: 256, 256>}, {pipeline_mode = #tpu.pipeline_mode<synchronous>, transform_indices = @transform_6, window_bounds = array<i64: 1, 256>}, {pipeline_mode = #tpu.pipeline_mode<synchronous>, transform_indices = @transform_7, window_bounds = array<i64: 256, 256>}, {pipeline_mode = #tpu.pipeline_mode<synchronous>, transform_indices = @transform_8, window_bounds = array<i64: 1, 256>}, {pipeline_mode = #tpu.pipeline_mode<synchronous>, transform_indices = @transform_9, window_bounds = array<i64: 8, 32, 256>}, {pipeline_mode = #tpu.pipeline_mode<synchronous>, transform_indices = @transform_10, window_bounds = array<i64: 1, 256>}, {transform_indices = @transform_11, window_bounds = array<i64: 4, 8, 256>}]} {
    %c0 = arith.constant 0 : index
    %c0_0 = arith.constant 0 : index
    %c0_1 = arith.constant 0 : index
    %0 = vector.load %arg1[%c0, %c0_0, %c0_1] : memref<4x8x128xbf16, #tpu.memory_space<vmem>>, vector<4x8x128xbf16>
    %1 = vector.shape_cast %0 : vector<4x8x128xbf16> to vector<32x128xbf16>
    %c0_2 = arith.constant 0 : index
    %c0_3 = arith.constant 0 : index
    %c0_4 = arith.constant 0 : index
    %2 = vector.load %arg2[%c0_2, %c0_3, %c0_4] : memref<4x16x256xbf16, #tpu.memory_space<vmem>>, vector<4x16x256xbf16>
    %3 = vector.shape_cast %2 : vector<4x16x256xbf16> to vector<64x256xbf16>
    %c0_5 = arith.constant 0 : index
    %c0_6 = arith.constant 0 : index
    %c0_7 = arith.constant 0 : index
    %4 = vector.load %arg3[%c0_5, %c0_6, %c0_7] : memref<4x16x256xbf16, #tpu.memory_space<vmem>>, vector<4x16x256xbf16>
    %5 = vector.shape_cast %4 : vector<4x16x256xbf16> to vector<64x256xbf16>
    %c0_8 = arith.constant 0 : index
    %c0_9 = arith.constant 0 : index
    %6 = vector.load %arg4[%c0_8, %c0_9] : memref<128x256xbf16, #tpu.memory_space<vmem>>, vector<128x256xbf16>
    %cst = arith.constant dense<0.000000e+00> : vector<32x256xf32>
    %7 = tpu.matmul %1, %6, %cst {dimension_numbers = #tpu.dot_dimension_numbers<[1], [0], [0], [1], [0, 0, 1, 1], [], []>} : vector<32x128xbf16>, vector<128x256xbf16>, vector<32x256xf32> -> vector<32x256xf32>
    %c0_10 = arith.constant 0 : index
    %c0_11 = arith.constant 0 : index
    %8 = vector.load %arg5[%c0_10, %c0_11] : memref<1x256xf32, #tpu.memory_space<vmem>>, vector<1x256xf32>
    %9 = vector.broadcast %8 : vector<1x256xf32> to vector<32x256xf32>
    %10 = arith.addf %7, %9 : vector<32x256xf32>
    %cst_12 = arith.constant 0.176776692 : f32
    %11 = vector.broadcast %cst_12 : f32 to vector<32x256xf32>
    %12 = arith.mulf %10, %11 : vector<32x256xf32>
    %c0_13 = arith.constant 0 : index
    %c0_14 = arith.constant 0 : index
    %13 = vector.load %arg6[%c0_13, %c0_14] : memref<256x256xbf16, #tpu.memory_space<vmem>>, vector<256x256xbf16>
    %cst_15 = arith.constant dense<0.000000e+00> : vector<64x256xf32>
    %14 = tpu.matmul %3, %13, %cst_15 {dimension_numbers = #tpu.dot_dimension_numbers<[1], [0], [0], [1], [0, 0, 1, 1], [], []>} : vector<64x256xbf16>, vector<256x256xbf16>, vector<64x256xf32> -> vector<64x256xf32>
    %c0_16 = arith.constant 0 : index
    %c0_17 = arith.constant 0 : index
    %15 = vector.load %arg7[%c0_16, %c0_17] : memref<1x256xf32, #tpu.memory_space<vmem>>, vector<1x256xf32>
    %16 = vector.broadcast %15 : vector<1x256xf32> to vector<64x256xf32>
    %17 = arith.addf %14, %16 : vector<64x256xf32>
    %c0_18 = arith.constant 0 : index
    %c0_19 = arith.constant 0 : index
    %18 = vector.load %arg8[%c0_18, %c0_19] : memref<256x256xbf16, #tpu.memory_space<vmem>>, vector<256x256xbf16>
    %cst_20 = arith.constant dense<0.000000e+00> : vector<64x256xf32>
    %19 = tpu.matmul %5, %18, %cst_20 {dimension_numbers = #tpu.dot_dimension_numbers<[1], [0], [0], [1], [0, 0, 1, 1], [], []>} : vector<64x256xbf16>, vector<256x256xbf16>, vector<64x256xf32> -> vector<64x256xf32>
    %c0_21 = arith.constant 0 : index
    %c0_22 = arith.constant 0 : index
    %20 = vector.load %arg9[%c0_21, %c0_22] : memref<1x256xf32, #tpu.memory_space<vmem>>, vector<1x256xf32>
    %21 = vector.broadcast %20 : vector<1x256xf32> to vector<64x256xf32>
    %22 = arith.addf %19, %21 : vector<64x256xf32>
    %23 = vector.shape_cast %12 : vector<32x256xf32> to vector<4x8x256xf32>
    %24 = arith.truncf %23 : vector<4x8x256xf32> to vector<4x8x256xbf16>
    %25 = vector.shape_cast %17 : vector<64x256xf32> to vector<4x16x256xf32>
    %26 = arith.truncf %25 : vector<4x16x256xf32> to vector<4x16x256xbf16>
    %27 = vector.shape_cast %22 : vector<64x256xf32> to vector<4x16x256xf32>
    %28 = arith.truncf %27 : vector<4x16x256xf32> to vector<4x16x256xbf16>
    %29 = vector.extract_strided_slice %24 {offsets = [0, 0, 0], sizes = [4, 8, 32], strides = [1, 1, 1]} : vector<4x8x256xbf16> to vector<4x8x32xbf16>
    %30 = vector.extract_strided_slice %24 {offsets = [0, 0, 32], sizes = [4, 8, 32], strides = [1, 1, 1]} : vector<4x8x256xbf16> to vector<4x8x32xbf16>
    %31 = vector.extract_strided_slice %24 {offsets = [0, 0, 64], sizes = [4, 8, 32], strides = [1, 1, 1]} : vector<4x8x256xbf16> to vector<4x8x32xbf16>
    %32 = vector.extract_strided_slice %24 {offsets = [0, 0, 96], sizes = [4, 8, 32], strides = [1, 1, 1]} : vector<4x8x256xbf16> to vector<4x8x32xbf16>
    %33 = vector.extract_strided_slice %24 {offsets = [0, 0, 128], sizes = [4, 8, 32], strides = [1, 1, 1]} : vector<4x8x256xbf16> to vector<4x8x32xbf16>
    %34 = vector.extract_strided_slice %24 {offsets = [0, 0, 160], sizes = [4, 8, 32], strides = [1, 1, 1]} : vector<4x8x256xbf16> to vector<4x8x32xbf16>
    %35 = vector.extract_strided_slice %24 {offsets = [0, 0, 192], sizes = [4, 8, 32], strides = [1, 1, 1]} : vector<4x8x256xbf16> to vector<4x8x32xbf16>
    %36 = vector.extract_strided_slice %24 {offsets = [0, 0, 224], sizes = [4, 8, 32], strides = [1, 1, 1]} : vector<4x8x256xbf16> to vector<4x8x32xbf16>
    %37 = vector.shape_cast %29 : vector<4x8x32xbf16> to vector<1x4x8x32xbf16>
    %38 = vector.shape_cast %30 : vector<4x8x32xbf16> to vector<1x4x8x32xbf16>
    %39 = vector.shape_cast %31 : vector<4x8x32xbf16> to vector<1x4x8x32xbf16>
    %40 = vector.shape_cast %32 : vector<4x8x32xbf16> to vector<1x4x8x32xbf16>
    %41 = vector.shape_cast %33 : vector<4x8x32xbf16> to vector<1x4x8x32xbf16>
    %42 = vector.shape_cast %34 : vector<4x8x32xbf16> to vector<1x4x8x32xbf16>
    %43 = vector.shape_cast %35 : vector<4x8x32xbf16> to vector<1x4x8x32xbf16>
    %44 = vector.shape_cast %36 : vector<4x8x32xbf16> to vector<1x4x8x32xbf16>
    %45 = tpu.concatenate %37, %38, %39, %40, %41, %42, %43, %44 in 0 : vector<1x4x8x32xbf16>, vector<1x4x8x32xbf16>, vector<1x4x8x32xbf16>, vector<1x4x8x32xbf16>, vector<1x4x8x32xbf16>, vector<1x4x8x32xbf16>, vector<1x4x8x32xbf16>, vector<1x4x8x32xbf16> -> vector<8x4x8x32xbf16>
    %46 = vector.shape_cast %45 : vector<8x4x8x32xbf16> to vector<32x8x32xbf16>
    %47 = vector.extract_strided_slice %26 {offsets = [0, 0, 0], sizes = [4, 16, 32], strides = [1, 1, 1]} : vector<4x16x256xbf16> to vector<4x16x32xbf16>
    %48 = vector.extract_strided_slice %26 {offsets = [0, 0, 32], sizes = [4, 16, 32], strides = [1, 1, 1]} : vector<4x16x256xbf16> to vector<4x16x32xbf16>
    %49 = vector.extract_strided_slice %26 {offsets = [0, 0, 64], sizes = [4, 16, 32], strides = [1, 1, 1]} : vector<4x16x256xbf16> to vector<4x16x32xbf16>
    %50 = vector.extract_strided_slice %26 {offsets = [0, 0, 96], sizes = [4, 16, 32], strides = [1, 1, 1]} : vector<4x16x256xbf16> to vector<4x16x32xbf16>
    %51 = vector.extract_strided_slice %26 {offsets = [0, 0, 128], sizes = [4, 16, 32], strides = [1, 1, 1]} : vector<4x16x256xbf16> to vector<4x16x32xbf16>
    %52 = vector.extract_strided_slice %26 {offsets = [0, 0, 160], sizes = [4, 16, 32], strides = [1, 1, 1]} : vector<4x16x256xbf16> to vector<4x16x32xbf16>
    %53 = vector.extract_strided_slice %26 {offsets = [0, 0, 192], sizes = [4, 16, 32], strides = [1, 1, 1]} : vector<4x16x256xbf16> to vector<4x16x32xbf16>
    %54 = vector.extract_strided_slice %26 {offsets = [0, 0, 224], sizes = [4, 16, 32], strides = [1, 1, 1]} : vector<4x16x256xbf16> to vector<4x16x32xbf16>
    %55 = vector.shape_cast %47 : vector<4x16x32xbf16> to vector<1x4x16x32xbf16>
    %56 = vector.shape_cast %48 : vector<4x16x32xbf16> to vector<1x4x16x32xbf16>
    %57 = vector.shape_cast %49 : vector<4x16x32xbf16> to vector<1x4x16x32xbf16>
    %58 = vector.shape_cast %50 : vector<4x16x32xbf16> to vector<1x4x16x32xbf16>
    %59 = vector.shape_cast %51 : vector<4x16x32xbf16> to vector<1x4x16x32xbf16>
    %60 = vector.shape_cast %52 : vector<4x16x32xbf16> to vector<1x4x16x32xbf16>
    %61 = vector.shape_cast %53 : vector<4x16x32xbf16> to vector<1x4x16x32xbf16>
    %62 = vector.shape_cast %54 : vector<4x16x32xbf16> to vector<1x4x16x32xbf16>
    %63 = tpu.concatenate %55, %56, %57, %58, %59, %60, %61, %62 in 0 : vector<1x4x16x32xbf16>, vector<1x4x16x32xbf16>, vector<1x4x16x32xbf16>, vector<1x4x16x32xbf16>, vector<1x4x16x32xbf16>, vector<1x4x16x32xbf16>, vector<1x4x16x32xbf16>, vector<1x4x16x32xbf16> -> vector<8x4x16x32xbf16>
    %64 = vector.shape_cast %63 : vector<8x4x16x32xbf16> to vector<32x16x32xbf16>
    %65 = vector.extract_strided_slice %28 {offsets = [0, 0, 0], sizes = [4, 16, 32], strides = [1, 1, 1]} : vector<4x16x256xbf16> to vector<4x16x32xbf16>
    %66 = vector.extract_strided_slice %28 {offsets = [0, 0, 32], sizes = [4, 16, 32], strides = [1, 1, 1]} : vector<4x16x256xbf16> to vector<4x16x32xbf16>
    %67 = vector.extract_strided_slice %28 {offsets = [0, 0, 64], sizes = [4, 16, 32], strides = [1, 1, 1]} : vector<4x16x256xbf16> to vector<4x16x32xbf16>
    %68 = vector.extract_strided_slice %28 {offsets = [0, 0, 96], sizes = [4, 16, 32], strides = [1, 1, 1]} : vector<4x16x256xbf16> to vector<4x16x32xbf16>
    %69 = vector.extract_strided_slice %28 {offsets = [0, 0, 128], sizes = [4, 16, 32], strides = [1, 1, 1]} : vector<4x16x256xbf16> to vector<4x16x32xbf16>
    %70 = vector.extract_strided_slice %28 {offsets = [0, 0, 160], sizes = [4, 16, 32], strides = [1, 1, 1]} : vector<4x16x256xbf16> to vector<4x16x32xbf16>
    %71 = vector.extract_strided_slice %28 {offsets = [0, 0, 192], sizes = [4, 16, 32], strides = [1, 1, 1]} : vector<4x16x256xbf16> to vector<4x16x32xbf16>
    %72 = vector.extract_strided_slice %28 {offsets = [0, 0, 224], sizes = [4, 16, 32], strides = [1, 1, 1]} : vector<4x16x256xbf16> to vector<4x16x32xbf16>
    %73 = vector.shape_cast %65 : vector<4x16x32xbf16> to vector<1x4x16x32xbf16>
    %74 = vector.shape_cast %66 : vector<4x16x32xbf16> to vector<1x4x16x32xbf16>
    %75 = vector.shape_cast %67 : vector<4x16x32xbf16> to vector<1x4x16x32xbf16>
    %76 = vector.shape_cast %68 : vector<4x16x32xbf16> to vector<1x4x16x32xbf16>
    %77 = vector.shape_cast %69 : vector<4x16x32xbf16> to vector<1x4x16x32xbf16>
    %78 = vector.shape_cast %70 : vector<4x16x32xbf16> to vector<1x4x16x32xbf16>
    %79 = vector.shape_cast %71 : vector<4x16x32xbf16> to vector<1x4x16x32xbf16>
    %80 = vector.shape_cast %72 : vector<4x16x32xbf16> to vector<1x4x16x32xbf16>
    %81 = tpu.concatenate %73, %74, %75, %76, %77, %78, %79, %80 in 0 : vector<1x4x16x32xbf16>, vector<1x4x16x32xbf16>, vector<1x4x16x32xbf16>, vector<1x4x16x32xbf16>, vector<1x4x16x32xbf16>, vector<1x4x16x32xbf16>, vector<1x4x16x32xbf16>, vector<1x4x16x32xbf16> -> vector<8x4x16x32xbf16>
    %82 = vector.shape_cast %81 : vector<8x4x16x32xbf16> to vector<32x16x32xbf16>
    "tpu.trace_start"() <{level = 10 : i32, message = "bqd,bkd->bqk"}> : () -> ()
    %cst_23 = arith.constant dense<0.000000e+00> : vector<32x8x16xf32>
    %83 = tpu.matmul %46, %64, %cst_23 {dimension_numbers = #tpu.dot_dimension_numbers<[2], [2], [1], [1], [0, 0, 0, 1, 1, 1], [0], [0]>} : vector<32x8x32xbf16>, vector<32x16x32xbf16>, vector<32x8x16xf32> -> vector<32x8x16xf32>
    "tpu.trace_stop"() : () -> ()
    %84 = tpu.iota {dimensions = array<i32: 0>} : vector<8x16xi32>
    %85 = tpu.iota {dimensions = array<i32: 1>} : vector<8x16xi32>
    %86 = arith.cmpi sgt, %85, %84 : vector<8x16xi32>
    %87 = vector.shape_cast %86 : vector<8x16xi1> to vector<1x8x16xi1>
    %cst_24 = arith.constant -1.000000e+30 : f32
    %88 = vector.shape_cast %87 : vector<1x8x16xi1> to vector<1x8x16xi1>
    %89 = vector.broadcast %88 : vector<1x8x16xi1> to vector<32x8x16xi1>
    %90 = vector.broadcast %cst_24 : f32 to vector<32x8x16xf32>
    %91 = arith.select %89, %90, %83 : vector<32x8x16xi1>, vector<32x8x16xf32>
    %cst_25 = arith.constant dense<0xFF800000> : vector<32x8xf32>
    %92 = vector.multi_reduction <maximumf>, %91, %cst_25 [2] : vector<32x8x16xf32> to vector<32x8xf32>
    %93 = vector.shape_cast %92 : vector<32x8xf32> to vector<32x8x1xf32>
    %94 = vector.broadcast %93 : vector<32x8x1xf32> to vector<32x8x16xf32>
    %95 = arith.subf %91, %94 : vector<32x8x16xf32>
    %96 = math.exp %95 : vector<32x8x16xf32>
    %cst_26 = arith.constant dense<0.000000e+00> : vector<32x8xf32>
    %97 = vector.multi_reduction <add>, %96, %cst_26 [2] : vector<32x8x16xf32> to vector<32x8xf32>
    %98 = vector.shape_cast %97 : vector<32x8xf32> to vector<32x8x1xf32>
    %99 = tpu.reciprocal %98 {approx = true} : vector<32x8x1xf32> -> vector<32x8x1xf32>
    %100 = vector.broadcast %99 : vector<32x8x1xf32> to vector<32x8x16xf32>
    %101 = arith.mulf %96, %100 : vector<32x8x16xf32>
    %102 = arith.truncf %101 : vector<32x8x16xf32> to vector<32x8x16xbf16>
    "tpu.trace_start"() <{level = 10 : i32, message = "bqk,bkd->bqd"}> : () -> ()
    %cst_27 = arith.constant dense<0.000000e+00> : vector<32x8x32xf32>
    %103 = tpu.matmul %102, %82, %cst_27 {dimension_numbers = #tpu.dot_dimension_numbers<[2], [1], [1], [2], [0, 0, 0, 1, 1, 2], [0], [0]>} : vector<32x8x16xbf16>, vector<32x16x32xbf16>, vector<32x8x32xf32> -> vector<32x8x32xf32>
    "tpu.trace_stop"() : () -> ()
    %104 = vector.shape_cast %103 : vector<32x8x32xf32> to vector<8x32x32xf32>
    %105 = arith.truncf %104 : vector<8x32x32xf32> to vector<8x32x32xbf16>
    %c0_28 = arith.constant 0 : index
    %c0_29 = arith.constant 0 : index
    %c0_30 = arith.constant 0 : index
    %106 = vector.load %arg10[%c0_28, %c0_29, %c0_30] : memref<8x32x256xbf16, #tpu.memory_space<vmem>>, vector<8x32x256xbf16>
    "tpu.trace_start"() <{level = 10 : i32, message = "hmd,hdn->hmn"}> : () -> ()
    %cst_31 = arith.constant dense<0.000000e+00> : vector<8x32x256xf32>
    %107 = tpu.matmul %105, %106, %cst_31 {dimension_numbers = #tpu.dot_dimension_numbers<[2], [1], [1], [2], [0, 0, 0, 1, 1, 2], [0], [0]>} : vector<8x32x32xbf16>, vector<8x32x256xbf16>, vector<8x32x256xf32> -> vector<8x32x256xf32>
    "tpu.trace_stop"() : () -> ()
    %cst_32 = arith.constant dense<0.000000e+00> : vector<32x256xf32>
    %108 = vector.multi_reduction <add>, %107, %cst_32 [0] : vector<8x32x256xf32> to vector<32x256xf32>
    %c0_33 = arith.constant 0 : index
    %c0_34 = arith.constant 0 : index
    %109 = vector.load %arg11[%c0_33, %c0_34] : memref<1x256xf32, #tpu.memory_space<vmem>>, vector<1x256xf32>
    %110 = vector.broadcast %109 : vector<1x256xf32> to vector<32x256xf32>
    %111 = arith.addf %108, %110 : vector<32x256xf32>
    %112 = vector.shape_cast %111 : vector<32x256xf32> to vector<4x8x256xf32>
    %113 = arith.truncf %112 : vector<4x8x256xf32> to vector<4x8x256xbf16>
    %c0_35 = arith.constant 0 : index
    %c0_36 = arith.constant 0 : index
    %c0_37 = arith.constant 0 : index
    %114 = vector.load %arg12[%c0_35, %c0_36, %c0_37] : memref<4x8x256xbf16, #tpu.memory_space<vmem>>, vector<4x8x256xbf16>
    tpu.vector_store %arg12[%c0_35, %c0_36, %c0_37], %113 {strides = array<i32>} : memref<4x8x256xbf16, #tpu.memory_space<vmem>>, vector<4x8x256xbf16>,
    return
  }
  func.func @transform_0(%arg0: i32) -> (i32, i32, i32) {
    %c0_i32 = arith.constant 0 : i32
    %c0_i32_0 = arith.constant 0 : i32
    %c0_i32_1 = arith.constant 0 : i32
    return %arg0, %c0_i32, %c0_i32_0 : i32, i32, i32
  }
  func.func @transform_1(%arg0: i32) -> (i32, i32, i32) {
    %c0_i32 = arith.constant 0 : i32
    %c0_i32_0 = arith.constant 0 : i32
    %c0_i32_1 = arith.constant 0 : i32
    return %arg0, %c0_i32, %c0_i32_0 : i32, i32, i32
  }
  func.func @transform_2(%arg0: i32) -> (i32, i32, i32) {
    %c0_i32 = arith.constant 0 : i32
    %c0_i32_0 = arith.constant 0 : i32
    %c0_i32_1 = arith.constant 0 : i32
    return %arg0, %c0_i32, %c0_i32_0 : i32, i32, i32
  }
  func.func @transform_3(%arg0: i32) -> (i32, i32) {
    %c0_i32 = arith.constant 0 : i32
    %c0_i32_0 = arith.constant 0 : i32
    %c0_i32_1 = arith.constant 0 : i32
    return %c0_i32, %c0_i32_0 : i32, i32
  }
  func.func @transform_4(%arg0: i32) -> (i32, i32) {
    %c0_i32 = arith.constant 0 : i32
    %c0_i32_0 = arith.constant 0 : i32
    %c0_i32_1 = arith.constant 0 : i32
    return %c0_i32, %c0_i32_0 : i32, i32
  }
  func.func @transform_5(%arg0: i32) -> (i32, i32) {
    %c0_i32 = arith.constant 0 : i32
    %c0_i32_0 = arith.constant 0 : i32
    %c0_i32_1 = arith.constant 0 : i32
    return %c0_i32, %c0_i32_0 : i32, i32
  }
  func.func @transform_6(%arg0: i32) -> (i32, i32) {
    %c0_i32 = arith.constant 0 : i32
    %c0_i32_0 = arith.constant 0 : i32
    %c0_i32_1 = arith.constant 0 : i32
    return %c0_i32, %c0_i32_0 : i32, i32
  }
  func.func @transform_7(%arg0: i32) -> (i32, i32) {
    %c0_i32 = arith.constant 0 : i32
    %c0_i32_0 = arith.constant 0 : i32
    %c0_i32_1 = arith.constant 0 : i32
    return %c0_i32, %c0_i32_0 : i32, i32
  }
  func.func @transform_8(%arg0: i32) -> (i32, i32) {
    %c0_i32 = arith.constant 0 : i32
    %c0_i32_0 = arith.constant 0 : i32
    %c0_i32_1 = arith.constant 0 : i32
    return %c0_i32, %c0_i32_0 : i32, i32
  }
  func.func @transform_9(%arg0: i32) -> (i32, i32, i32) {
    %c0_i32 = arith.constant 0 : i32
    %c0_i32_0 = arith.constant 0 : i32
    %c0_i32_1 = arith.constant 0 : i32
    %c0_i32_2 = arith.constant 0 : i32
    return %c0_i32, %c0_i32_0, %c0_i32_1 : i32, i32, i32
  }
  func.func @transform_10(%arg0: i32) -> (i32, i32) {
    %c0_i32 = arith.constant 0 : i32
    %c0_i32_0 = arith.constant 0 : i32
    %c0_i32_1 = arith.constant 0 : i32
    return %c0_i32, %c0_i32_0 : i32, i32
  }
  func.func @transform_11(%arg0: i32) -> (i32, i32, i32) {
    %c0_i32 = arith.constant 0 : i32
    %c0_i32_0 = arith.constant 0 : i32
    %c0_i32_1 = arith.constant 0 : i32
    return %arg0, %c0_i32, %c0_i32_0 : i32, i32, i32
  }
}

</mosaic_0001>

<bundles_post_ra>
// kernel: tpu_custom_call.1
= control target key start
LH: loop header
LB: loop body
LE: loop exit
PB: predicated region body
PF: predicated region fallthrough
CT: control target
= control target key end

     0   :  { %16 = vsyncpa [#allocation3], 0  ;;  %s7808_s0 = inlined_call_operand.hbm [shape: bf16[4,8,128], index: 0, kind: input, shape index: {}]   ;;  %s7809_s1 = inlined_call_operand.hbm [shape: bf16[4,16,256], index: 1, kind: input, shape index: {}]   ;;  %s7810_s2 = inlined_call_operand.hbm [shape: bf16[4,16,256], index: 2, kind: input, shape index: {}]   ;;  %s7811_s3 = inlined_call_operand.hbm [shape: bf16[128,256], index: 3, kind: input, shape index: {}]   ;;  %s7812_s4 = inlined_call_operand.vmem [shape: f32[1,256], index: 4, kind: input, shape index: {}]   ;;  %s7813_s5 = inlined_call_operand.hbm [shape: bf16[256,256], index: 5, kind: input, shape index: {}]   ;;  %s7814_s6 = inlined_call_operand.vmem [shape: f32[1,256], index: 6, kind: input, shape index: {}]   ;;  %s7815_s7 = inlined_call_operand.hbm [shape: bf16[256,256], index: 7, kind: input, shape index: {}]   ;;  %s7816_s8 = inlined_call_operand.vmem [shape: f32[1,256], index: 8, kind: input, shape index: {}]   ;;  %s7817_s9 = inlined_call_operand.hbm [shape: bf16[8,32,256], index: 9, kind: input, shape index: {}]   ;;  %s7818_s10 = inlined_call_operand.vmem [shape: f32[1,256], index: 10, kind: input, shape index: {}]   ;;  %s7819_s11 = inlined_call_operand.hbm [shape: bf16[4,8,256], index: 11, kind: output, shape index: {}]  }
   0x1   :  { %17 = vsyncpa [#allocation6], 0 }
   0x2   :  { %18 = vsyncpa [#allocation9], 0 }
   0x3   :  { %19 = vsyncpa [#allocation12], 0 }
   0x4   :  { %20 = vsyncpa [#allocation4], 0  ;;  %s6582_s17 = smov [#allocation5]   ;;  %s6396_s21 = scalar_lea.hbm %s7809_s1, 1024 }
   0x5   :  { %s38_s18 = sshll.u32 %s6582_s17, 4  ;;  %p6397_p0 = scmp.ne.s32.totalorder %s7809_s1, %s6396_s21  ;;  %s39_s18 = int_to_ptr.vmem [resolvable:$true] %s38_s18 }
   0x6   :  { %p6400_p1 = scmp.lt.u32.totalorder %s6396_s21, %s7809_s1 }
   0x8   :  { %p6402_p2 = pnand %p6400_p1, %p6397_p0 }
   0xa   :  { %6405 = shalt.err (!%p6402_p2)
}
   0xb   :  { %s6406_s26 = scalar_lea.vmem %s39_s18, 1024  ;;  %p6411_p4 = scmp.lt.s32.totalorder %s39_s18, %s39_s18 }
   0xc   :  { %p6407_p3 = scmp.ne.s32.totalorder %s39_s18, %s6406_s26  ;;  %p6412_p5 = scmp.lt.s32.totalorder %s6406_s26, %s6406_s26 }
   0xe   :  { %p6413_p6 = por %p6412_p5, %p6411_p4 }
  0x10   :  { %p6414_p7 = pnand %p6413_p6, %p6407_p3 }
  0x12   :  { %6417 = shalt.err (!%p6414_p7)
}
  0x13   :  { %s6583_s27 = smov 128   ;;  %s6584_s28 = smov 8  }
  0x14   :  { %44 = dma.hbm_to_vmem [thread:$0]  %s7809_s1, 1024, %s39_s18, [#allocation6], %s6583_s27, %s6583_s27, %s6584_s28  }
  0x15   :  { %s6585_s12 = smov [#allocation8]   ;;  %s6586_s14 = smov [#allocation11]  }
  0x16   :  { %s62_s13 = sshll.u32 %s6585_s12, 4  ;;  %s90_s15 = sshll.u32 %s6586_s14, 4  ;;  %s63_s13 = int_to_ptr.vmem [resolvable:$true] %s62_s13  ;;  %s91_s15 = int_to_ptr.vmem [resolvable:$true] %s90_s15 }
  0x17   :  { %s6418_s19 = scalar_lea.hbm %s7811_s3, 2048 }
  0x18   :  { %p6419_p8 = scmp.ne.s32.totalorder %s7811_s3, %s6418_s19  ;;  %p6422_p9 = scmp.lt.u32.totalorder %s6418_s19, %s7811_s3 }
  0x1a   :  { %p6424_p10 = pnand %p6422_p9, %p6419_p8 }
  0x1c   :  { %6427 = shalt.err (!%p6424_p10)
}
  0x1d   :  { %s6428_s1 = scalar_lea.vmem %s63_s13, 2048  ;;  %p6433_p12 = scmp.lt.s32.totalorder %s63_s13, %s63_s13 }
  0x1e   :  { %p6429_p11 = scmp.ne.s32.totalorder %s63_s13, %s6428_s1  ;;  %p6434_p13 = scmp.lt.s32.totalorder %s6428_s1, %s6428_s1 }
  0x20   :  { %p6435_p0 = por %p6434_p13, %p6433_p12 }
  0x22   :  { %p6436_p1 = pnand %p6435_p0, %p6429_p11 }
  0x24   :  { %6439 = shalt.err (!%p6436_p1)
}
  0x25   :  { %68 = dma.hbm_to_vmem [thread:$0]  %s7811_s3, 2048, %s63_s13, [#allocation9], %s6583_s27, %s6583_s27, %s6584_s28  }
  0x26   :  { %s6440_s29 = scalar_lea.hbm %s7815_s7, 4096 }
  0x27   :  { %p6441_p2 = scmp.ne.s32.totalorder %s7815_s7, %s6440_s29  ;;  %p6444_p3 = scmp.lt.u32.totalorder %s6440_s29, %s7815_s7 }
  0x29   :  { %p6446_p4 = pnand %p6444_p3, %p6441_p2 }
  0x2b   :  { %6449 = shalt.err (!%p6446_p4)
}
  0x2c   :  { %s6450_s17 = scalar_lea.vmem %s91_s15, 4096  ;;  %p6455_p6 = scmp.lt.s32.totalorder %s91_s15, %s91_s15 }
  0x2d   :  { %p6451_p5 = scmp.ne.s32.totalorder %s91_s15, %s6450_s17  ;;  %p6456_p7 = scmp.lt.s32.totalorder %s6450_s17, %s6450_s17 }
  0x2f   :  { %p6457_p8 = por %p6456_p7, %p6455_p6 }
  0x31   :  { %p6458_p9 = pnand %p6457_p8, %p6451_p5 }
  0x33   :  { %6461 = shalt.err (!%p6458_p9)
}
  0x34   :  { %96 = dma.hbm_to_vmem [thread:$0]  %s7815_s7, 4096, %s91_s15, [#allocation12], %s6583_s27, %s6583_s27, %s6584_s28  }
  0x35   :  { %s6587_s19 = smov [#allocation2]   ;;  %s6462_s23 = scalar_lea.hbm %s7808_s0, 256 }
  0x36   :  { %s26_s20 = sshll.u32 %s6587_s19, 4  ;;  %p6463_p10 = scmp.ne.s32.totalorder %s7808_s0, %s6462_s23  ;;  %s27_s20 = int_to_ptr.vmem [resolvable:$true] %s26_s20 }
  0x37   :  { %p6466_p11 = scmp.lt.u32.totalorder %s6462_s23, %s7808_s0 }
  0x39   :  { %p6468_p12 = pnand %p6466_p11, %p6463_p10 }
  0x3b   :  { %6471 = shalt.err (!%p6468_p12)
}
  0x3c   :  { %s6472_s26 = scalar_lea.vmem %s27_s20, 256  ;;  %p6477_p0 = scmp.lt.s32.totalorder %s27_s20, %s27_s20 }
  0x3d   :  { %p6473_p13 = scmp.ne.s32.totalorder %s27_s20, %s6472_s26  ;;  %p6478_p1 = scmp.lt.s32.totalorder %s6472_s26, %s6472_s26 }
  0x3f   :  { %p6479_p2 = por %p6478_p1, %p6477_p0 }
  0x41   :  { %p6480_p3 = pnand %p6479_p2, %p6473_p13 }
  0x43   :  { %6483 = shalt.err (!%p6480_p3)
}
  0x44   :  { %s6588_s7 = smov 64   ;;  %s6589_s15 = smov 4  }
  0x45   :  { %32 = dma.hbm_to_vmem [thread:$0]  %s7808_s0, 256, %s27_s20, [#allocation3], %s6588_s7, %s6588_s7, %s6589_s15  }
  0x46   :  { %s6590_s12 = smov [#allocation7]   ;;  %s6591_s16 = smov [#allocation10]  }
  0x47   :  { %s50_s14 = sshll.u32 %s6590_s12, 4  ;;  %s76_s17 = sshll.u32 %s6591_s16, 4  ;;  %s51_s14 = int_to_ptr.vmem [resolvable:$true] %s50_s14  ;;  %s6718_s17 = int_to_ptr.vmem [resolvable:$true] %s76_s17 }
  0x48   :  { %s6484_s19 = scalar_lea.hbm %s7810_s2, 1024 }
  0x49   :  { %p6485_p4 = scmp.ne.s32.totalorder %s7810_s2, %s6484_s19  ;;  %p6488_p5 = scmp.lt.u32.totalorder %s6484_s19, %s7810_s2 }
  0x4b   :  { %p6490_p6 = pnand %p6488_p5, %p6485_p4 }
  0x4d   :  { %6493 = shalt.err (!%p6490_p6)
}
  0x4e   :  { %s6494_s0 = scalar_lea.vmem %s51_s14, 1024  ;;  %p6499_p8 = scmp.lt.s32.totalorder %s51_s14, %s51_s14 }
  0x4f   :  { %p6495_p7 = scmp.ne.s32.totalorder %s51_s14, %s6494_s0  ;;  %p6500_p9 = scmp.lt.s32.totalorder %s6494_s0, %s6494_s0 }
  0x51   :  { %p6501_p10 = por %p6500_p9, %p6499_p8 }
  0x53   :  { %p6502_p11 = pnand %p6501_p10, %p6495_p7 }
  0x55   :  { %6505 = shalt.err (!%p6502_p11)
}
  0x56   :  { %56 = dma.hbm_to_vmem [thread:$0]  %s7810_s2, 1024, %s51_s14, [#allocation6], %s6583_s27, %s6583_s27, %s6584_s28  }
  0x57   :  { %s6506_s26 = scalar_lea.hbm %s7813_s5, 4096 }
  0x58   :  { %p6507_p12 = scmp.ne.s32.totalorder %s7813_s5, %s6506_s26  ;;  %p6510_p13 = scmp.lt.u32.totalorder %s6506_s26, %s7813_s5 }
  0x5a   :  { %p6512_p0 = pnand %p6510_p13, %p6507_p12 }
  0x5c   :  { %6515 = shalt.err (!%p6512_p0)
}
  0x5d   :  { %s6516_s16 = scalar_lea.vmem %s6718_s17, 4096  ;;  %p6521_p2 = scmp.lt.s32.totalorder %s6718_s17, %s6718_s17 }
  0x5e   :  { %p6517_p1 = scmp.ne.s32.totalorder %s6718_s17, %s6516_s16  ;;  %p6522_p3 = scmp.lt.s32.totalorder %s6516_s16, %s6516_s16 }
  0x60   :  { %p6523_p4 = por %p6522_p3, %p6521_p2 }
  0x62   :  { %p6524_p5 = pnand %p6523_p4, %p6517_p1 }
  0x64   :  { %6527 = shalt.err (!%p6524_p5)
}
  0x65   :  { %82 = dma.hbm_to_vmem [thread:$0]  %s7813_s5, 4096, %s6718_s17, [#allocation9], %s6583_s27, %s6583_s27, %s6584_s28  }
  0x66   :  { %s6592_s3 = smov [#allocation13]   ;;  %s6528_s22 = scalar_lea.hbm %s7817_s9, 4096 }
  0x67   :  { %s104_s13 = sshll.u32 %s6592_s3, 4  ;;  %p6529_p6 = scmp.ne.s32.totalorder %s7817_s9, %s6528_s22  ;;  %s105_s13 = int_to_ptr.vmem [resolvable:$true] %s104_s13 }
  0x68   :  { %p6532_p7 = scmp.lt.u32.totalorder %s6528_s22, %s7817_s9 }
  0x6a   :  { %p6534_p8 = pnand %p6532_p7, %p6529_p6 }
  0x6c   :  { %6537 = shalt.err (!%p6534_p8)
}
  0x6d   :  { %s6538_s18 = scalar_lea.vmem %s105_s13, 4096  ;;  %p6543_p10 = scmp.lt.s32.totalorder %s105_s13, %s105_s13 }
  0x6e   :  { %p6539_p9 = scmp.ne.s32.totalorder %s105_s13, %s6538_s18  ;;  %p6544_p11 = scmp.lt.s32.totalorder %s6538_s18, %s6538_s18 }
  0x70   :  { %p6545_p12 = por %p6544_p11, %p6543_p10 }
  0x72   :  { %p6546_p13 = pnand %p6545_p12, %p6539_p9 }
  0x74   :  { %6549 = shalt.err (!%p6546_p13)
}
  0x75   :  { %110 = dma.hbm_to_vmem [thread:$0]  %s7817_s9, 4096, %s105_s13, [#allocation12], %s6583_s27, %s6583_s27, %s6584_s28  }
  0x76   :  { %6572 = dma.done.wait [#allocation3], 256  }
  0x77   :  { %6573 = vsyncadd [#allocation3], 4294967040 }
  0x78   :  { %6574 = dma.done.wait [#allocation6], 2048  }
  0x79   :  { %6575 = vsyncadd [#allocation6], 4294965248 }
  0x7a   :  { %6576 = dma.done.wait [#allocation9], 6144  }
  0x7b   :  { %6577 = vsyncadd [#allocation9], 4294961152 }
  0x7c   :  { %6578 = dma.done.wait [#allocation12], 8192  }
  0x7d   :  { %6579 = vsyncadd [#allocation12], 4294959104  ;;  %v7820_v0 = vmov 0   ;;  %v6074_v1 = vld [vmem:[#allocation10 + $0x4] ss:$8 sps:$4 sm:$0xff]   ;;  %v6151_v43 = vld [vmem:[#allocation2] sm:$0xff]  }
  0x7e   :  { %307 = vmatprep.mubr.bf16.mxu0 %v7820_v0  ;;  %v6076_v2 = vld [vmem:[#allocation10] ss:$8 sps:$4 sm:$0xff]   ;;  %580 = vmatprep.subr.bf16.mxu1 %v6074_v1  ;;  %v6077_v3 = vld [vmem:[#allocation10 + $0x14] ss:$8 sps:$4 sm:$0xff]   ;;  %v6079_v4 = vld [vmem:[#allocation10 + $0x10] ss:$8 sps:$4 sm:$0xff]  }
  0x7f   :  { %581 = vmatpush1.bf16.msra.mxu1 %v6076_v2  ;;  %v6080_v5 = vld [vmem:[#allocation10 + $0x24] ss:$8 sps:$4 sm:$0xff]   ;;  %v6082_v6 = vld [vmem:[#allocation10 + $0x20] ss:$8 sps:$4 sm:$0xff]   ;;  %v6083_v7 = vld [vmem:[#allocation10 + $0x34] ss:$8 sps:$4 sm:$0xff]  }
  0x80   :  { %582 = vmatprep.subr.bf16.mxu1 %v6077_v3  ;;  %v6085_v8 = vld [vmem:[#allocation10 + $0x30] ss:$8 sps:$4 sm:$0xff]   ;;  %v6086_v9 = vld [vmem:[#allocation10 + $0x44] ss:$8 sps:$4 sm:$0xff]   ;;  %v6088_v11 = vld [vmem:[#allocation10 + $0x40] ss:$8 sps:$4 sm:$0xff]  }
  0x81   :  { %v6104_v10 = vld [vmem:[#allocation8 + $0x4] ss:$8 sps:$4 sm:$0xff]   ;;  %v6089_v12 = vld [vmem:[#allocation10 + $0x54] ss:$8 sps:$4 sm:$0xff]   ;;  %v6108_v13 = vld [vmem:[#allocation8] ss:$8 sps:$4 sm:$0xff]  }
  0x82   :  { %275 = vmatprep.subr.bf16.mxu0 %v6104_v10  ;;  %v6110_v14 = vld [vmem:[#allocation8 + $0x14] ss:$8 sps:$4 sm:$0xff]   ;;  %v6091_v15 = vld [vmem:[#allocation10 + $0x50] ss:$8 sps:$4 sm:$0xff]   ;;  %v6116_v17 = vld [vmem:[#allocation8 + $0x24] ss:$8 sps:$4 sm:$0xff]  }
  0x83   :  { %583 = vmatpush1.bf16.msra.mxu1 %v6079_v4  ;;  %276 = vmatpush1.bf16.msra.mxu0 %v6108_v13  ;;  %v6114_v16 = vld [vmem:[#allocation8 + $0x10] ss:$8 sps:$4 sm:$0xff]   ;;  %v6092_v18 = vld [vmem:[#allocation10 + $0x64] ss:$8 sps:$4 sm:$0xff]   ;;  %v6120_v19 = vld [vmem:[#allocation8 + $0x20] ss:$8 sps:$4 sm:$0xff]  }
  0x84   :  { %584 = vmatprep.subr.bf16.mxu1 %v6080_v5  ;;  %277 = vmatprep.subr.bf16.mxu0 %v6110_v14  ;;  %v6122_v20 = vld [vmem:[#allocation8 + $0x34] ss:$8 sps:$4 sm:$0xff]   ;;  %v6094_v21 = vld [vmem:[#allocation10 + $0x60] ss:$8 sps:$4 sm:$0xff]   ;;  %v6126_v23 = vld [vmem:[#allocation8 + $0x30] ss:$8 sps:$4 sm:$0xff]  }
  0x85   :  { %v6095_v22 = vld [vmem:[#allocation10 + $0x74] ss:$8 sps:$4 sm:$0xff]   ;;  %v6128_v24 = vld [vmem:[#allocation8 + $0x44] ss:$8 sps:$4 sm:$0xff]   ;;  %v6097_v25 = vld [vmem:[#allocation10 + $0x70] ss:$8 sps:$4 sm:$0xff]  }
  0x86   :  { %v6098_v26 = vld [vmem:[#allocation10 + $0x84] ss:$8 sps:$4 sm:$0xff]   ;;  %v6132_v27 = vld [vmem:[#allocation8 + $0x40] ss:$8 sps:$4 sm:$0xff]   ;;  %v6134_v28 = vld [vmem:[#allocation8 + $0x54] ss:$8 sps:$4 sm:$0xff]  }
  0x87   :  { %585 = vmatpush1.bf16.msra.mxu1 %v6082_v6  ;;  %278 = vmatpush1.bf16.msra.mxu0 %v6114_v16  ;;  %v6142_v29 = vld [vmem:[#allocation5 + $0x4] ss:$8 sps:$4 sm:$0xff]   ;;  %v6100_v30 = vld [vmem:[#allocation10 + $0x80] ss:$8 sps:$4 sm:$0xff]   ;;  %v6101_v31 = vld [vmem:[#allocation10 + $0x94] ss:$8 sps:$4 sm:$0xff]  }
  0x88   :  { %586 = vmatprep.subr.bf16.mxu1 %v6083_v7  ;;  %279 = vmatprep.subr.bf16.mxu0 %v6116_v17  ;;  %v6138_v32 = vld [vmem:[#allocation8 + $0x50] ss:$8 sps:$4 sm:$0xff]   ;;  %v6143_v33 = vld [vmem:[#allocation8 + $0x64] ss:$8 sps:$4 sm:$0xff]   ;;  %v6145_v36 = vld [vmem:[#allocation8 + $0x60] ss:$8 sps:$4 sm:$0xff]  }
  0x89   :  { %612 = vmatprep.mubr.bf16.mxu1 %v6142_v29  ;;  %v6103_v34 = vld [vmem:[#allocation10 + $0x90] ss:$8 sps:$4 sm:$0xff]   ;;  %v6106_v35 = vld [vmem:[#allocation10 + $0xa4] ss:$8 sps:$4 sm:$0xff]   ;;  %v6146_v37 = vld [vmem:[#allocation8 + $0x74] ss:$8 sps:$4 sm:$0xff]  }
  0x8a   :  { %v6109_v38 = vld [vmem:[#allocation10 + $0xa0] ss:$8 sps:$4 sm:$0xff]   ;;  %v6112_v39 = vld [vmem:[#allocation10 + $0xb4] ss:$8 sps:$4 sm:$0xff]   ;;  %v6148_v40 = vld [vmem:[#allocation8 + $0x70] ss:$8 sps:$4 sm:$0xff]  }
  0x8b   :  { %587 = vmatpush1.bf16.msra.mxu1 %v6085_v8  ;;  %280 = vmatpush1.bf16.msra.mxu0 %v6120_v19  ;;  %v6115_v41 = vld [vmem:[#allocation10 + $0xb0] ss:$8 sps:$4 sm:$0xff]   ;;  %v6118_v42 = vld [vmem:[#allocation10 + $0xc4] ss:$8 sps:$4 sm:$0xff]   ;;  %v6121_v44 = vld [vmem:[#allocation10 + $0xc0] ss:$8 sps:$4 sm:$0xff]  }
  0x8c   :  { %588 = vmatprep.subr.bf16.mxu1 %v6086_v9  ;;  %281 = vmatprep.subr.bf16.mxu0 %v6122_v20  ;;  %v6124_v45 = vld [vmem:[#allocation10 + $0xd4] ss:$8 sps:$4 sm:$0xff]   ;;  %v6127_v46 = vld [vmem:[#allocation10 + $0xd0] ss:$8 sps:$4 sm:$0xff]   ;;  %v6130_v47 = vld [vmem:[#allocation10 + $0xe4] ss:$8 sps:$4 sm:$0xff]  }
  0x8d   :  { %v6156_v48 = vld [vmem:[#allocation2 + $0x8] sm:$0xff]   ;;  %v6133_v49 = vld [vmem:[#allocation10 + $0xe0] ss:$8 sps:$4 sm:$0xff]   ;;  %v6162_v52 = vld [vmem:[#allocation11 + $0x4] ss:$8 sps:$4 sm:$0xff]   ;;  %vm6595_vm0 = vmmov 0  }
  0x8e   :  { %v6136_v50 = vld [vmem:[#allocation10 + $0xf4] ss:$8 sps:$4 sm:$0xff]   ;;  %v6139_v51 = vld [vmem:[#allocation10 + $0xf0] ss:$8 sps:$4 sm:$0xff]   ;;  %v6140_v53 = vld [vmem:[#allocation5] ss:$8 sps:$4 sm:$0xff]  }
  0x8f   :  { %589 = vmatpush1.bf16.msra.mxu1 %v6088_v11  ;;  %282 = vmatpush1.bf16.msra.mxu0 %v6126_v23  ;;  %v6149_v54 = vld [vmem:[#allocation5 + $0x14] ss:$8 sps:$4 sm:$0xff]   ;;  %v6160_v55 = vld [vmem:[#allocation11] ss:$8 sps:$4 sm:$0xff]   ;;  %v6163_v57 = vld [vmem:[#allocation11 + $0x10] ss:$8 sps:$4 sm:$0xff]  }
  0x90   :  { %590 = vmatprep.subr.bf16.mxu1 %v6089_v12  ;;  %283 = vmatprep.subr.bf16.mxu0 %v6128_v24  ;;  %v6165_v56 = vld [vmem:[#allocation11 + $0x14] ss:$8 sps:$4 sm:$0xff]   ;;  %v6168_v58 = vld [vmem:[#allocation11 + $0x24] ss:$8 sps:$4 sm:$0xff]   ;;  %v6152_v59 = vld [vmem:[#allocation5 + $0x10] ss:$8 sps:$4 sm:$0xff]  }
  0x91   :  { %v6153_v60 = vld [vmem:[#allocation5 + $0x24] ss:$8 sps:$4 sm:$0xff]   ;;  %v6166_v61 = vld [vmem:[#allocation11 + $0x20] ss:$8 sps:$4 sm:$0xff]   ;;  %v6171_v62 = vld [vmem:[#allocation11 + $0x34] ss:$8 sps:$4 sm:$0xff]  }
  0x92   :  { %v6169_v63 = vld [vmem:[#allocation11 + $0x30] ss:$8 sps:$4 sm:$0xff]   ;;  %v6174_v1 = vld [vmem:[#allocation11 + $0x44] ss:$8 sps:$4 sm:$0xff]   ;;  %v6155_v2 = vld [vmem:[#allocation5 + $0x20] ss:$8 sps:$4 sm:$0xff]  }
  0x93   :  { %591 = vmatpush1.bf16.msra.mxu1 %v6091_v15  ;;  %284 = vmatpush1.bf16.msra.mxu0 %v6132_v27  ;;  %v6157_v3 = vld [vmem:[#allocation5 + $0x34] ss:$8 sps:$4 sm:$0xff]   ;;  %v6172_v4 = vld [vmem:[#allocation11 + $0x40] ss:$8 sps:$4 sm:$0xff]   ;;  %v6175_v6 = vld [vmem:[#allocation11 + $0x50] ss:$8 sps:$4 sm:$0xff]  }
  0x94   :  { %592 = vmatprep.subr.bf16.mxu1 %v6092_v18  ;;  %285 = vmatprep.subr.bf16.mxu0 %v6134_v28  ;;  %v6177_v5 = vld [vmem:[#allocation11 + $0x54] ss:$8 sps:$4 sm:$0xff]   ;;  %v6180_v7 = vld [vmem:[#allocation11 + $0x64] ss:$8 sps:$4 sm:$0xff]   ;;  %v6159_v8 = vld [vmem:[#allocation5 + $0x30] ss:$8 sps:$4 sm:$0xff]  }
  0x95   :  { %v6178_v9 = vld [vmem:[#allocation11 + $0x60] ss:$8 sps:$4 sm:$0xff]   ;;  %v6210_v10 = vld [vmem:[#allocation7 + $0x4] ss:$8 sps:$4 sm:$0xff]   ;;  %v6183_v11 = vld [vmem:[#allocation11 + $0x74] ss:$8 sps:$4 sm:$0xff]  }
  0x96   :  { %v6181_v12 = vld [vmem:[#allocation11 + $0x70] ss:$8 sps:$4 sm:$0xff]   ;;  %v6186_v13 = vld [vmem:[#allocation11 + $0x84] ss:$8 sps:$4 sm:$0xff]   ;;  %v6184_v14 = vld [vmem:[#allocation11 + $0x80] ss:$8 sps:$4 sm:$0xff]  }
  0x97   :  { %593 = vmatpush1.bf16.msra.mxu1 %v6094_v21  ;;  %286 = vmatpush1.bf16.msra.mxu0 %v6138_v32  ;;  %v6189_v15 = vld [vmem:[#allocation11 + $0x94] ss:$8 sps:$4 sm:$0xff]   ;;  %v6187_v16 = vld [vmem:[#allocation11 + $0x90] ss:$8 sps:$4 sm:$0xff]   ;;  %v6192_v17 = vld [vmem:[#allocation11 + $0xa4] ss:$8 sps:$4 sm:$0xff]  }
  0x98   :  { %594 = vmatprep.subr.bf16.mxu1 %v6095_v22  ;;  %287 = vmatprep.subr.bf16.mxu0 %v6143_v33  ;;  %v6190_v18 = vld [vmem:[#allocation11 + $0xa0] ss:$8 sps:$4 sm:$0xff]   ;;  %v6195_v19 = vld [vmem:[#allocation11 + $0xb4] ss:$8 sps:$4 sm:$0xff]   ;;  %v6193_v20 = vld [vmem:[#allocation11 + $0xb0] ss:$8 sps:$4 sm:$0xff]  }
  0x99   :  { %v6198_v21 = vld [vmem:[#allocation11 + $0xc4] ss:$8 sps:$4 sm:$0xff]   ;;  %v6196_v22 = vld [vmem:[#allocation11 + $0xc0] ss:$8 sps:$4 sm:$0xff]   ;;  %v6201_v23 = vld [vmem:[#allocation11 + $0xd4] ss:$8 sps:$4 sm:$0xff]  }
  0x9a   :  { %v6199_v24 = vld [vmem:[#allocation11 + $0xd0] ss:$8 sps:$4 sm:$0xff]   ;;  %v6207_v27 = vld [vmem:[#allocation11 + $0xf4] ss:$8 sps:$4 sm:$0xff]   ;;  %v6208_v29 = vld [vmem:[#allocation7] ss:$8 sps:$4 sm:$0xff]  }
  0x9b   :  { %595 = vmatpush1.bf16.msra.mxu1 %v6097_v25  ;;  %288 = vmatpush1.bf16.msra.mxu0 %v6145_v36  ;;  %v6204_v25 = vld [vmem:[#allocation11 + $0xe4] ss:$8 sps:$4 sm:$0xff]   ;;  %v6205_v28 = vld [vmem:[#allocation11 + $0xf0] ss:$8 sps:$4 sm:$0xff]   ;;  %v6216_v33 = vld [vmem:[#allocation7 + $0x20] ss:$8 sps:$4 sm:$0xff]  }
  0x9c   :  { %596 = vmatprep.subr.bf16.mxu1 %v6098_v26  ;;  %289 = vmatprep.subr.bf16.mxu0 %v6146_v37  ;;  %v6202_v26 = vld [vmem:[#allocation11 + $0xe0] ss:$8 sps:$4 sm:$0xff]   ;;  %v6214_v32 = vld [vmem:[#allocation7 + $0x24] ss:$8 sps:$4 sm:$0xff]   ;;  %v7822_v36 = vmov 0.0   ;;  %v173_v37 = vlaneseq  ;;  %vm1186_vm1 = vcmask 261120  }
  0x9d   :  { %vm2698_vm3 = vcmask 130048  }
  0x9f   :  { %597 = vmatpush1.bf16.msra.mxu1 %v6100_v30  ;;  %290 = vmatpush1.bf16.msra.mxu0 %v6148_v40  ;;  %v6211_v30 = vld [vmem:[#allocation7 + $0x14] ss:$8 sps:$4 sm:$0xff]  }
  0xa0   :  { %598 = vmatprep.subr.bf16.mxu1 %v6101_v31  ;;  %v6213_v31 = vld [vmem:[#allocation7 + $0x10] ss:$8 sps:$4 sm:$0xff]   ;;  %5617 = vmatprep.subr.bf16.mxu0 %v7822_v36 }
  0xa2   :  { %308 = vmatmul.mubr.bf16.vlgmr.msra.gmra.mrb[0].mxu0 %v6151_v43 }
  0xa3   :  { %599 = vmatpush1.bf16.msra.mxu1 %v6103_v34  ;;  %317 = vmatprep.mubr.bf16.mxu0 %v7820_v0  ;;  %v6217_v34 = vld [vmem:[#allocation7 + $0x34] ss:$8 sps:$4 sm:$0xff]  }
  0xa4   :  { %600 = vmatprep.subr.bf16.mxu1 %v6106_v35  ;;  %v6219_v35 = vld [vmem:[#allocation7 + $0x30] ss:$8 sps:$4 sm:$0xff]  }
  0xa7   :  { %601 = vmatpush1.bf16.msra.mxu1 %v6109_v38  ;;  %v6779_v38 = vshrl.u32 %v173_v37, 7 }
  0xa8   :  { %602 = vmatprep.subr.bf16.mxu1 %v6112_v39  ;;  %v171_v39 = vld [vmem:[%s7812_s4] sm:$0x3]  ;;  %s6596_s4 = smov 96  }
  0xa9   :  { %v6785_v40 = vsub.s32 0, %v6779_v38 }
  0xaa   :  { %318 = vmatmul.mubr.bf16.gmra.mrb[4].mxu0 %v6156_v48 }
  0xab   :  { %603 = vmatpush1.bf16.msra.mxu1 %v6115_v41  ;;  %5619 = vmatprep.mubr.msk.bf16.mxu0 %vm6595_vm0, %v7822_v36  ;;  %7830 = vst [vmem:[#allocation20_spill] sm:$0xff] %v6785_v40  ;;  %v6788_v41 = vsub.s32 1, %v6779_v38 }
  0xac   :  { %604 = vmatprep.subr.bf16.mxu1 %v6118_v42  ;;  %v6791_v42 = vrot.slane %v171_v39, %v6785_v40 }
  0xad   :  { %7831 = vst [vmem:[#allocation21_spill] sm:$0xff] %v6788_v41  ;;  %v180_v43 = vrot.slane %v171_v39, %v6788_v41 }
  0xaf   :  { %605 = vmatpush1.bf16.msra.mxu1 %v6121_v44 }
  0xb0   :  { %606 = vmatprep.subr.bf16.mxu1 %v6124_v45 }
  0xb3   :  { %607 = vmatpush1.bf16.msra.mxu1 %v6127_v46 }
  0xb4   :  { %608 = vmatprep.subr.bf16.mxu1 %v6130_v47 }
  0xb7   :  { %609 = vmatpush1.bf16.msra.mxu1 %v6133_v49 }
  0xb8   :  { %610 = vmatprep.subr.bf16.mxu1 %v6136_v50 }
  0xbb   :  { %611 = vmatpush1.bf16.msra.mxu1 %v6139_v51 }
  0xbc   :  { %897 = vmatprep.subr.bf16.mxu1 %v6162_v52 }
  0xbe   :  { %613 = vmatmul.mubr.bf16.vlgmr.msra.gmra.mrb[0].mxu1 %v6140_v53 }
  0xbf   :  { %622 = vmatprep.mubr.bf16.mxu1 %v6149_v54  ;;  %898 = vmatpush1.bf16.msra.mxu1 %v6160_v55 }
  0xc0   :  { %899 = vmatprep.subr.bf16.mxu1 %v6165_v56 }
  0xc3   :  { %900 = vmatpush1.bf16.msra.mxu1 %v6163_v57 }
  0xc4   :  { %901 = vmatprep.subr.bf16.mxu1 %v6168_v58 }
  0xc6   :  { %623 = vmatmul.mubr.bf16.gmra.mrb[4].mxu1 %v6152_v59 }
  0xc7   :  { %632 = vmatprep.mubr.bf16.mxu1 %v6153_v60  ;;  %902 = vmatpush1.bf16.msra.mxu1 %v6166_v61 }
  0xc8   :  { %903 = vmatprep.subr.bf16.mxu1 %v6171_v62  ;;  %v368_v62 = vld [vmem:[%s7814_s6] sm:$0x3]  ;;  %s6597_s6 = smov 32  }
  0xcb   :  { %904 = vmatpush1.bf16.msra.mxu1 %v6169_v63  ;;  %v373_v63 = vrot.slane %v368_v62, %v6785_v40 }
  0xcc   :  { %905 = vmatprep.subr.bf16.mxu1 %v6174_v1 }
  0xce   :  { %633 = vmatmul.mubr.bf16.gmra.mrb[8].mxu1 %v6155_v2  ;;  %v377_v2 = vrot.slane %v368_v62, %v6788_v41 }
  0xcf   :  { %642 = vmatprep.mubr.bf16.mxu1 %v6157_v3  ;;  %906 = vmatpush1.bf16.msra.mxu1 %v6172_v4 }
  0xd0   :  { %907 = vmatprep.subr.bf16.mxu1 %v6177_v5 }
  0xd3   :  { %908 = vmatpush1.bf16.msra.mxu1 %v6175_v6 }
  0xd4   :  { %909 = vmatprep.subr.bf16.mxu1 %v6180_v7 }
  0xd6   :  { %643 = vmatmul.mubr.bf16.gmra.mrb[12].mxu1 %v6159_v8 }
  0xd7   :  { %910 = vmatpush1.bf16.msra.mxu1 %v6178_v9  ;;  %929 = vmatprep.mubr.bf16.mxu1 %v6210_v10 }
  0xd8   :  { %911 = vmatprep.subr.bf16.mxu1 %v6183_v11 }
  0xdb   :  { %912 = vmatpush1.bf16.msra.mxu1 %v6181_v12 }
  0xdc   :  { %913 = vmatprep.subr.bf16.mxu1 %v6186_v13 }
  0xdf   :  { %914 = vmatpush1.bf16.msra.mxu1 %v6184_v14 }
  0xe0   :  { %915 = vmatprep.subr.bf16.mxu1 %v6189_v15 }
  0xe3   :  { %916 = vmatpush1.bf16.msra.mxu1 %v6187_v16 }
  0xe4   :  { %917 = vmatprep.subr.bf16.mxu1 %v6192_v17 }
  0xe7   :  { %918 = vmatpush1.bf16.msra.mxu1 %v6190_v18 }
  0xe8   :  { %919 = vmatprep.subr.bf16.mxu1 %v6195_v19 }
  0xeb   :  { %920 = vmatpush1.bf16.msra.mxu1 %v6193_v20 }
  0xec   :  { %921 = vmatprep.subr.bf16.mxu1 %v6198_v21 }
  0xef   :  { %922 = vmatpush1.bf16.msra.mxu1 %v6196_v22 }
  0xf0   :  { %923 = vmatprep.subr.bf16.mxu1 %v6201_v23 }
  0xf3   :  { %924 = vmatpush1.bf16.msra.mxu1 %v6199_v24 }
  0xf4   :  { %925 = vmatprep.subr.bf16.mxu1 %v6204_v25 }
  0xf7   :  { %926 = vmatpush1.bf16.msra.mxu1 %v6202_v26 }
  0xf8   :  { %927 = vmatprep.subr.bf16.mxu1 %v6207_v27 }
  0xfb   :  { %928 = vmatpush1.bf16.msra.mxu1 %v6205_v28 }
  0xfc   :  { %5623 = vmatprep.subr.bf16.mxu1 %v7822_v36 }
  0xfe   :  { %930 = vmatmul.mubr.bf16.vlgmr.msra.gmra.mrb[16].mxu1 %v6208_v29 }
  0xff   :  { %939 = vmatprep.mubr.bf16.mxu1 %v6211_v30 }
 0x106   :  { %940 = vmatmul.mubr.bf16.gmra.mrb[20].mxu1 %v6213_v31 }
 0x107   :  { %949 = vmatprep.mubr.bf16.mxu1 %v6214_v32 }
 0x10e   :  { %950 = vmatmul.mubr.bf16.gmra.mrb[24].mxu1 %v6216_v33 }
 0x10f   :  { %959 = vmatprep.mubr.bf16.mxu1 %v6217_v34 }
 0x116   :  { %960 = vmatmul.mubr.bf16.gmra.mrb[28].mxu1 %v6219_v35 }
 0x117   :  { %5625 = vmatprep.mubr.msk.bf16.mxu1 %vm6595_vm0, %v7822_v36 }
 0x175   :  { %v309_v44 = vpop.f32.mrb[0].mxu0 }
 0x176   :  { %v310_v45 = vadd.f32 %v309_v44, %v6791_v42  ;;  %v311_v46 = vpop.f32.mrb[1].mxu0 }
 0x177   :  { %v6795_v47 = vadd.f32 %v311_v46, %v180_v43  ;;  %v313_v48 = vpop.f32.mrb[2].mxu0 }
 0x178   :  { %v328_v49 = vmul.f32 0.17677669, %v310_v45  ;;  %v314_v50 = vadd.f32 %v313_v48, %v6791_v42  ;;  %v315_v51 = vpop.f32.mrb[3].mxu0 }
 0x179   :  { %v6798_v52 = vadd.f32 %v315_v51, %v180_v43 }
 0x17a   :  { %v6800_v53 = vpack.c.bf16 %v328_v49, %v328_v49  ;;  %v330_v54 = vmul.f32 0.17677669, %v314_v50 }
 0x17c   :  { %998 = vrot.lane.b32.xlu1 %v6800_v53, %s6596_s4  ;;  %v6804_v55 = vpack.c.bf16 %v330_v54, %v330_v54 }
 0x17d   :  { %v319_v56 = vpop.f32.mrb[4].mxu0 }
 0x17e   :  { %v321_v57 = vpop.f32.mrb[5].mxu0  ;;  %v320_v24 = vadd.f32 %v319_v56, %v6791_v42 }
 0x17f   :  { %v6806_v58 = vadd.f32 %v321_v57, %v180_v43  ;;  %v323_v59 = vpop.f32.mrb[6].mxu0 }
 0x180   :  { %1000 = vrot.lane.b32.xlu1 %v6804_v55, %s6596_s4  ;;  %v325_v60 = vpop.f32.mrb[7].mxu0  ;;  %v332_v30 = vmul.f32 0.17677669, %v320_v24  ;;  %v324_v48 = vadd.f32 %v323_v59, %v6791_v42  ;;  %v685_v59 = vld [vmem:[%s7816_s8] sm:$0x3] }
 0x181   :  { %v6810_v61 = vadd.f32 %v325_v60, %v180_v43 }
 0x182   :  { %v974_v39 = vpack.c.bf16 %v332_v30, %v332_v30  ;;  %v334_v60 = vmul.f32 0.17677669, %v324_v48 }
 0x184   :  { %v976_v42 = vpack.c.bf16 %v334_v60, %v334_v60 }
 0x191   :  { %v614_v1 = vpop.f32.mrb[0].mxu1 }
 0x192   :  { %v616_v3 = vpop.f32.mrb[1].mxu1  ;;  %v615_v5 = vadd.f32 %v614_v1, %v373_v63 }
 0x193   :  { %v618_v4 = vpop.f32.mrb[2].mxu1  ;;  %v617_v8 = vadd.f32 %v616_v3, %v377_v2 }
 0x194   :  { %v619_v6 = vadd.f32 %v618_v4, %v373_v63  ;;  %v620_v7 = vpop.f32.mrb[3].mxu1 }
 0x195   :  { %v621_v9 = vadd.f32 %v620_v7, %v377_v2 }
 0x196   :  { %v6817_v10 = vpack.c.bf16 %v619_v6, %v615_v5 }
 0x197   :  { %v6819_v11 = vpack.c.bf16 %v621_v9, %v617_v8 }
 0x198   :  { %1054 = vrot.lane.b32.xlu0 %v6817_v10, %s6596_s4  ;;  %v1191_v12 = vsel %vm1186_vm1, %v6817_v10, 0 }
 0x199   :  { %v624_v13 = vpop.f32.mrb[4].mxu1  ;;  %5618 = vmatpush3.bf16.xpose.msra.mxu0 %v1191_v12 }
 0x19a   :  { %v626_v14 = vpop.f32.mrb[5].mxu1  ;;  %5641 = vmatprep.subr.bf16.mxu0 %v7822_v36  ;;  %v625_v16 = vadd.f32 %v624_v13, %v373_v63  ;;  %v331_v13 = vmul.f32 0.17677669, %v6798_v52 }
 0x19b   :  { %v628_v15 = vpop.f32.mrb[6].mxu1  ;;  %v627_v19 = vadd.f32 %v626_v14, %v377_v2 }
 0x19c   :  { %v629_v17 = vadd.f32 %v628_v15, %v373_v63  ;;  %v630_v18 = vpop.f32.mrb[7].mxu1 }
 0x19d   :  { %v631_v20 = vadd.f32 %v630_v18, %v377_v2 }
 0x19e   :  { %v980_v21 = vpack.c.bf16 %v629_v17, %v625_v16 }
 0x19f   :  { %v6826_v22 = vpack.c.bf16 %v631_v20, %v627_v19  ;;  %v6905_v19 = vpack.c.bf16 %v331_v13, %v331_v13 }
 0x1a0   :  { %1056 = vrot.lane.b32.xlu0 %v980_v21, %s6596_s4  ;;  %5620 = vmatmul.mubr.msk.bf16.vlgmr.msra.gmra.mrb[8].mxu0 %vm1186_vm1, %v6800_v53  ;;  %v1237_v23 = vsel %vm1186_vm1, %v980_v21, 0 }
 0x1a1   :  { %v634_v25 = vpop.f32.mrb[8].mxu1  ;;  %5624 = vmatpush3.bf16.xpose.msra.mxu1 %v1237_v23  ;;  %5643 = vmatprep.mubr.msk.bf16.mxu0 %vm6595_vm0, %v7822_v36 }
 0x1a2   :  { %v636_v26 = vpop.f32.mrb[9].mxu1  ;;  %5629 = vmatprep.subr.bf16.mxu1 %v7822_v36  ;;  %v635_v28 = vadd.f32 %v634_v25, %v373_v63  ;;  %v335_v25 = vmul.f32 0.17677669, %v6810_v61 }
 0x1a3   :  { %v638_v27 = vpop.f32.mrb[10].mxu1  ;;  %v637_v32 = vadd.f32 %v636_v26, %v377_v2 }
 0x1a4   :  { %v639_v29 = vadd.f32 %v638_v27, %v373_v63  ;;  %v640_v31 = vpop.f32.mrb[11].mxu1  ;;  %v6920_v30 = vpack.c.bf16 %v335_v25, %v335_v25 }
 0x1a5   :  { %v641_v33 = vadd.f32 %v640_v31, %v377_v2 }
 0x1a6   :  { %v982_v34 = vpack.c.bf16 %v639_v29, %v635_v28 }
 0x1a7   :  { %v6836_v35 = vpack.c.bf16 %v641_v33, %v637_v32 }
 0x1a8   :  { %1058 = vrot.lane.b32.xlu0 %v982_v34, %s6596_s4  ;;  %5626 = vmatmul.mubr.msk.bf16.vlgmr.msra.gmra.mrb[32].mxu1 %vm1186_vm1, %v6804_v55  ;;  %v1283_v43 = vsel %vm1186_vm1, %v982_v34, 0 }
 0x1a9   :  { %v644_v44 = vpop.f32.mrb[12].mxu1  ;;  %5630 = vmatpush3.bf16.xpose.msra.mxu1 %v1283_v43  ;;  %5631 = vmatprep.mubr.msk.bf16.mxu1 %vm6595_vm0, %v7822_v36 }
 0x1aa   :  { %v646_v45 = vpop.f32.mrb[13].mxu1  ;;  %5635 = vmatprep.subr.bf16.mxu1 %v7822_v36  ;;  %v645_v49 = vadd.f32 %v644_v44, %v373_v63 }
 0x1ab   :  { %v648_v46 = vpop.f32.mrb[14].mxu1  ;;  %v647_v54 = vadd.f32 %v646_v45, %v377_v2 }
 0x1ac   :  { %v649_v50 = vadd.f32 %v648_v46, %v373_v63  ;;  %1002 = vrot.lane.b32.xlu0 %v974_v39, %s6596_s4  ;;  %v650_v51 = vpop.f32.mrb[15].mxu1  ;;  %v329_v63 = vmul.f32 0.17677669, %v6795_v47 }
 0x1ad   :  { %v651_v56 = vadd.f32 %v650_v51, %v377_v2  ;;  %v690_v2 = vrot.slane %v685_v59, %v6785_v40 }
 0x1ae   :  { %v984_v57 = vpack.c.bf16 %v649_v50, %v645_v49  ;;  %v6888_v4 = vpack.c.bf16 %v329_v63, %v329_v63 }
 0x1af   :  { %v6847_v62 = vpack.c.bf16 %v651_v56, %v647_v54 }
 0x1b0   :  { %1062 = vrot.lane.b32.xlu0 %v6817_v10, %s6588_s7  ;;  %5632 = vmatmul.mubr.msk.bf16.vlgmr.msra.gmra.mrb[36].mxu1 %vm1186_vm1, %v974_v39  ;;  %v1329_v1 = vsel %vm1186_vm1, %v984_v57, 0 }
 0x1b1   :  { %1060 = vrot.lane.b32.xlu1 %v984_v57, %s6596_s4  ;;  %5636 = vmatpush3.bf16.xpose.msra.mxu1 %v1329_v1 }
 0x1b2   :  { %5637 = vmatprep.mubr.msk.bf16.mxu1 %vm6595_vm0, %v7822_v36  ;;  %5647 = vmatprep.subr.bf16.mxu1 %v7822_v36 }
 0x1b4   :  { %1006 = vrot.lane.b32.xlu0 %v6800_v53, %s6588_s7 }
 0x1b5   :  { %1004 = vrot.lane.b32.xlu1 %v976_v42, %s6596_s4 }
 0x1b8   :  { %5638 = vmatmul.mubr.msk.bf16.vlgmr.msra.gmra.mrb[40].mxu1 %vm1186_vm1, %v976_v42  ;;  %1066 = vrot.lane.b32.xlu0 %v982_v34, %s6588_s7 }
 0x1b9   :  { %1064 = vrot.lane.b32.xlu1 %v980_v21, %s6588_s7  ;;  %5649 = vmatprep.mubr.msk.bf16.mxu1 %vm6595_vm0, %v7822_v36 }
 0x1bc   :  { %1010 = vrot.lane.b32.xlu0 %v974_v39, %s6588_s7 }
 0x1bd   :  { %1008 = vrot.lane.b32.xlu1 %v6804_v55, %s6588_s7 }
 0x1c0   :  { %1070 = vrot.lane.b32.xlu0 %v6817_v10, %s6597_s6  ;;  %v333_v10 = vmul.f32 0.17677669, %v6806_v58 }
 0x1c1   :  { %1068 = vrot.lane.b32.xlu1 %v984_v57, %s6588_s7 }
 0x1c2   :  { %v6903_v16 = vpack.c.bf16 %v333_v10, %v333_v10 }
 0x1c4   :  { %1014 = vrot.lane.b32.xlu0 %v6800_v53, %s6597_s6  ;;  %v694_v53 = vrot.slane %v685_v59, %v6788_v41 }
 0x1c5   :  { %1012 = vrot.lane.b32.xlu1 %v976_v42, %s6588_s7 }
 0x1c8   :  { %1074 = vrot.lane.b32.xlu0 %v982_v34, %s6597_s6 }
 0x1c9   :  { %1072 = vrot.lane.b32.xlu1 %v980_v21, %s6597_s6 }
 0x1cc   :  { %1018 = vrot.lane.b32.xlu0 %v974_v39, %s6597_s6 }
 0x1cd   :  { %1016 = vrot.lane.b32.xlu1 %v6804_v55, %s6597_s6 }
 0x1d0   :  { %1082 = vrot.lane.b32.xlu0 %v6819_v11, %s6596_s4 }
 0x1d1   :  { %1076 = vrot.lane.b32.xlu1 %v984_v57, %s6597_s6  ;;  %v931_v3 = vpop.f32.mrb[16].mxu1 }
 0x1d2   :  { %v932_v5 = vadd.f32 %v931_v3, %v690_v2  ;;  %v933_v6 = vpop.f32.mrb[17].mxu1 }
 0x1d3   :  { %v934_v7 = vadd.f32 %v933_v6, %v694_v53  ;;  %v935_v8 = vpop.f32.mrb[18].mxu1 }
 0x1d4   :  { %1026 = vrot.lane.b32.xlu0 %v6888_v4, %s6596_s4  ;;  %v936_v47 = vadd.f32 %v935_v8, %v690_v2  ;;  %v937_v55 = vpop.f32.mrb[19].mxu1 }
 0x1d5   :  { %1020 = vrot.lane.b32.xlu1 %v976_v42, %s6597_s6  ;;  %v938_v9 = vadd.f32 %v937_v55, %v694_v53 }
 0x1d6   :  { %v6894_v12 = vpack.c.bf16 %v936_v47, %v932_v5 }
 0x1d7   :  { %v6897_v14 = vpack.c.bf16 %v938_v9, %v934_v7 }
 0x1d8   :  { %1086 = vrot.lane.b32.xlu0 %v6836_v35, %s6596_s4 }
 0x1d9   :  { %1084 = vrot.lane.b32.xlu1 %v6826_v22, %s6596_s4  ;;  %v941_v15 = vpop.f32.mrb[20].mxu1 }
 0x1da   :  { %v942_v17 = vadd.f32 %v941_v15, %v690_v2  ;;  %v943_v18 = vpop.f32.mrb[21].mxu1 }
 0x1db   :  { %v944_v58 = vadd.f32 %v943_v18, %v694_v53  ;;  %v945_v20 = vpop.f32.mrb[22].mxu1 }
 0x1dc   :  { %1030 = vrot.lane.b32.xlu0 %v6903_v16, %s6596_s4  ;;  %v946_v52 = vadd.f32 %v945_v20, %v690_v2  ;;  %v947_v21 = vpop.f32.mrb[23].mxu1 }
 0x1dd   :  { %1028 = vrot.lane.b32.xlu1 %v6905_v19, %s6596_s4  ;;  %v948_v23 = vadd.f32 %v947_v21, %v694_v53 }
 0x1de   :  { %v6911_v24 = vpack.c.bf16 %v946_v52, %v942_v17 }
 0x1df   :  { %v6914_v26 = vpack.c.bf16 %v948_v23, %v944_v58 }
 0x1e0   :  { %1090 = vrot.lane.b32.xlu0 %v6819_v11, %s6588_s7 }
 0x1e1   :  { %1088 = vrot.lane.b32.xlu1 %v6847_v62, %s6596_s4  ;;  %v951_v27 = vpop.f32.mrb[24].mxu1 }
 0x1e2   :  { %v952_v28 = vadd.f32 %v951_v27, %v690_v2  ;;  %v953_v29 = vpop.f32.mrb[25].mxu1 }
 0x1e3   :  { %v954_v31 = vadd.f32 %v953_v29, %v694_v53  ;;  %v955_v32 = vpop.f32.mrb[26].mxu1 }
 0x1e4   :  { %1034 = vrot.lane.b32.xlu0 %v6888_v4, %s6588_s7  ;;  %v956_v33 = vadd.f32 %v955_v32, %v690_v2  ;;  %v957_v61 = vpop.f32.mrb[27].mxu1 }
 0x1e5   :  { %1032 = vrot.lane.b32.xlu1 %v6920_v30, %s6596_s4  ;;  %v958_v34 = vadd.f32 %v957_v61, %v694_v53 }
 0x1e6   :  { %v6926_v39 = vpack.c.bf16 %v956_v33, %v952_v28 }
 0x1e7   :  { %v6928_v43 = vpack.c.bf16 %v958_v34, %v954_v31 }
 0x1e8   :  { %1094 = vrot.lane.b32.xlu0 %v6836_v35, %s6588_s7 }
 0x1e9   :  { %7832 = vst [vmem:[#allocation22_spill] sm:$0xff] %v6928_v43  ;;  %1092 = vrot.lane.b32.xlu1 %v6826_v22, %s6588_s7  ;;  %v961_v44 = vpop.f32.mrb[28].mxu1 }
 0x1ea   :  { %v962_v45 = vadd.f32 %v961_v44, %v690_v2  ;;  %v963_v46 = vpop.f32.mrb[29].mxu1 }
 0x1eb   :  { %v964_v48 = vadd.f32 %v963_v46, %v694_v53  ;;  %v965_v49 = vpop.f32.mrb[30].mxu1 }
 0x1ec   :  { %1038 = vrot.lane.b32.xlu0 %v6903_v16, %s6588_s7  ;;  %v966_v50 = vadd.f32 %v965_v49, %v690_v2  ;;  %v967_v51 = vpop.f32.mrb[31].mxu1 }
 0x1ed   :  { %1036 = vrot.lane.b32.xlu1 %v6905_v19, %s6588_s7  ;;  %v968_v54 = vadd.f32 %v967_v51, %v694_v53  ;;  %v2019_v51 = vsel %vm1186_vm1, %v6836_v35, 0 }
 0x1ee   :  { %v6938_v56 = vpack.c.bf16 %v966_v50, %v962_v45  ;;  %v999_v42 = vpop.permute.xlu1 %998  ;;  %v1927_v45 = vsel %vm1186_vm1, %v6819_v11, 0 }
 0x1ef   :  { %v6940_v57 = vpack.c.bf16 %v968_v54, %v964_v48  ;;  %v1973_v54 = vsel %vm1186_vm1, %v6826_v22, 0 }
 0x1f0   :  { %1098 = vrot.lane.b32.xlu0 %v6819_v11, %s6597_s6 }
 0x1f1   :  { %7833 = vst [vmem:[#allocation23_spill] sm:$0xff] %v6940_v57  ;;  %1096 = vrot.lane.b32.xlu1 %v6847_v62, %s6588_s7 }
 0x1f2   :  { %v1001_v2 = vpop.permute.xlu1 %1000 }
 0x1f4   :  { %1042 = vrot.lane.b32.xlu0 %v6888_v4, %s6597_s6 }
 0x1f5   :  { %1040 = vrot.lane.b32.xlu1 %v6920_v30, %s6588_s7 }
 0x1f8   :  { %1102 = vrot.lane.b32.xlu0 %v6836_v35, %s6597_s6 }
 0x1f9   :  { %1100 = vrot.lane.b32.xlu1 %v6826_v22, %s6597_s6 }
 0x1fc   :  { %1046 = vrot.lane.b32.xlu0 %v6903_v16, %s6597_s6 }
 0x1fd   :  { %1044 = vrot.lane.b32.xlu1 %v6905_v19, %s6597_s6 }
 0x200   :  { %1112 = vrot.lane.b32.xlu0 %v6911_v24, %s6596_s4 }
 0x201   :  { %1104 = vrot.lane.b32.xlu1 %v6847_v62, %s6597_s6 }
 0x204   :  { %1124 = vrot.lane.b32.xlu0 %v6911_v24, %s6588_s7 }
 0x205   :  { %1048 = vrot.lane.b32.xlu1 %v6920_v30, %s6597_s6 }
 0x208   :  { %1136 = vrot.lane.b32.xlu0 %v6911_v24, %s6597_s6 }
 0x209   :  { %1110 = vrot.lane.b32.xlu1 %v6894_v12, %s6596_s4 }
 0x20a   :  { %v1055_v60 = vpop.permute.xlu0 %1054 }
 0x20b   :  { %v1375_v1 = vsel %vm1186_vm1, %v1055_v60, 0 }
 0x20c   :  { %5642 = vmatpush3.bf16.xpose.msra.mxu0 %v1375_v1  ;;  %1152 = vrot.lane.b32.xlu0 %v6914_v26, %s6596_s4 }
 0x20d   :  { %5653 = vmatprep.subr.bf16.mxu0 %v7822_v36  ;;  %1122 = vrot.lane.b32.xlu1 %v6894_v12, %s6588_s7 }
 0x210   :  { %1116 = vrot.lane.b32.xlu0 %v6938_v56, %s6596_s4 }
 0x211   :  { %1134 = vrot.lane.b32.xlu1 %v6894_v12, %s6597_s6 }
 0x212   :  { %v1057_v59 = vpop.permute.xlu0 %1056 }
 0x213   :  { %v1421_v63 = vsel %vm1186_vm1, %v1057_v59, 0  ;;  %5644 = vmatmul.mubr.msk.bf16.vlgmr.msra.gmra.mrb[12].mxu0 %vm1186_vm1, %v999_v42  ;;  %v2065_v42 = vsel %vm1186_vm1, %v6847_v62, 0 }
 0x214   :  { %5648 = vmatpush3.bf16.xpose.msra.mxu1 %v1421_v63  ;;  %5655 = vmatprep.mubr.msk.bf16.mxu0 %vm6595_vm0, %v7822_v36 }
 0x215   :  { %5659 = vmatprep.subr.bf16.mxu1 %v7822_v36  ;;  %1150 = vrot.lane.b32.xlu1 %v6897_v14, %s6596_s4 }
 0x216   :  { %1128 = vrot.lane.b32.xlu0 %v6938_v56, %s6588_s7 }
 0x219   :  { %1162 = vrot.lane.b32.xlu1 %v6897_v14, %s6588_s7 }
 0x21a   :  { %v1059_v53 = vpop.permute.xlu0 %1058  ;;  %1140 = vrot.lane.b32.xlu0 %v6938_v56, %s6597_s6 }
 0x21b   :  { %v1467_v3 = vsel %vm1186_vm1, %v1059_v53, 0  ;;  %5650 = vmatmul.mubr.msk.bf16.vlgmr.msra.gmra.mrb[44].mxu1 %vm1186_vm1, %v1001_v2 }
 0x21c   :  { %5654 = vmatpush3.bf16.xpose.msra.mxu0 %v1467_v3  ;;  %5661 = vmatprep.mubr.msk.bf16.mxu1 %vm6595_vm0, %v7822_v36 }
 0x21d   :  { %5665 = vmatprep.subr.bf16.mxu0 %v7822_v36  ;;  %1114 = vrot.lane.b32.xlu1 %v6926_v39, %s6596_s4 }
 0x21e   :  { %v1003_v5 = vpop.permute.xlu0 %1002  ;;  %1156 = vrot.lane.b32.xlu0 %v6940_v57, %s6596_s4 }
 0x221   :  { %1126 = vrot.lane.b32.xlu1 %v6926_v39, %s6588_s7 }
 0x222   :  { %v1063_v6 = vpop.permute.xlu0 %1062 }
 0x223   :  { %v1559_v7 = vsel %vm1186_vm1, %v1063_v6, 0  ;;  %v1061_v8 = vpop.permute.xlu1 %1060  ;;  %5656 = vmatmul.mubr.msk.bf16.vlgmr.msra.gmra.mrb[16].mxu0 %vm1186_vm1, %v1003_v5 }
 0x224   :  { %v1513_v47 = vsel %vm1186_vm1, %v1061_v8, 0  ;;  %5666 = vmatpush3.bf16.xpose.msra.mxu0 %v1559_v7  ;;  %5667 = vmatprep.mubr.msk.bf16.mxu0 %vm6595_vm0, %v7822_v36 }
 0x225   :  { %5660 = vmatpush3.bf16.xpose.msra.mxu1 %v1513_v47  ;;  %5677 = vmatprep.subr.bf16.mxu0 %v7822_v36 }
 0x226   :  { %v1007_v55 = vpop.permute.xlu0 %1006  ;;  %5671 = vmatprep.subr.bf16.mxu1 %v7822_v36  ;;  %1138 = vrot.lane.b32.xlu1 %v6926_v39, %s6597_s6 }
 0x227   :  { %v1005_v9 = vpop.permute.xlu1 %1004 }
 0x22a   :  { %v1067_v10 = vpop.permute.xlu0 %1066  ;;  %1154 = vrot.lane.b32.xlu1 %v6928_v43, %s6596_s4 }
 0x22b   :  { %v1651_v13 = vsel %vm1186_vm1, %v1067_v10, 0  ;;  %v1065_v15 = vpop.permute.xlu1 %1064  ;;  %5668 = vmatmul.mubr.msk.bf16.vlgmr.msra.gmra.mrb[20].mxu0 %vm1186_vm1, %v1007_v55  ;;  %v2662_v55 = vand.u32 127, %v173_v37 }
 0x22c   :  { %v1605_v17 = vsel %vm1186_vm1, %v1065_v15, 0  ;;  %5662 = vmatmul.mubr.msk.bf16.vlgmr.msra.gmra.mrb[48].mxu1 %vm1186_vm1, %v1005_v9  ;;  %5678 = vmatpush3.bf16.xpose.msra.mxu0 %v1651_v13 }
 0x22d   :  { %5672 = vmatpush3.bf16.xpose.msra.mxu1 %v1605_v17  ;;  %5673 = vmatprep.mubr.msk.bf16.mxu1 %vm6595_vm0, %v7822_v36  ;;  %vm7115_vm2 = vcmp.gt.s32.totalorder %v2662_v55, %v6779_v38 }
 0x22e   :  { %v1011_v18 = vpop.permute.xlu0 %1010  ;;  %5679 = vmatprep.mubr.msk.bf16.mxu0 %vm6595_vm0, %v7822_v36  ;;  %5683 = vmatprep.subr.bf16.mxu1 %v7822_v36 }
 0x22f   :  { %v1009_v58 = vpop.permute.xlu1 %1008  ;;  %5689 = vmatprep.subr.bf16.mxu0 %v7822_v36 }
 0x232   :  { %v1071_v20 = vpop.permute.xlu0 %1070 }
 0x233   :  { %v1743_v52 = vsel %vm1186_vm1, %v1071_v20, 0  ;;  %v1069_v21 = vpop.permute.xlu1 %1068  ;;  %5680 = vmatmul.mubr.msk.bf16.vlgmr.msra.gmra.mrb[24].mxu0 %vm1186_vm1, %v1011_v18 }
 0x234   :  { %v1697_v23 = vsel %vm1186_vm1, %v1069_v21, 0  ;;  %5674 = vmatmul.mubr.msk.bf16.vlgmr.msra.gmra.mrb[52].mxu1 %vm1186_vm1, %v1009_v58  ;;  %5690 = vmatpush3.bf16.xpose.msra.mxu0 %v1743_v52 }
 0x235   :  { %5684 = vmatpush3.bf16.xpose.msra.mxu1 %v1697_v23  ;;  %5685 = vmatprep.mubr.msk.bf16.mxu1 %vm6595_vm0, %v7822_v36 }
 0x236   :  { %v1015_v25 = vpop.permute.xlu0 %1014  ;;  %5691 = vmatprep.mubr.msk.bf16.mxu0 %vm6595_vm0, %v7822_v36  ;;  %5695 = vmatprep.subr.bf16.mxu1 %v7822_v36 }
 0x237   :  { %v1013_v27 = vpop.permute.xlu1 %1012  ;;  %5701 = vmatprep.subr.bf16.mxu0 %v7822_v36 }
 0x23a   :  { %v1075_v28 = vpop.permute.xlu0 %1074 }
 0x23b   :  { %v1835_v29 = vsel %vm1186_vm1, %v1075_v28, 0  ;;  %v1073_v31 = vpop.permute.xlu1 %1072  ;;  %5692 = vmatmul.mubr.msk.bf16.vlgmr.msra.gmra.mrb[28].mxu0 %vm1186_vm1, %v1015_v25 }
 0x23c   :  { %v1789_v32 = vsel %vm1186_vm1, %v1073_v31, 0  ;;  %5686 = vmatmul.mubr.msk.bf16.vlgmr.msra.gmra.mrb[56].mxu1 %vm1186_vm1, %v1013_v27  ;;  %5702 = vmatpush3.bf16.xpose.msra.mxu0 %v1835_v29 }
 0x23d   :  { %5696 = vmatpush3.bf16.xpose.msra.mxu1 %v1789_v32  ;;  %5697 = vmatprep.mubr.msk.bf16.mxu1 %vm6595_vm0, %v7822_v36 }
 0x23e   :  { %v1019_v33 = vpop.permute.xlu0 %1018  ;;  %5703 = vmatprep.mubr.msk.bf16.mxu0 %vm6595_vm0, %v7822_v36  ;;  %5707 = vmatprep.subr.bf16.mxu1 %v7822_v36 }
 0x23f   :  { %v1017_v61 = vpop.permute.xlu1 %1016  ;;  %5713 = vmatprep.subr.bf16.mxu0 %v7822_v36 }
 0x242   :  { %v1083_v34 = vpop.permute.xlu0 %1082 }
 0x243   :  { %v1077_v44 = vpop.permute.xlu1 %1076  ;;  %5704 = vmatmul.mubr.msk.bf16.vlgmr.msra.gmra.mrb[32].mxu0 %vm1186_vm1, %v1019_v33  ;;  %v2111_v35 = vsel %vm1186_vm1, %v1083_v34, 0 }
 0x244   :  { %v1881_v46 = vsel %vm1186_vm1, %v1077_v44, 0  ;;  %5698 = vmatmul.mubr.msk.bf16.vlgmr.msra.gmra.mrb[60].mxu1 %vm1186_vm1, %v1017_v61  ;;  %5714 = vmatpush3.bf16.xpose.msra.mxu0 %v1927_v45 }
 0x245   :  { %5708 = vmatpush3.bf16.xpose.msra.mxu1 %v1881_v46  ;;  %5709 = vmatprep.mubr.msk.bf16.mxu1 %vm6595_vm0, %v7822_v36 }
 0x246   :  { %v1027_v48 = vpop.permute.xlu0 %1026  ;;  %5715 = vmatprep.mubr.msk.bf16.mxu0 %vm6595_vm0, %v7822_v36  ;;  %5719 = vmatprep.subr.bf16.mxu1 %v7822_v36 }
 0x247   :  { %v1021_v49 = vpop.permute.xlu1 %1020  ;;  %5725 = vmatprep.subr.bf16.mxu0 %v7822_v36 }
 0x24a   :  { %v1087_v50 = vpop.permute.xlu0 %1086 }
 0x24b   :  { %v1085_v11 = vpop.permute.xlu1 %1084  ;;  %5716 = vmatmul.mubr.msk.bf16.vlgmr.msra.gmra.mrb[36].mxu0 %vm1186_vm1, %v6888_v4  ;;  %v2203_v63 = vsel %vm1186_vm1, %v1087_v50, 0 }
 0x24c   :  { %5710 = vmatmul.mubr.msk.bf16.vlgmr.msra.gmra.mrb[64].mxu1 %vm1186_vm1, %v1021_v49  ;;  %5726 = vmatpush3.bf16.xpose.msra.mxu0 %v2019_v51  ;;  %v2157_v62 = vsel %vm1186_vm1, %v1085_v11, 0 }
 0x24d   :  { %5720 = vmatpush3.bf16.xpose.msra.mxu1 %v1973_v54  ;;  %5721 = vmatprep.mubr.msk.bf16.mxu1 %vm6595_vm0, %v7822_v36 }
 0x24e   :  { %v1031_v60 = vpop.permute.xlu0 %1030  ;;  %5727 = vmatprep.mubr.msk.bf16.mxu0 %vm6595_vm0, %v7822_v36  ;;  %5731 = vmatprep.subr.bf16.mxu1 %v7822_v36 }
 0x24f   :  { %v1029_v4 = vpop.permute.xlu1 %1028  ;;  %5737 = vmatprep.subr.bf16.mxu0 %v7822_v36 }
 0x252   :  { %v1091_v22 = vpop.permute.xlu0 %1090 }
 0x253   :  { %v1089_v1 = vpop.permute.xlu1 %1088  ;;  %5728 = vmatmul.mubr.msk.bf16.vlgmr.msra.gmra.mrb[40].mxu0 %vm1186_vm1, %v6903_v16  ;;  %v2295_v53 = vsel %vm1186_vm1, %v1091_v22, 0 }
 0x254   :  { %5722 = vmatmul.mubr.msk.bf16.vlgmr.msra.gmra.mrb[68].mxu1 %vm1186_vm1, %v6905_v19  ;;  %5738 = vmatpush3.bf16.xpose.msra.mxu0 %v2111_v35 }
 0x255   :  { %5732 = vmatpush3.bf16.xpose.msra.mxu1 %v2065_v42  ;;  %5733 = vmatprep.mubr.msk.bf16.mxu1 %vm6595_vm0, %v7822_v36 }
 0x256   :  { %5739 = vmatprep.mubr.msk.bf16.mxu0 %vm6595_vm0, %v7822_v36  ;;  %5743 = vmatprep.subr.bf16.mxu1 %v7822_v36  ;;  %v1035_v16 = vpop.permute.xlu0 %1034 }
 0x257   :  { %v1033_v59 = vpop.permute.xlu1 %1032  ;;  %5749 = vmatprep.subr.bf16.mxu0 %v7822_v36 }
 0x25a   :  { %v1095_v2 = vpop.permute.xlu0 %1094 }
 0x25b   :  { %5740 = vmatmul.mubr.msk.bf16.vlgmr.msra.gmra.mrb[44].mxu0 %vm1186_vm1, %v1027_v48  ;;  %v1093_v19 = vpop.permute.xlu1 %1092  ;;  %v2387_v7 = vsel %vm1186_vm1, %v1095_v2, 0 }
 0x25c   :  { %5734 = vmatmul.mubr.msk.bf16.vlgmr.msra.gmra.mrb[72].mxu1 %vm1186_vm1, %v6920_v30  ;;  %5750 = vmatpush3.bf16.xpose.msra.mxu0 %v2203_v63  ;;  %v2249_v30 = vsel %vm1186_vm1, %v1089_v1, 0  ;;  %v2341_v8 = vsel %vm1186_vm1, %v1093_v19, 0 }
 0x25d   :  { %5744 = vmatpush3.bf16.xpose.msra.mxu1 %v2157_v62  ;;  %5745 = vmatprep.mubr.msk.bf16.mxu1 %vm6595_vm0, %v7822_v36 }
 0x25e   :  { %5751 = vmatprep.mubr.msk.bf16.mxu0 %vm6595_vm0, %v7822_v36  ;;  %5755 = vmatprep.subr.bf16.mxu1 %v7822_v36  ;;  %v1039_v5 = vpop.permute.xlu0 %1038 }
 0x25f   :  { %5761 = vmatprep.subr.bf16.mxu0 %v7822_v36  ;;  %v1037_v3 = vpop.permute.xlu1 %1036 }
 0x262   :  { %v1099_v47 = vpop.permute.xlu0 %1098 }
 0x263   :  { %5752 = vmatmul.mubr.msk.bf16.vlgmr.msra.gmra.mrb[48].mxu0 %vm1186_vm1, %v1031_v60  ;;  %v1097_v6 = vpop.permute.xlu1 %1096  ;;  %v2479_v37 = vsel %vm1186_vm1, %v1099_v47, 0 }
 0x264   :  { %5746 = vmatmul.mubr.msk.bf16.vlgmr.msra.gmra.mrb[76].mxu1 %vm1186_vm1, %v1029_v4  ;;  %5762 = vmatpush3.bf16.xpose.msra.mxu0 %v2295_v53  ;;  %v2433_v17 = vsel %vm1186_vm1, %v1097_v6, 0 }
 0x265   :  { %5756 = vmatpush3.bf16.xpose.msra.mxu1 %v2249_v30  ;;  %5757 = vmatprep.mubr.msk.bf16.mxu1 %vm6595_vm0, %v7822_v36 }
 0x266   :  { %5763 = vmatprep.mubr.msk.bf16.mxu0 %vm6595_vm0, %v7822_v36  ;;  %5767 = vmatprep.subr.bf16.mxu1 %v7822_v36  ;;  %v1043_v13 = vpop.permute.xlu0 %1042 }
 0x267   :  { %5773 = vmatprep.subr.bf16.mxu0 %v7822_v36  ;;  %v1041_v9 = vpop.permute.xlu1 %1040 }
 0x26a   :  { %v1103_v23 = vpop.permute.xlu0 %1102 }
 0x26b   :  { %5764 = vmatmul.mubr.msk.bf16.vlgmr.msra.gmra.mrb[52].mxu0 %vm1186_vm1, %v1035_v16  ;;  %v1101_v58 = vpop.permute.xlu1 %1100  ;;  %v2571_v25 = vsel %vm1186_vm1, %v1103_v23, 0 }
 0x26c   :  { %5758 = vmatmul.mubr.msk.bf16.vlgmr.msra.gmra.mrb[80].mxu1 %vm1186_vm1, %v1033_v59  ;;  %5774 = vmatpush3.bf16.xpose.msra.mxu0 %v2387_v7  ;;  %v2525_v29 = vsel %vm1186_vm1, %v1101_v58, 0 }
 0x26d   :  { %5768 = vmatpush3.bf16.xpose.msra.mxu1 %v2341_v8  ;;  %5769 = vmatprep.mubr.msk.bf16.mxu1 %vm6595_vm0, %v7822_v36 }
 0x26e   :  { %5775 = vmatprep.mubr.msk.bf16.mxu0 %vm6595_vm0, %v7822_v36  ;;  %5779 = vmatprep.subr.bf16.mxu1 %v7822_v36  ;;  %v1047_v45 = vpop.permute.xlu0 %1046 }
 0x26f   :  { %5785 = vmatprep.subr.bf16.mxu0 %v7822_v36  ;;  %v1045_v27 = vpop.permute.xlu1 %1044 }
 0x272   :  { %v7178_v59 = vpop.permute.xlu0 %1112 }
 0x273   :  { %v1227_v15 = vpop.f32.mrb[8].mxu0  ;;  %5776 = vmatmul.mubr.msk.bf16.vlgmr.msra.gmra.mrb[56].mxu0 %vm1186_vm1, %v1039_v5  ;;  %v1105_v44 = vpop.permute.xlu1 %1104 }
 0x274   :  { %v7124_v18 = vsel %vm7115_vm2, -1e+30, %v1227_v15  ;;  %5770 = vmatmul.mubr.msk.bf16.vlgmr.msra.gmra.mrb[84].mxu1 %vm1186_vm1, %v1037_v3  ;;  %5786 = vmatpush3.bf16.xpose.msra.mxu0 %v2479_v37  ;;  %v5621_v38 = vpop.f32.mrb[9].mxu0  ;;  %v2617_v48 = vsel %vm1186_vm1, %v1105_v44, 0 }
 0x275   :  { %5780 = vmatpush3.bf16.xpose.msra.mxu1 %v2433_v17  ;;  %v2699_v20 = vsel %vm2698_vm3, %v7124_v18, -inf  ;;  %5781 = vmatprep.mubr.msk.bf16.mxu1 %vm6595_vm0, %v7822_v36  ;;  %v1230_v52 = vpop.f32.mrb[10].mxu0 }
 0x276   :  { %2700 = vmax.xlane.f32.xlu0 %v2699_v20  ;;  %5787 = vmatprep.mubr.msk.bf16.mxu0 %vm6595_vm0, %v7822_v36  ;;  %v5622_v21 = vpop.f32.mrb[11].mxu0  ;;  %v7182_v63 = vpop.permute.xlu0 %1124 }
 0x277   :  { %5791 = vmatprep.subr.bf16.mxu1 %v7822_v36  ;;  %5797 = vmatprep.subr.bf16.mxu0 %v7822_v36  ;;  %v1049_v60 = vpop.permute.xlu1 %1048 }
 0x27b   :  { %v1273_v28 = vpop.f32.mrb[32].mxu1  ;;  %5788 = vmatmul.mubr.msk.bf16.vlgmr.msra.gmra.mrb[60].mxu0 %vm1186_vm1, %v1043_v13  ;;  %v7180_v16 = vpop.permute.xlu1 %1110 }
 0x27c   :  { %v7140_v31 = vsel %vm7115_vm2, -1e+30, %v1273_v28  ;;  %5782 = vmatmul.mubr.msk.bf16.vlgmr.msra.gmra.mrb[88].mxu1 %vm1186_vm1, %v1041_v9  ;;  %5798 = vmatpush3.bf16.xpose.msra.mxu0 %v2571_v25  ;;  %v5627_v32 = vpop.f32.mrb[33].mxu1 }
 0x27d   :  { %5792 = vmatpush3.bf16.xpose.msra.mxu1 %v2525_v29  ;;  %v2702_v33 = vsel %vm2698_vm3, %v7140_v31, -inf  ;;  %v1276_v61 = vpop.f32.mrb[34].mxu1  ;;  %5793 = vmatprep.mubr.msk.bf16.mxu1 %vm6595_vm0, %v7822_v36 }
 0x27e   :  { %2703 = vmax.xlane.f32.xlu1 %v2702_v33  ;;  %v5628_v34 = vpop.f32.mrb[35].mxu1  ;;  %5799 = vmatprep.mubr.msk.bf16.mxu0 %vm6595_vm0, %v7822_v36 }
 0x27f   :  { %5803 = vmatprep.subr.bf16.mxu1 %v7822_v36  ;;  %5809 = vmatprep.subr.bf16.mxu0 %v7822_v36  ;;  %v7184_v62 = vpop.permute.xlu1 %1122 }
 0x283   :  { %v1319_v46 = vpop.f32.mrb[36].mxu1  ;;  %5800 = vmatmul.mubr.msk.bf16.vlgmr.msra.gmra.mrb[64].mxu0 %vm1186_vm1, %v1047_v45  ;;  %v7188_v19 = vpop.permute.xlu1 %1134 }
 0x284   :  { %v7155_v49 = vsel %vm7115_vm2, -1e+30, %v1319_v46  ;;  %5794 = vmatmul.mubr.msk.bf16.vlgmr.msra.gmra.mrb[92].mxu1 %vm1186_vm1, %v1045_v27  ;;  %5810 = vmatpush3.bf16.msra.mxu0 %v6894_v12  ;;  %v5633_v50 = vpop.f32.mrb[37].mxu1 }
 0x285   :  { %5804 = vmatpush3.bf16.xpose.msra.mxu1 %v2617_v48  ;;  %v2705_v11 = vsel %vm2698_vm3, %v7155_v49, -inf  ;;  %v1322_v51 = vpop.f32.mrb[38].mxu1  ;;  %5805 = vmatprep.mubr.msk.bf16.mxu1 %vm6595_vm0, %v7822_v36 }
 0x286   :  { %2706 = vmax.xlane.f32.xlu0 %v2705_v11  ;;  %v5634_v54 = vpop.f32.mrb[39].mxu1  ;;  %5815 = vmatprep.subr.bf16.mxu1 %v7822_v36 }
 0x287   :  { %5811 = vmatprep.mubr.msk.bf16.mxu0 %vm6595_vm0, %v7822_v36  ;;  %5821 = vmatprep.subr.bf16.mxu0 %v7822_v36  ;;  %v7192_v53 = vpop.permute.xlu1 %1150 }
 0x288   :  { %7837 = vst [vmem:[#allocation25_spill] sm:$0xff] %v7192_v53 }
 0x28b   :  { %v1365_v12 = vpop.f32.mrb[40].mxu1  ;;  %v7202_v55 = vpop.permute.xlu1 %1162 }
 0x28c   :  { %v7169_v4 = vsel %vm7115_vm2, -1e+30, %v1365_v12  ;;  %5806 = vmatmul.mubr.msk.bf16.vlgmr.msra.gmra.mrb[96].mxu1 %vm1186_vm1, %v1049_v60  ;;  %v5639_v35 = vpop.f32.mrb[41].mxu1  ;;  %7838 = vst [vmem:[#allocation26_spill] sm:$0xff] %v7202_v55 }
 0x28d   :  { %5816 = vmatpush3.bf16.msra.mxu1 %v6911_v24  ;;  %v2708_v1 = vsel %vm2698_vm3, %v7169_v4, -inf  ;;  %v1368_v22 = vpop.f32.mrb[42].mxu1  ;;  %5817 = vmatprep.mubr.msk.bf16.mxu1 %vm6595_vm0, %v7822_v36  ;;  %v7186_v24 = vpop.permute.xlu0 %1136 }
 0x28e   :  { %2709 = vmax.xlane.f32.xlu0 %v2708_v1  ;;  %v5640_v42 = vpop.f32.mrb[43].mxu1  ;;  %5827 = vmatprep.subr.bf16.mxu1 %v7822_v36 }
 0x28f   :  { %v7212_v20 = vpop.permute.xlu1 %1114 }
 0x291   :  { %v7190_v2 = vpop.permute.xlu0 %1152 }
 0x292   :  { %7836 = vst [vmem:[#allocation24_spill] sm:$0xff] %v7190_v2 }
 0x293   :  { %v7220_v27 = vpop.permute.xlu1 %1126 }
 0x295   :  { %v7200_v47 = vpop.permute.xlu0 %1116 }
 0x298   :  { %v7226_v61 = vpop.permute.xlu1 %1138 }
 0x299   :  { %v7210_v38 = vpop.permute.xlu0 %1128 }
 0x29c   :  { %v7241_v42 = vpop.permute.xlu1 %1154 }
 0x29d   :  { %v7214_v21 = vpop.permute.xlu0 %1140  ;;  %7840 = vst [vmem:[#allocation28_spill] sm:$0xff] %v7241_v42 }
 0x2a1   :  { %v7224_v33 = vpop.permute.xlu0 %1156 }
 0x2a2   :  { %7839 = vst [vmem:[#allocation27_spill] sm:$0xff] %v7224_v33 }
 0x2e6   :  { %v1411_v3 = vpop.f32.mrb[12].mxu0 }
 0x2e7   :  { %v7196_v30 = vsel %vm7115_vm2, -1e+30, %v1411_v3  ;;  %v5645_v5 = vpop.f32.mrb[13].mxu0 }
 0x2e8   :  { %v2711_v6 = vsel %vm2698_vm3, %v7196_v30, -inf  ;;  %v1414_v7 = vpop.f32.mrb[14].mxu0 }
 0x2e9   :  { %2712 = vmax.xlane.f32.xlu1 %v2711_v6  ;;  %v5646_v8 = vpop.f32.mrb[15].mxu0 }
 0x2ee   :  { %v1457_v9 = vpop.f32.mrb[44].mxu1 }
 0x2ef   :  { %v7206_v13 = vsel %vm7115_vm2, -1e+30, %v1457_v9  ;;  %v5651_v37 = vpop.f32.mrb[45].mxu1 }
 0x2f0   :  { %v2714_v15 = vsel %vm2698_vm3, %v7206_v13, -inf  ;;  %v1460_v17 = vpop.f32.mrb[46].mxu1 }
 0x2f1   :  { %2715 = vmax.xlane.f32.xlu0 %v2714_v15  ;;  %v5652_v58 = vpop.f32.mrb[47].mxu1 }
 0x2f6   :  { %v1503_v52 = vpop.f32.mrb[16].mxu0 }
 0x2f7   :  { %v7218_v23 = vsel %vm7115_vm2, -1e+30, %v1503_v52  ;;  %v5657_v25 = vpop.f32.mrb[17].mxu0 }
 0x2f8   :  { %v2717_v28 = vsel %vm2698_vm3, %v7218_v23, -inf  ;;  %v1506_v29 = vpop.f32.mrb[18].mxu0 }
 0x2f9   :  { %2718 = vmax.xlane.f32.xlu1 %v2717_v28  ;;  %v5658_v32 = vpop.f32.mrb[19].mxu0 }
 0x2fe   :  { %v1595_v34 = vpop.f32.mrb[20].mxu0 }
 0x2ff   :  { %v1549_v44 = vpop.f32.mrb[48].mxu1  ;;  %v7230_v45 = vsel %vm7115_vm2, -1e+30, %v1595_v34  ;;  %v5669_v46 = vpop.f32.mrb[21].mxu0 }
 0x300   :  { %v7234_v48 = vsel %vm7115_vm2, -1e+30, %v1549_v44  ;;  %v2723_v50 = vsel %vm2698_vm3, %v7230_v45, -inf  ;;  %v5663_v11 = vpop.f32.mrb[49].mxu1  ;;  %v1598_v51 = vpop.f32.mrb[22].mxu0 }
 0x301   :  { %v2720_v54 = vsel %vm2698_vm3, %v7234_v48, -inf  ;;  %2724 = vmax.xlane.f32.xlu1 %v2723_v50  ;;  %v1552_v60 = vpop.f32.mrb[50].mxu1  ;;  %v5670_v12 = vpop.f32.mrb[23].mxu0 }
 0x302   :  { %2721 = vmax.xlane.f32.xlu0 %v2720_v54  ;;  %v5664_v35 = vpop.f32.mrb[51].mxu1 }
 0x303   :  { %v2701_v1 = vpop.xlane.xlu0 %2700 }
 0x304   :  { %v2795_v22 = vsub.f32 %v7124_v18, %v2701_v1 }
 0x306   :  { %v2827_v3 = vmul.f32 1.442695, %v2795_v22  ;;  %v1687_v5 = vpop.f32.mrb[24].mxu0 }
 0x307   :  { %v1641_v6 = vpop.f32.mrb[52].mxu1  ;;  %v7245_v7 = vsel %vm7115_vm2, -1e+30, %v1687_v5  ;;  %v5681_v8 = vpop.f32.mrb[25].mxu0 }
 0x308   :  { %6268 = vpow2.f32 %v2827_v3  ;;  %v7249_v9 = vsel %vm7115_vm2, -1e+30, %v1641_v6  ;;  %v5675_v37 = vpop.f32.mrb[53].mxu1  ;;  %v2729_v15 = vsel %vm2698_vm3, %v7245_v7, -inf  ;;  %v1690_v18 = vpop.f32.mrb[26].mxu0 }
 0x309   :  { %v1644_v17 = vpop.f32.mrb[54].mxu1  ;;  %v2726_v58 = vsel %vm2698_vm3, %v7249_v9, -inf  ;;  %2730 = vmax.xlane.f32.xlu1 %v2729_v15  ;;  %v5682_v52 = vpop.f32.mrb[27].mxu0 }
 0x30a   :  { %v5676_v25 = vpop.f32.mrb[55].mxu1  ;;  %2727 = vmax.xlane.f32.xlu0 %v2726_v58 }
 0x30b   :  { %v2704_v28 = vpop.xlane.xlu1 %2703 }
 0x30c   :  { %v2796_v29 = vsub.f32 %v7140_v31, %v2704_v28 }
 0x30e   :  { %v2829_v32 = vmul.f32 1.442695, %v2796_v29  ;;  %v1779_v34 = vpop.f32.mrb[28].mxu0 }
 0x30f   :  { %v1733_v44 = vpop.f32.mrb[56].mxu1  ;;  %v7258_v46 = vsel %vm7115_vm2, -1e+30, %v1779_v34  ;;  %v5693_v50 = vpop.f32.mrb[29].mxu0 }
 0x310   :  { %6270 = vpow2.f32 %v2829_v32  ;;  %v7262_v11 = vsel %vm7115_vm2, -1e+30, %v1733_v44  ;;  %v5687_v51 = vpop.f32.mrb[57].mxu1  ;;  %v1782_v54 = vpop.f32.mrb[30].mxu0  ;;  %v2735_v60 = vsel %vm2698_vm3, %v7258_v46, -inf }
 0x311   :  { %v1736_v12 = vpop.f32.mrb[58].mxu1  ;;  %v2732_v31 = vsel %vm2698_vm3, %v7262_v11, -inf  ;;  %2736 = vmax.xlane.f32.xlu1 %v2735_v60  ;;  %v5694_v35 = vpop.f32.mrb[31].mxu0 }
 0x312   :  { %v7268_v1 = vpop.eup %6268  ;;  %v5688_v22 = vpop.f32.mrb[59].mxu1  ;;  %2733 = vmax.xlane.f32.xlu0 %v2732_v31 }
 0x313   :  { %v2707_v3 = vpop.xlane.xlu0 %2706  ;;  %v2891_v5 = vsel %vm2698_vm3, %v7268_v1, 0.0 }
 0x314   :  { %v2797_v6 = vsub.f32 %v7155_v49, %v2707_v3 }
 0x315   :  { %2892 = vadd.xlane.f32.xlu1 %v2891_v5 }
 0x316   :  { %v2831_v8 = vmul.f32 1.442695, %v2797_v6  ;;  %v1871_v37 = vpop.f32.mrb[32].mxu0 }
 0x317   :  { %v1825_v15 = vpop.f32.mrb[60].mxu1  ;;  %v7275_v18 = vsel %vm7115_vm2, -1e+30, %v1871_v37  ;;  %v5705_v17 = vpop.f32.mrb[33].mxu0 }
 0x318   :  { %6272 = vpow2.f32 %v2831_v8  ;;  %v7279_v58 = vsel %vm7115_vm2, -1e+30, %v1825_v15  ;;  %v5699_v52 = vpop.f32.mrb[61].mxu1  ;;  %v1874_v25 = vpop.f32.mrb[34].mxu0  ;;  %v2741_v28 = vsel %vm2698_vm3, %v7275_v18, -inf }
 0x319   :  { %v1828_v49 = vpop.f32.mrb[62].mxu1  ;;  %v2738_v29 = vsel %vm2698_vm3, %v7279_v58, -inf  ;;  %2742 = vmax.xlane.f32.xlu1 %v2741_v28  ;;  %v5706_v32 = vpop.f32.mrb[35].mxu0 }
 0x31a   :  { %v7285_v34 = vpop.eup %6270  ;;  %v5700_v44 = vpop.f32.mrb[63].mxu1  ;;  %2739 = vmax.xlane.f32.xlu0 %v2738_v29 }
 0x31b   :  { %v2710_v50 = vpop.xlane.xlu0 %2709  ;;  %v2894_v51 = vsel %vm2698_vm3, %v7285_v34, 0.0 }
 0x31c   :  { %v2798_v54 = vsub.f32 %v7169_v4, %v2710_v50 }
 0x31e   :  { %v2833_v60 = vmul.f32 1.442695, %v2798_v54  ;;  %2895 = vadd.xlane.f32.xlu0 %v2894_v51  ;;  %v1963_v12 = vpop.f32.mrb[36].mxu0 }
 0x31f   :  { %v1917_v31 = vpop.f32.mrb[64].mxu1  ;;  %v7292_v35 = vsel %vm7115_vm2, -1e+30, %v1963_v12  ;;  %v5717_v22 = vpop.f32.mrb[37].mxu0 }
 0x320   :  { %6274 = vpow2.f32 %v2833_v60  ;;  %v7296_v3 = vsel %vm7115_vm2, -1e+30, %v1917_v31  ;;  %v5711_v5 = vpop.f32.mrb[65].mxu1  ;;  %v1966_v6 = vpop.f32.mrb[38].mxu0  ;;  %v2747_v8 = vsel %vm2698_vm3, %v7292_v35, -inf }
 0x321   :  { %v1920_v4 = vpop.f32.mrb[66].mxu1  ;;  %v2744_v37 = vsel %vm2698_vm3, %v7296_v3, -inf  ;;  %2748 = vmax.xlane.f32.xlu1 %v2747_v8  ;;  %v5718_v15 = vpop.f32.mrb[39].mxu0 }
 0x322   :  { %v7302_v17 = vpop.eup %6272  ;;  %v5712_v52 = vpop.f32.mrb[67].mxu1  ;;  %2745 = vmax.xlane.f32.xlu0 %v2744_v37 }
 0x323   :  { %v2897_v25 = vsel %vm2698_vm3, %v7302_v17, 0.0 }
 0x325   :  { %2898 = vadd.xlane.f32.xlu1 %v2897_v25 }
 0x326   :  { %v2055_v28 = vpop.f32.mrb[40].mxu0 }
 0x327   :  { %v2009_v49 = vpop.f32.mrb[68].mxu1  ;;  %v7308_v29 = vsel %vm7115_vm2, -1e+30, %v2055_v28  ;;  %v5729_v32 = vpop.f32.mrb[41].mxu0 }
 0x328   :  { %v7312_v44 = vsel %vm7115_vm2, -1e+30, %v2009_v49  ;;  %v5723_v50 = vpop.f32.mrb[69].mxu1  ;;  %v2058_v51 = vpop.f32.mrb[42].mxu0  ;;  %v2753_v54 = vsel %vm2698_vm3, %v7308_v29, -inf }
 0x329   :  { %v2012_v60 = vpop.f32.mrb[70].mxu1  ;;  %v2750_v12 = vsel %vm2698_vm3, %v7312_v44, -inf  ;;  %2754 = vmax.xlane.f32.xlu1 %v2753_v54  ;;  %v5730_v31 = vpop.f32.mrb[43].mxu0 }
 0x32a   :  { %v7318_v22 = vpop.eup %6274  ;;  %v5724_v5 = vpop.f32.mrb[71].mxu1  ;;  %2751 = vmax.xlane.f32.xlu0 %v2750_v12 }
 0x32b   :  { %v2900_v6 = vsel %vm2698_vm3, %v7318_v22, 0.0 }
 0x32e   :  { %2901 = vadd.xlane.f32.xlu0 %v2900_v6  ;;  %v2147_v8 = vpop.f32.mrb[44].mxu0 }
 0x32f   :  { %v2101_v4 = vpop.f32.mrb[72].mxu1  ;;  %v5741_v37 = vpop.f32.mrb[45].mxu0 }
 0x330   :  { %v7324_v15 = vsel %vm7115_vm2, -1e+30, %v2101_v4  ;;  %v5735_v52 = vpop.f32.mrb[73].mxu1  ;;  %v2150_v25 = vpop.f32.mrb[46].mxu0 }
 0x331   :  { %v2104_v28 = vpop.f32.mrb[74].mxu1  ;;  %v2756_v49 = vsel %vm2698_vm3, %v7324_v15, -inf  ;;  %v5742_v32 = vpop.f32.mrb[47].mxu0 }
 0x332   :  { %v5736_v50 = vpop.f32.mrb[75].mxu1  ;;  %2757 = vmax.xlane.f32.xlu0 %v2756_v49 }
 0x336   :  { %v2239_v51 = vpop.f32.mrb[48].mxu0 }
 0x337   :  { %v2193_v54 = vpop.f32.mrb[76].mxu1  ;;  %v5753_v60 = vpop.f32.mrb[49].mxu0 }
 0x338   :  { %v5747_v12 = vpop.f32.mrb[77].mxu1  ;;  %v2242_v31 = vpop.f32.mrb[50].mxu0 }
 0x339   :  { %v2196_v5 = vpop.f32.mrb[78].mxu1  ;;  %v5754_v6 = vpop.f32.mrb[51].mxu0 }
 0x33a   :  { %v5748_v37 = vpop.f32.mrb[79].mxu1  ;;  %1166 = vrot.lane.b32.xlu1 %v6928_v43, %s6588_s7 }
 0x33e   :  { %1168 = vrot.lane.b32.xlu1 %v6940_v57, %s6588_s7  ;;  %v2331_v4 = vpop.f32.mrb[52].mxu0 }
 0x33f   :  { %v2285_v52 = vpop.f32.mrb[80].mxu1  ;;  %v5765_v25 = vpop.f32.mrb[53].mxu0 }
 0x340   :  { %v5759_v28 = vpop.f32.mrb[81].mxu1  ;;  %v2334_v32 = vpop.f32.mrb[54].mxu0 }
 0x341   :  { %v2288_v49 = vpop.f32.mrb[82].mxu1  ;;  %v5766_v50 = vpop.f32.mrb[55].mxu0 }
 0x342   :  { %v5760_v0 = vpop.f32.mrb[83].mxu1 }
 0x346   :  { %v2423_v60 = vpop.f32.mrb[56].mxu0 }
 0x347   :  { %v2377_v12 = vpop.f32.mrb[84].mxu1  ;;  %v5777_v31 = vpop.f32.mrb[57].mxu0 }
 0x348   :  { %v5771_v5 = vpop.f32.mrb[85].mxu1  ;;  %1164 = vrot.lane.b32.xlu0 %v6914_v26, %s6588_s7  ;;  %v2426_v6 = vpop.f32.mrb[58].mxu0 }
 0x349   :  { %v2380_v37 = vpop.f32.mrb[86].mxu1  ;;  %v5778_v36 = vpop.f32.mrb[59].mxu0 }
 0x34a   :  { %v5772_v41 = vpop.f32.mrb[87].mxu1  ;;  %v7336_v36 = vsel %vm7115_vm2, -1e+30, %v2147_v8 }
 0x34b   :  { %v2759_v37 = vsel %vm2698_vm3, %v7336_v36, -inf }
 0x34e   :  { %v2515_v40 = vpop.f32.mrb[60].mxu0 }
 0x34f   :  { %v2469_v55 = vpop.f32.mrb[88].mxu1  ;;  %v5789_v33 = vpop.f32.mrb[61].mxu0 }
 0x350   :  { %v5783_v25 = vpop.f32.mrb[89].mxu1  ;;  %v2518_v28 = vpop.f32.mrb[62].mxu0 }
 0x351   :  { %v2472_v32 = vpop.f32.mrb[90].mxu1  ;;  %v5790_v49 = vpop.f32.mrb[63].mxu0  ;;  %v7342_v25 = vsel %vm7115_vm2, -1e+30, %v2239_v51  ;;  %v7358_v51 = vsel %vm7115_vm2, -1e+30, %v2285_v52 }
 0x352   :  { %v5784_v50 = vpop.f32.mrb[91].mxu1  ;;  %v7364_v28 = vsel %vm7115_vm2, -1e+30, %v2423_v60  ;;  %v7370_v32 = vsel %vm7115_vm2, -1e+30, %v2377_v12 }
 0x353   :  { %v2777_v52 = vsel %vm2698_vm3, %v7364_v28, -inf  ;;  %v7376_v49 = vsel %vm7115_vm2, -1e+30, %v2515_v40  ;;  %v2774_v60 = vsel %vm2698_vm3, %v7370_v32, -inf  ;;  %v7382_v50 = vsel %vm7115_vm2, -1e+30, %v2469_v55 }
 0x354   :  { %v2783_v12 = vsel %vm2698_vm3, %v7376_v49, -inf }
 0x356   :  { %v2607_v0 = vpop.f32.mrb[64].mxu0 }
 0x357   :  { %v2561_v42 = vpop.f32.mrb[92].mxu1  ;;  %v5801_v2 = vpop.f32.mrb[65].mxu0 }
 0x358   :  { %v5795_v31 = vpop.f32.mrb[93].mxu1  ;;  %v2610_v5 = vpop.f32.mrb[66].mxu0  ;;  %v7394_v40 = vsel %vm7115_vm2, -1e+30, %v2561_v42 }
 0x359   :  { %v2564_v53 = vpop.f32.mrb[94].mxu1  ;;  %v5802_v43 = vpop.f32.mrb[67].mxu0  ;;  %v2780_v31 = vsel %vm2698_vm3, %v7382_v50, -inf  ;;  %v7390_v5 = vsel %vm7115_vm2, -1e+30, %v2607_v0 }
 0x35a   :  { %v5796_v57 = vpop.f32.mrb[95].mxu1  ;;  %v7346_v43 = vsel %vm7115_vm2, -1e+30, %v2193_v54  ;;  %v7352_v53 = vsel %vm7115_vm2, -1e+30, %v2331_v4  ;;  %v2768_v4 = vsel %vm2698_vm3, %v7358_v51, -inf }
 0x35b   :  { %v2765_v57 = vsel %vm2698_vm3, %v7342_v25, -inf  ;;  %v2762_v8 = vsel %vm2698_vm3, %v7346_v43, -inf  ;;  %v2771_v54 = vsel %vm2698_vm3, %v7352_v53, -inf  ;;  %v2789_v55 = vsel %vm2698_vm3, %v7390_v5, -inf }
 0x35f   :  { %v2653_v41 = vpop.f32.mrb[96].mxu1 }
 0x360   :  { %v5807_v6 = vpop.f32.mrb[97].mxu1 }
 0x361   :  { %v2656_v33 = vpop.f32.mrb[98].mxu1  ;;  %v2786_v6 = vsel %vm2698_vm3, %v7394_v40, -inf }
 0x362   :  { %v5808_v2 = vpop.f32.mrb[99].mxu1  ;;  %2760 = vmax.xlane.f32.xlu1 %v2759_v37  ;;  %v7402_v37 = vsel %vm7115_vm2, -1e+30, %v2653_v41 }
 0x363   :  { %v2792_v42 = vsel %vm2698_vm3, %v7402_v37, -inf }
 0x366   :  { %2766 = vmax.xlane.f32.xlu1 %v2765_v57 }
 0x367   :  { %2763 = vmax.xlane.f32.xlu0 %v2762_v8 }
 0x36a   :  { %2772 = vmax.xlane.f32.xlu1 %v2771_v54 }
 0x36b   :  { %2769 = vmax.xlane.f32.xlu0 %v2768_v4 }
 0x36e   :  { %2778 = vmax.xlane.f32.xlu1 %v2777_v52 }
 0x36f   :  { %2775 = vmax.xlane.f32.xlu0 %v2774_v60 }
 0x372   :  { %2784 = vmax.xlane.f32.xlu1 %v2783_v12 }
 0x373   :  { %2781 = vmax.xlane.f32.xlu0 %v2780_v31 }
 0x376   :  { %v2713_v33 = vpop.xlane.xlu1 %2712  ;;  %2790 = vmax.xlane.f32.xlu1 %v2789_v55 }
 0x377   :  { %2787 = vmax.xlane.f32.xlu0 %v2786_v6  ;;  %v2799_v0 = vsub.f32 %v7196_v30, %v2713_v33 }
 0x379   :  { %v2835_v2 = vmul.f32 1.442695, %v2799_v0 }
 0x37b   :  { %6276 = vpow2.f32 %v2835_v2  ;;  %2793 = vmax.xlane.f32.xlu0 %v2792_v42 }
 0x37e   :  { %v2716_v57 = vpop.xlane.xlu0 %2715 }
 0x37f   :  { %v2800_v8 = vsub.f32 %v7206_v13, %v2716_v57 }
 0x381   :  { %v2837_v54 = vmul.f32 1.442695, %v2800_v8 }
 0x383   :  { %6278 = vpow2.f32 %v2837_v54 }
 0x385   :  { %v7408_v4 = vpop.eup %6276 }
 0x386   :  { %v2719_v52 = vpop.xlane.xlu1 %2718  ;;  %v2903_v10 = vsel %vm2698_vm3, %v7408_v4, 0.0 }
 0x387   :  { %v2801_v41 = vsub.f32 %v7218_v23, %v2719_v52  ;;  %2904 = vadd.xlane.f32.xlu1 %v2903_v10 }
 0x389   :  { %v2839_v30 = vmul.f32 1.442695, %v2801_v41 }
 0x38b   :  { %6280 = vpow2.f32 %v2839_v30 }
 0x38d   :  { %v7413_v60 = vpop.eup %6278 }
 0x38e   :  { %v2725_v12 = vpop.xlane.xlu1 %2724  ;;  %v2906_v31 = vsel %vm2698_vm3, %v7413_v60, 0.0 }
 0x38f   :  { %v2722_v13 = vpop.xlane.xlu0 %2721  ;;  %v2803_v55 = vsub.f32 %v7230_v45, %v2725_v12  ;;  %2907 = vadd.xlane.f32.xlu0 %v2906_v31 }
 0x390   :  { %v2802_v6 = vsub.f32 %v7234_v48, %v2722_v13 }
 0x391   :  { %v2843_v33 = vmul.f32 1.442695, %v2803_v55 }
 0x392   :  { %v2841_v0 = vmul.f32 1.442695, %v2802_v6 }
 0x393   :  { %6282 = vpow2.f32 %v2843_v33 }
 0x394   :  { %6284 = vpow2.f32 %v2841_v0 }
 0x395   :  { %v7419_v23 = vpop.eup %6280 }
 0x396   :  { %v2731_v2 = vpop.xlane.xlu1 %2730  ;;  %v2909_v42 = vsel %vm2698_vm3, %v7419_v23, 0.0 }
 0x397   :  { %v2728_v57 = vpop.xlane.xlu0 %2727  ;;  %v2805_v8 = vsub.f32 %v7245_v7, %v2731_v2  ;;  %2910 = vadd.xlane.f32.xlu1 %v2909_v42 }
 0x398   :  { %v2804_v54 = vsub.f32 %v7249_v9, %v2728_v57 }
 0x399   :  { %v2847_v45 = vmul.f32 1.442695, %v2805_v8 }
 0x39a   :  { %v2845_v52 = vmul.f32 1.442695, %v2804_v54 }
 0x39b   :  { %6286 = vpow2.f32 %v2847_v45 }
 0x39c   :  { %6288 = vpow2.f32 %v2845_v52 }
 0x39d   :  { %v7425_v48 = vpop.eup %6282 }
 0x39e   :  { %v7427_v10 = vpop.eup %6284  ;;  %v2737_v41 = vpop.xlane.xlu1 %2736  ;;  %v2915_v30 = vsel %vm2698_vm3, %v7425_v48, 0.0 }
 0x39f   :  { %v2734_v12 = vpop.xlane.xlu0 %2733  ;;  %v2807_v31 = vsub.f32 %v7258_v46, %v2737_v41  ;;  %v2912_v7 = vsel %vm2698_vm3, %v7427_v10, 0.0  ;;  %2916 = vadd.xlane.f32.xlu1 %v2915_v30 }
 0x3a0   :  { %v2806_v9 = vsub.f32 %v7262_v11, %v2734_v12  ;;  %2913 = vadd.xlane.f32.xlu0 %v2912_v7 }
 0x3a1   :  { %v2851_v13 = vmul.f32 1.442695, %v2807_v31 }
 0x3a2   :  { %v2849_v55 = vmul.f32 1.442695, %v2806_v9  ;;  %v2893_v6 = vpop.xlane.xlu1 %2892 }
 0x3a3   :  { %6290 = vpow2.f32 %v2851_v13 }
 0x3a4   :  { %6292 = vpow2.f32 %v2849_v55 }
 0x3a5   :  { %v7435_v33 = vpop.eup %6286  ;;  %6294 = vrcp.f32 %v2893_v6 }
 0x3a6   :  { %v7437_v0 = vpop.eup %6288  ;;  %v2743_v2 = vpop.xlane.xlu1 %2742  ;;  %v2921_v46 = vsel %vm2698_vm3, %v7435_v33, 0.0 }
 0x3a7   :  { %v2740_v42 = vpop.xlane.xlu0 %2739  ;;  %v2809_v57 = vsub.f32 %v7275_v18, %v2743_v2  ;;  %v2918_v11 = vsel %vm2698_vm3, %v7437_v0, 0.0  ;;  %2922 = vadd.xlane.f32.xlu1 %v2921_v46 }
 0x3a8   :  { %v2808_v8 = vsub.f32 %v7279_v58, %v2740_v42  ;;  %2919 = vadd.xlane.f32.xlu0 %v2918_v11 }
 0x3a9   :  { %v2855_v54 = vmul.f32 1.442695, %v2809_v57 }
 0x3aa   :  { %v2853_v45 = vmul.f32 1.442695, %v2808_v8 }
 0x3ab   :  { %6296 = vpow2.f32 %v2855_v54  ;;  %v2896_v52 = vpop.xlane.xlu0 %2895 }
 0x3ac   :  { %6298 = vpow2.f32 %v2853_v45 }
 0x3ad   :  { %v7445_v41 = vpop.eup %6290  ;;  %6300 = vrcp.f32 %v2896_v52 }
 0x3ae   :  { %v7447_v30 = vpop.eup %6292  ;;  %v2749_v12 = vpop.xlane.xlu1 %2748  ;;  %v2927_v18 = vsel %vm2698_vm3, %v7445_v41, 0.0 }
 0x3af   :  { %v6295_v31 = vpop.eup %6294  ;;  %v2746_v7 = vpop.xlane.xlu0 %2745  ;;  %v2811_v9 = vsub.f32 %v7292_v35, %v2749_v12  ;;  %v2924_v58 = vsel %vm2698_vm3, %v7447_v30, 0.0  ;;  %2928 = vadd.xlane.f32.xlu1 %v2927_v18  ;;  %v7841_v35 = vmov 0.0  }
 0x3b0   :  { %v3019_v13 = vmul.f32 %v6295_v31, %v7268_v1  ;;  %v2810_v55 = vsub.f32 %v7296_v3, %v2746_v7  ;;  %2925 = vadd.xlane.f32.xlu0 %v2924_v58 }
 0x3b1   :  { %v2859_v6 = vmul.f32 1.442695, %v2811_v9 }
 0x3b2   :  { %v2857_v2 = vmul.f32 1.442695, %v2810_v55  ;;  %v3051_v46 = vpack.c.bf16 %v3019_v13, %v3019_v13  ;;  %v2899_v42 = vpop.xlane.xlu1 %2898 }
 0x3b3   :  { %6302 = vpow2.f32 %v2859_v6 }
 0x3b4   :  { %6304 = vpow2.f32 %v2857_v2  ;;  %5812 = vmatmul.mubr.msk.bf16.vlgmr.msra.gmra.mrb[68].mxu0 %vm2698_vm3, %v3051_v46 }
 0x3b5   :  { %v7457_v57 = vpop.eup %6296  ;;  %5822 = vmatpush3.bf16.msra.mxu0 %v6926_v39  ;;  %6306 = vrcp.f32 %v2899_v42  ;;  %5823 = vmatprep.mubr.msk.bf16.mxu0 %vm6595_vm0, %v7841_v35 }
 0x3b6   :  { %v7462_v1 = vpop.eup %6298  ;;  %v2755_v3 = vpop.xlane.xlu1 %2754  ;;  %v2933_v11 = vsel %vm2698_vm3, %v7457_v57, 0.0  ;;  %5833 = vmatprep.subr.bf16.mxu0 %v7841_v35 }
 0x3b7   :  { %v6301_v8 = vpop.eup %6300  ;;  %v2752_v54 = vpop.xlane.xlu0 %2751  ;;  %v2813_v45 = vsub.f32 %v7308_v29, %v2755_v3  ;;  %v2930_v52 = vsel %vm2698_vm3, %v7462_v1, 0.0  ;;  %2934 = vadd.xlane.f32.xlu1 %v2933_v11 }
 0x3b8   :  { %v3020_v39 = vmul.f32 %v6301_v8, %v7285_v34  ;;  %v2812_v12 = vsub.f32 %v7312_v44, %v2752_v54  ;;  %2931 = vadd.xlane.f32.xlu0 %v2930_v52 }
 0x3b9   :  { %v2863_v18 = vmul.f32 1.442695, %v2813_v45 }
 0x3ba   :  { %v2861_v31 = vmul.f32 1.442695, %v2812_v12  ;;  %v3052_v7 = vpack.c.bf16 %v3020_v39, %v3020_v39  ;;  %v7510_v52 = vpop.permute.xlu1 %1166 }
 0x3bb   :  { %6308 = vpow2.f32 %v2863_v18  ;;  %v2902_v9 = vpop.xlane.xlu0 %2901 }
 0x3bc   :  { %6310 = vpow2.f32 %v2861_v31  ;;  %5818 = vmatmul.mubr.msk.bf16.vlgmr.msra.gmra.mrb[100].mxu1 %vm2698_vm3, %v3052_v7 }
 0x3bd   :  { %v7473_v58 = vpop.eup %6302  ;;  %5828 = vmatpush3.bf16.msra.mxu1 %v6938_v56  ;;  %6312 = vrcp.f32 %v2902_v9  ;;  %5829 = vmatprep.mubr.msk.bf16.mxu1 %vm6595_vm0, %v7841_v35 }
 0x3be   :  { %v7478_v34 = vpop.eup %6304  ;;  %v2939_v29 = vsel %vm2698_vm3, %v7473_v58, 0.0  ;;  %5839 = vmatprep.subr.bf16.mxu1 %v7841_v35 }
 0x3bf   :  { %v6307_v44 = vpop.eup %6306  ;;  %v2758_v13 = vpop.xlane.xlu0 %2757  ;;  %v2936_v55 = vsel %vm2698_vm3, %v7478_v34, 0.0  ;;  %2940 = vadd.xlane.f32.xlu1 %v2939_v29 }
 0x3c0   :  { %v3021_v6 = vmul.f32 %v6307_v44, %v7302_v17  ;;  %v2814_v56 = vsub.f32 %v7324_v15, %v2758_v13  ;;  %2937 = vadd.xlane.f32.xlu0 %v2936_v55 }
 0x3c2   :  { %v2865_v2 = vmul.f32 1.442695, %v2814_v56  ;;  %v3053_v46 = vpack.c.bf16 %v3021_v6, %v3021_v6 }
 0x3c3   :  { %v7514_v12 = vpop.permute.xlu0 %1164 }
 0x3c4   :  { %6314 = vpow2.f32 %v2865_v2  ;;  %5824 = vmatmul.mubr.msk.bf16.vlgmr.msra.gmra.mrb[72].mxu0 %vm2698_vm3, %v3053_v46 }
 0x3c5   :  { %v7488_v42 = vpop.eup %6308  ;;  %5834 = vmatpush3.bf16.msra.mxu0 %v7180_v16  ;;  %5835 = vmatprep.mubr.msk.bf16.mxu0 %vm6595_vm0, %v7841_v35 }
 0x3c6   :  { %v7493_v3 = vpop.eup %6310  ;;  %v2945_v17 = vsel %vm2698_vm3, %v7488_v42, 0.0  ;;  %5845 = vmatprep.subr.bf16.mxu0 %v7841_v35 }
 0x3c7   :  { %v6313_v15 = vpop.eup %6312  ;;  %v2942_v11 = vsel %vm2698_vm3, %v7493_v3, 0.0  ;;  %2946 = vadd.xlane.f32.xlu1 %v2945_v17 }
 0x3c8   :  { %v3022_v8 = vmul.f32 %v6313_v15, %v7318_v22  ;;  %2943 = vadd.xlane.f32.xlu0 %v2942_v11  ;;  %v7512_v22 = vpop.permute.xlu1 %1168 }
 0x3ca   :  { %v3054_v54 = vpack.c.bf16 %v3022_v8, %v3022_v8 }
 0x3cc   :  { %5830 = vmatmul.mubr.msk.bf16.vlgmr.msra.gmra.mrb[104].mxu1 %vm2698_vm3, %v3054_v54 }
 0x3cd   :  { %5840 = vmatpush3.bf16.msra.mxu1 %v7178_v59  ;;  %5841 = vmatprep.mubr.msk.bf16.mxu1 %vm6595_vm0, %v7841_v35 }
 0x3ce   :  { %v7505_v16 = vpop.eup %6314  ;;  %5851 = vmatprep.subr.bf16.mxu1 %v7841_v35 }
 0x3cf   :  { %v2948_v45 = vsel %vm2698_vm3, %v7505_v16, 0.0 }
 0x3d0   :  { %2949 = vadd.xlane.f32.xlu0 %v2948_v45 }
 0x3ef   :  { %v2761_v39 = vpop.xlane.xlu1 %2760 }
 0x3f0   :  { %v2815_v59 = vsub.f32 %v7336_v36, %v2761_v39 }
 0x3f2   :  { %v2867_v18 = vmul.f32 1.442695, %v2815_v59 }
 0x3f3   :  { %v2767_v31 = vpop.xlane.xlu1 %2766 }
 0x3f4   :  { %6316 = vpow2.f32 %v2867_v18  ;;  %v2764_v7 = vpop.xlane.xlu0 %2763  ;;  %v2817_v9 = vsub.f32 %v7342_v25, %v2767_v31 }
 0x3f5   :  { %v2816_v29 = vsub.f32 %v7346_v43, %v2764_v7 }
 0x3f6   :  { %v2871_v44 = vmul.f32 1.442695, %v2817_v9 }
 0x3f7   :  { %v2869_v13 = vmul.f32 1.442695, %v2816_v29  ;;  %v2773_v55 = vpop.xlane.xlu1 %2772 }
 0x3f8   :  { %6318 = vpow2.f32 %v2871_v44  ;;  %v2770_v6 = vpop.xlane.xlu0 %2769  ;;  %v2819_v56 = vsub.f32 %v7352_v53, %v2773_v55 }
 0x3f9   :  { %6320 = vpow2.f32 %v2869_v13  ;;  %v2818_v2 = vsub.f32 %v7358_v51, %v2770_v6 }
 0x3fa   :  { %v2875_v46 = vmul.f32 1.442695, %v2819_v56 }
 0x3fb   :  { %v2873_v36 = vmul.f32 1.442695, %v2818_v2  ;;  %v2779_v17 = vpop.xlane.xlu1 %2778 }
 0x3fc   :  { %6322 = vpow2.f32 %v2875_v46  ;;  %v2776_v15 = vpop.xlane.xlu0 %2775  ;;  %v2821_v11 = vsub.f32 %v7364_v28, %v2779_v17 }
 0x3fd   :  { %6324 = vpow2.f32 %v2873_v36  ;;  %v2820_v25 = vsub.f32 %v7370_v32, %v2776_v15 }
 0x3fe   :  { %v7523_v43 = vpop.eup %6316  ;;  %v2879_v8 = vmul.f32 1.442695, %v2821_v11 }
 0x3ff   :  { %v2877_v54 = vmul.f32 1.442695, %v2820_v25  ;;  %v2951_v53 = vsel %vm2698_vm3, %v7523_v43, 0.0  ;;  %v2785_v44 = vpop.xlane.xlu1 %2784 }
 0x400   :  { %6326 = vpow2.f32 %v2879_v8  ;;  %v2782_v45 = vpop.xlane.xlu0 %2781  ;;  %2952 = vadd.xlane.f32.xlu1 %v2951_v53 }
 0x401   :  { %6328 = vpow2.f32 %v2877_v54  ;;  %v2822_v51 = vsub.f32 %v7382_v50, %v2782_v45 }
 0x402   :  { %v7528_v39 = vpop.eup %6318 }
 0x403   :  { %v7530_v59 = vpop.eup %6320  ;;  %v2881_v28 = vmul.f32 1.442695, %v2822_v51  ;;  %v2957_v32 = vsel %vm2698_vm3, %v7528_v39, 0.0  ;;  %v2791_v2 = vpop.xlane.xlu1 %2790 }
 0x404   :  { %v2954_v18 = vsel %vm2698_vm3, %v7530_v59, 0.0  ;;  %2958 = vadd.xlane.f32.xlu1 %v2957_v32  ;;  %v2788_v36 = vpop.xlane.xlu0 %2787 }
 0x405   :  { %6330 = vpow2.f32 %v2881_v28  ;;  %2955 = vadd.xlane.f32.xlu0 %v2954_v18 }
 0x406   :  { %v7536_v31 = vpop.eup %6322 }
 0x407   :  { %v7538_v7 = vpop.eup %6324  ;;  %v2963_v50 = vsel %vm2698_vm3, %v7536_v31, 0.0 }
 0x408   :  { %v2960_v9 = vsel %vm2698_vm3, %v7538_v7, 0.0  ;;  %2964 = vadd.xlane.f32.xlu1 %v2963_v50  ;;  %v2794_v15 = vpop.xlane.xlu0 %2793 }
 0x409   :  { %2961 = vadd.xlane.f32.xlu0 %v2960_v9 }
 0x40a   :  { %v7544_v29 = vpop.eup %6326 }
 0x40b   :  { %v7546_v13 = vpop.eup %6328  ;;  %v2969_v55 = vsel %vm2698_vm3, %v7544_v29, 0.0 }
 0x40c   :  { %v2966_v6 = vsel %vm2698_vm3, %v7546_v13, 0.0  ;;  %2970 = vadd.xlane.f32.xlu1 %v2969_v55 }
 0x40d   :  { %2967 = vadd.xlane.f32.xlu0 %v2966_v6 }
 0x40f   :  { %v7552_v56 = vpop.eup %6330 }
 0x410   :  { %v2972_v46 = vsel %vm2698_vm3, %v7552_v56, 0.0 }
 0x411   :  { %2973 = vadd.xlane.f32.xlu0 %v2972_v46 }
 0x414   :  { %v2905_v17 = vpop.xlane.xlu1 %2904 }
 0x415   :  { %6332 = vrcp.f32 %v2905_v17 }
 0x41c   :  { %v2908_v11 = vpop.xlane.xlu0 %2907 }
 0x41d   :  { %6334 = vrcp.f32 %v2908_v11  ;;  %1176 = vrot.lane.b32.xlu1 %v6914_v26, %s6597_s6 }
 0x41f   :  { %v6333_v25 = vpop.eup %6332 }
 0x420   :  { %v3023_v8 = vmul.f32 %v6333_v25, %v7408_v4  ;;  %v2823_v4 = vsub.f32 %v7376_v49, %v2785_v44  ;;  %v2825_v49 = vsub.f32 %v7390_v5, %v2791_v2 }
 0x422   :  { %v3055_v54 = vpack.c.bf16 %v3023_v8, %v3023_v8  ;;  %v2883_v50 = vmul.f32 1.442695, %v2823_v4  ;;  %v2887_v46 = vmul.f32 1.442695, %v2825_v49 }
 0x424   :  { %5836 = vmatmul.mubr.msk.bf16.vlgmr.msra.gmra.mrb[76].mxu0 %vm2698_vm3, %v3055_v54  ;;  %v2911_v53 = vpop.xlane.xlu1 %2910 }
 0x425   :  { %5846 = vmatpush3.bf16.msra.mxu0 %v7212_v20  ;;  %6336 = vrcp.f32 %v2911_v53  ;;  %5847 = vmatprep.mubr.msk.bf16.mxu0 %vm6595_vm0, %v7841_v35 }
 0x426   :  { %5857 = vmatprep.subr.bf16.mxu0 %v7841_v35 }
 0x427   :  { %v6335_v45 = vpop.eup %6334  ;;  %1174 = vrot.lane.b32.xlu0 %v6897_v14, %s6597_s6 }
 0x428   :  { %v3024_v51 = vmul.f32 %v6335_v45, %v7413_v60  ;;  %v2824_v60 = vsub.f32 %v7394_v40, %v2788_v36 }
 0x42a   :  { %v3056_v28 = vpack.c.bf16 %v3024_v51, %v3024_v51  ;;  %v2885_v55 = vmul.f32 1.442695, %v2824_v60 }
 0x42c   :  { %5842 = vmatmul.mubr.msk.bf16.vlgmr.msra.gmra.mrb[108].mxu1 %vm2698_vm3, %v3056_v28  ;;  %v2917_v32 = vpop.xlane.xlu1 %2916 }
 0x42d   :  { %5852 = vmatpush3.bf16.msra.mxu1 %v7200_v47  ;;  %v2914_v20 = vpop.xlane.xlu0 %2913  ;;  %6338 = vrcp.f32 %v2917_v32  ;;  %5853 = vmatprep.mubr.msk.bf16.mxu1 %vm6595_vm0, %v7841_v35  ;;  %v2826_v47 = vsub.f32 %v7402_v37, %v2794_v15 }
 0x42e   :  { %6340 = vrcp.f32 %v2914_v20  ;;  %5863 = vmatprep.subr.bf16.mxu1 %v7841_v35 }
 0x42f   :  { %v6337_v18 = vpop.eup %6336  ;;  %6342 = vpow2.f32 %v2883_v50 }
 0x430   :  { %v3025_v9 = vmul.f32 %v6337_v18, %v7419_v23  ;;  %v2889_v23 = vmul.f32 1.442695, %v2826_v47 }
 0x432   :  { %v3057_v44 = vpack.c.bf16 %v3025_v9, %v3025_v9 }
 0x434   :  { %5848 = vmatmul.mubr.msk.bf16.vlgmr.msra.gmra.mrb[80].mxu0 %vm2698_vm3, %v3057_v44  ;;  %v2923_v6 = vpop.xlane.xlu1 %2922 }
 0x435   :  { %v2920_v17 = vpop.xlane.xlu0 %2919  ;;  %5858 = vmatpush3.bf16.msra.mxu0 %v7184_v62  ;;  %6344 = vrcp.f32 %v2923_v6  ;;  %5859 = vmatprep.mubr.msk.bf16.mxu0 %vm6595_vm0, %v7841_v35 }
 0x436   :  { %6346 = vrcp.f32 %v2920_v17  ;;  %5869 = vmatprep.subr.bf16.mxu0 %v7841_v35 }
 0x437   :  { %v6339_v5 = vpop.eup %6338  ;;  %6348 = vpow2.f32 %v2885_v55 }
 0x438   :  { %v6341_v40 = vpop.eup %6340  ;;  %v3027_v37 = vmul.f32 %v6339_v5, %v7425_v48  ;;  %6350 = vpow2.f32 %v2887_v46  ;;  %v7842_v5 = vld [vmem:[#allocation23_spill] sm:$0xff] }
 0x439   :  { %v3026_v2 = vmul.f32 %v6341_v40, %v7427_v10  ;;  %6352 = vpow2.f32 %v2889_v23  ;;  %v7585_v11 = vpop.eup %6342 }
 0x43a   :  { %v3059_v36 = vpack.c.bf16 %v3027_v37, %v3027_v37  ;;  %v2975_v54 = vsel %vm2698_vm3, %v7585_v11, 0.0  ;;  %v7843_v37 = vld [vmem:[#allocation22_spill] sm:$0xff] }
 0x43b   :  { %v3058_v15 = vpack.c.bf16 %v3026_v2, %v3026_v2 }
 0x43c   :  { %5860 = vmatmul.mubr.msk.bf16.vlgmr.msra.gmra.mrb[84].mxu0 %vm2698_vm3, %v3059_v36  ;;  %v2929_v62 = vpop.xlane.xlu1 %2928 }
 0x43d   :  { %5854 = vmatmul.mubr.msk.bf16.vlgmr.msra.gmra.mrb[112].mxu1 %vm2698_vm3, %v3058_v15  ;;  %v2926_v25 = vpop.xlane.xlu0 %2925  ;;  %5870 = vmatpush3.bf16.msra.mxu0 %v7220_v27  ;;  %6354 = vrcp.f32 %v2929_v62  ;;  %v7844_v62 = vld [vmem:[#allocation25_spill] sm:$0xff] }
 0x43e   :  { %5864 = vmatpush3.bf16.msra.mxu1 %v7182_v63  ;;  %6356 = vrcp.f32 %v2926_v25  ;;  %5865 = vmatprep.mubr.msk.bf16.mxu1 %vm6595_vm0, %v7841_v35 }
 0x43f   :  { %v6345_v48 = vpop.eup %6344  ;;  %5871 = vmatprep.mubr.msk.bf16.mxu0 %vm6595_vm0, %v7841_v35  ;;  %5875 = vmatprep.subr.bf16.mxu1 %v7841_v35 }
 0x440   :  { %v6347_v10 = vpop.eup %6346  ;;  %v3029_v8 = vmul.f32 %v6345_v48, %v7435_v33  ;;  %5881 = vmatprep.subr.bf16.mxu0 %v7841_v35  ;;  %v7845_v48 = vld [vmem:[#allocation24_spill] sm:$0xff] }
 0x441   :  { %v3028_v63 = vmul.f32 %v6347_v10, %v7437_v0  ;;  %2976 = vadd.xlane.f32.xlu1 %v2975_v54  ;;  %v7600_v27 = vpop.eup %6348 }
 0x442   :  { %v3061_v53 = vpack.c.bf16 %v3029_v8, %v3029_v8  ;;  %v7602_v45 = vpop.eup %6350  ;;  %v2978_v4 = vsel %vm2698_vm3, %v7600_v27, 0.0 }
 0x443   :  { %v3060_v51 = vpack.c.bf16 %v3028_v63, %v3028_v63  ;;  %v7609_v0 = vpop.eup %6352  ;;  %v2981_v32 = vsel %vm2698_vm3, %v7602_v45, 0.0 }
 0x444   :  { %5872 = vmatmul.mubr.msk.bf16.vlgmr.msra.gmra.mrb[88].mxu0 %vm2698_vm3, %v3061_v53  ;;  %v2935_v28 = vpop.xlane.xlu1 %2934  ;;  %v2984_v50 = vsel %vm2698_vm3, %v7609_v0, 0.0 }
 0x445   :  { %5866 = vmatmul.mubr.msk.bf16.vlgmr.msra.gmra.mrb[116].mxu1 %vm2698_vm3, %v3060_v51  ;;  %v2932_v33 = vpop.xlane.xlu0 %2931  ;;  %5882 = vmatpush3.bf16.msra.mxu0 %v7188_v19  ;;  %6358 = vrcp.f32 %v2935_v28 }
 0x446   :  { %5876 = vmatpush3.bf16.msra.mxu1 %v7210_v38  ;;  %6360 = vrcp.f32 %v2932_v33  ;;  %2979 = vadd.xlane.f32.xlu0 %v2978_v4 }
 0x447   :  { %v6355_v20 = vpop.eup %6354  ;;  %2982 = vadd.xlane.f32.xlu1 %v2981_v32  ;;  %5877 = vmatprep.mubr.msk.bf16.mxu1 %vm6595_vm0, %v7841_v35 }
 0x448   :  { %v6357_v18 = vpop.eup %6356  ;;  %v3031_v19 = vmul.f32 %v6355_v20, %v7445_v41  ;;  %5883 = vmatprep.mubr.msk.bf16.mxu0 %vm6595_vm0, %v7841_v35  ;;  %5887 = vmatprep.subr.bf16.mxu1 %v7841_v35 }
 0x449   :  { %v3030_v38 = vmul.f32 %v6357_v18, %v7447_v30  ;;  %5893 = vmatprep.subr.bf16.mxu0 %v7841_v35 }
 0x44a   :  { %2985 = vadd.xlane.f32.xlu0 %v2984_v50  ;;  %v3063_v60 = vpack.c.bf16 %v3031_v19, %v3031_v19 }
 0x44b   :  { %v3062_v9 = vpack.c.bf16 %v3030_v38, %v3030_v38 }
 0x44c   :  { %5884 = vmatmul.mubr.msk.bf16.vlgmr.msra.gmra.mrb[92].mxu0 %vm2698_vm3, %v3063_v60  ;;  %v2941_v49 = vpop.xlane.xlu1 %2940 }
 0x44d   :  { %5878 = vmatmul.mubr.msk.bf16.vlgmr.msra.gmra.mrb[120].mxu1 %vm2698_vm3, %v3062_v9  ;;  %v2938_v41 = vpop.xlane.xlu0 %2937  ;;  %5894 = vmatpush3.bf16.msra.mxu0 %v7226_v61  ;;  %6362 = vrcp.f32 %v2941_v49 }
 0x44e   :  { %5888 = vmatpush3.bf16.msra.mxu1 %v7186_v24  ;;  %6364 = vrcp.f32 %v2938_v41  ;;  %5889 = vmatprep.mubr.msk.bf16.mxu1 %vm6595_vm0, %v7841_v35 }
 0x44f   :  { %v6359_v30 = vpop.eup %6358  ;;  %5895 = vmatprep.mubr.msk.bf16.mxu0 %vm6595_vm0, %v7841_v35  ;;  %5899 = vmatprep.subr.bf16.mxu1 %v7841_v35 }
 0x450   :  { %v6361_v44 = vpop.eup %6360  ;;  %v3033_v55 = vmul.f32 %v6359_v30, %v7457_v57  ;;  %5905 = vmatprep.subr.bf16.mxu0 %v7841_v35 }
 0x451   :  { %v3032_v61 = vmul.f32 %v6361_v44, %v7462_v1 }
 0x452   :  { %v3065_v47 = vpack.c.bf16 %v3033_v55, %v3033_v55 }
 0x453   :  { %v3064_v6 = vpack.c.bf16 %v3032_v61, %v3032_v61 }
 0x454   :  { %5896 = vmatmul.mubr.msk.bf16.vlgmr.msra.gmra.mrb[96].mxu0 %vm2698_vm3, %v3065_v47  ;;  %v2947_v24 = vpop.xlane.xlu1 %2946 }
 0x455   :  { %5890 = vmatmul.mubr.msk.bf16.vlgmr.msra.gmra.mrb[124].mxu1 %vm2698_vm3, %v3064_v6  ;;  %v2944_v46 = vpop.xlane.xlu0 %2943  ;;  %5906 = vmatpush3.bf16.msra.mxu0 %v6897_v14  ;;  %6366 = vrcp.f32 %v2947_v24  ;;  %v7846_v6 = vld [vmem:[#allocation28_spill] sm:$0xff] }
 0x456   :  { %5900 = vmatpush3.bf16.msra.mxu1 %v7214_v21  ;;  %6368 = vrcp.f32 %v2944_v46  ;;  %5901 = vmatprep.mubr.msk.bf16.mxu1 %vm6595_vm0, %v7841_v35 }
 0x457   :  { %v6363_v57 = vpop.eup %6362  ;;  %5907 = vmatprep.mubr.msk.bf16.mxu0 %vm6595_vm0, %v7841_v35  ;;  %5911 = vmatprep.subr.bf16.mxu1 %v7841_v35 }
 0x458   :  { %v6365_v1 = vpop.eup %6364  ;;  %v3035_v17 = vmul.f32 %v6363_v57, %v7473_v58  ;;  %1180 = vrot.lane.b32.xlu1 %v7842_v5, %s6597_s6  ;;  %5917 = vmatprep.subr.bf16.mxu0 %v7841_v35 }
 0x459   :  { %v3034_v14 = vmul.f32 %v6365_v1, %v7478_v34 }
 0x45a   :  { %v3067_v21 = vpack.c.bf16 %v3035_v17, %v3035_v17 }
 0x45b   :  { %v3066_v40 = vpack.c.bf16 %v3034_v14, %v3034_v14 }
 0x45c   :  { %5908 = vmatmul.mubr.msk.bf16.vlgmr.msra.gmra.mrb[100].mxu0 %vm2698_vm3, %v3067_v21  ;;  %v7847_v21 = vld [vmem:[#allocation27_spill] sm:$0xff] }
 0x45d   :  { %5902 = vmatmul.mubr.msk.bf16.vlgmr.msra.gmra.mrb[128].mxu1 %vm2698_vm3, %v3066_v40  ;;  %v2950_v23 = vpop.xlane.xlu0 %2949  ;;  %5918 = vmatpush3.bf16.msra.mxu0 %v7843_v37 }
 0x45e   :  { %5912 = vmatpush3.bf16.msra.mxu1 %v6914_v26  ;;  %6370 = vrcp.f32 %v2950_v23  ;;  %5913 = vmatprep.mubr.msk.bf16.mxu1 %vm6595_vm0, %v7841_v35 }
 0x45f   :  { %v6367_v58 = vpop.eup %6366  ;;  %5919 = vmatprep.mubr.msk.bf16.mxu0 %vm6595_vm0, %v7841_v35  ;;  %5923 = vmatprep.subr.bf16.mxu1 %v7841_v35 }
 0x460   :  { %v6369_v34 = vpop.eup %6368  ;;  %v3037_v2 = vmul.f32 %v6367_v58, %v7488_v42  ;;  %1178 = vrot.lane.b32.xlu0 %v7843_v37, %s6597_s6  ;;  %5929 = vmatprep.subr.bf16.mxu0 %v7841_v35  ;;  %v7848_v58 = vld [vmem:[#allocation26_spill] sm:$0xff] }
 0x461   :  { %v3036_v26 = vmul.f32 %v6369_v34, %v7493_v3 }
 0x462   :  { %v3069_v36 = vpack.c.bf16 %v3037_v2, %v3037_v2 }
 0x463   :  { %v3068_v15 = vpack.c.bf16 %v3036_v26, %v3036_v26 }
 0x464   :  { %5920 = vmatmul.mubr.msk.bf16.vlgmr.msra.gmra.mrb[104].mxu0 %vm2698_vm3, %v3069_v36 }
 0x465   :  { %5914 = vmatmul.mubr.msk.bf16.vlgmr.msra.gmra.mrb[132].mxu1 %vm2698_vm3, %v3068_v15  ;;  %5930 = vmatpush3.bf16.msra.mxu0 %v7844_v62 }
 0x466   :  { %5924 = vmatpush3.bf16.msra.mxu1 %v7842_v5  ;;  %5925 = vmatprep.mubr.msk.bf16.mxu1 %vm6595_vm0, %v7841_v35 }
 0x467   :  { %5935 = vmatprep.subr.bf16.mxu1 %v7841_v35  ;;  %5931 = vmatprep.mubr.msk.bf16.mxu0 %vm6595_vm0, %v7841_v35 }
 0x468   :  { %v6371_v42 = vpop.eup %6370  ;;  %5941 = vmatprep.subr.bf16.mxu0 %v7841_v35 }
 0x469   :  { %v3038_v3 = vmul.f32 %v6371_v42, %v7505_v16 }
 0x46b   :  { %v3070_v25 = vpack.c.bf16 %v3038_v3, %v3038_v3 }
 0x46d   :  { %5926 = vmatmul.mubr.msk.bf16.vlgmr.msra.gmra.mrb[136].mxu1 %vm2698_vm3, %v3070_v25 }
 0x46e   :  { %5936 = vmatpush3.bf16.msra.mxu1 %v7845_v48  ;;  %5937 = vmatprep.mubr.msk.bf16.mxu1 %vm6595_vm0, %v7841_v35 }
 0x46f   :  { %5947 = vmatprep.subr.bf16.mxu1 %v7841_v35 }
 0x487   :  { %v7680_v10 = vpop.f32.mrb[68].mxu0 }
 0x488   :  { %v5813_v8 = vpop.f32.mrb[69].mxu0 }
 0x489   :  { %v3123_v54 = vpop.f32.mrb[70].mxu0 }
 0x48a   :  { %v5814_v63 = vpop.f32.mrb[71].mxu0 }
 0x48d   :  { %v2953_v53 = vpop.xlane.xlu1 %2952 }
 0x48e   :  { %6372 = vrcp.f32 %v2953_v53  ;;  %v6222_v53 = vld [vmem:[#allocation13 + $0x4] ss:$8 sps:$4 sm:$0xff]  }
 0x48f   :  { %v7682_v51 = vpop.f32.mrb[100].mxu1 }
 0x490   :  { %v4459_v16 = vpack.c.bf16 %v7682_v51, %v7680_v10  ;;  %v5819_v28 = vpop.f32.mrb[101].mxu1 }
 0x491   :  { %v3166_v33 = vpop.f32.mrb[102].mxu1  ;;  %v2959_v4 = vpop.xlane.xlu1 %2958 }
 0x492   :  { %v5820_v32 = vpop.f32.mrb[103].mxu1  ;;  %v2956_v20 = vpop.xlane.xlu0 %2955  ;;  %6374 = vrcp.f32 %v2959_v4 }
 0x493   :  { %6376 = vrcp.f32 %v2956_v20 }
 0x495   :  { %v2965_v19 = vpop.xlane.xlu1 %2964 }
 0x496   :  { %v2962_v18 = vpop.xlane.xlu0 %2961 }
 0x497   :  { %6378 = vrcp.f32 %v2962_v18  ;;  %v7686_v38 = vpop.f32.mrb[72].mxu0 }
 0x498   :  { %v6373_v50 = vpop.eup %6372  ;;  %v5825_v60 = vpop.f32.mrb[73].mxu0  ;;  %6380 = vrcp.f32 %v2965_v19 }
 0x499   :  { %v3039_v9 = vmul.f32 %v6373_v50, %v7523_v43  ;;  %v3209_v49 = vpop.f32.mrb[74].mxu0  ;;  %v2971_v43 = vpop.xlane.xlu1 %2970 }
 0x49a   :  { %v5826_v41 = vpop.f32.mrb[75].mxu0  ;;  %v2968_v55 = vpop.xlane.xlu0 %2967  ;;  %v6223_v49 = vld [vmem:[#allocation13 + $0x10] ss:$8 sps:$4 sm:$0xff]  }
 0x49b   :  { %v3071_v30 = vpack.c.bf16 %v3039_v9, %v3039_v9  ;;  %6382 = vrcp.f32 %v2968_v55  ;;  %v6225_v9 = vld [vmem:[#allocation13 + $0x14] ss:$8 sps:$4 sm:$0xff]   ;;  %v6228_v41 = vld [vmem:[#allocation13 + $0x24] ss:$8 sps:$4 sm:$0xff]  }
 0x49c   :  { %v6375_v44 = vpop.eup %6374  ;;  %6384 = vrcp.f32 %v2971_v43  ;;  %v6231_v55 = vld [vmem:[#allocation13 + $0x34] ss:$8 sps:$4 sm:$0xff]  }
 0x49d   :  { %v6377_v61 = vpop.eup %6376  ;;  %5932 = vmatmul.mubr.msk.bf16.vlgmr.msra.gmra.mrb[108].mxu0 %vm2698_vm3, %v3071_v30  ;;  %v3041_v24 = vmul.f32 %v6375_v44, %v7528_v39  ;;  %v1177_v3 = vpop.permute.xlu1 %1176  ;;  %v6226_v44 = vld [vmem:[#allocation13 + $0x20] ss:$8 sps:$4 sm:$0xff]  }
 0x49e   :  { %v3040_v47 = vmul.f32 %v6377_v61, %v7530_v59  ;;  %5942 = vmatpush3.bf16.msra.mxu0 %v7846_v6  ;;  %5943 = vmatprep.mubr.msk.bf16.mxu0 %vm6595_vm0, %v7841_v35  ;;  %v2974_v37 = vpop.xlane.xlu0 %2973  ;;  %v6232_v6 = vld [vmem:[#allocation13 + $0x40] ss:$8 sps:$4 sm:$0xff]  }
 0x49f   :  { %v7695_v46 = vpop.f32.mrb[104].mxu1  ;;  %5953 = vmatprep.subr.bf16.mxu0 %v7841_v35  ;;  %v3073_v39 = vpack.c.bf16 %v3041_v24, %v3041_v24  ;;  %6386 = vrcp.f32 %v2974_v37 }
 0x4a0   :  { %v4460_v57 = vpack.c.bf16 %v7695_v46, %v7686_v38  ;;  %v5831_v1 = vpop.f32.mrb[105].mxu1  ;;  %v3072_v17 = vpack.c.bf16 %v3040_v47, %v3040_v47  ;;  %v6235_v38 = vld [vmem:[#allocation13 + $0x50] ss:$8 sps:$4 sm:$0xff]   ;;  %v6240_v46 = vld [vmem:[#allocation13 + $0x64] ss:$8 sps:$4 sm:$0xff]  }
 0x4a1   :  { %v6379_v5 = vpop.eup %6378  ;;  %v3252_v59 = vpop.f32.mrb[106].mxu1  ;;  %v6237_v1 = vld [vmem:[#allocation13 + $0x54] ss:$8 sps:$4 sm:$0xff]  }
 0x4a2   :  { %v5832_v14 = vpop.f32.mrb[107].mxu1  ;;  %5938 = vmatmul.mubr.msk.bf16.vlgmr.msra.gmra.mrb[140].mxu1 %vm2698_vm3, %v3072_v17  ;;  %v6381_v40 = vpop.eup %6380  ;;  %v3042_v23 = vmul.f32 %v6379_v5, %v7538_v7 }
 0x4a3   :  { %5948 = vmatpush3.bf16.msra.mxu1 %v7847_v21  ;;  %5949 = vmatprep.mubr.msk.bf16.mxu1 %vm6595_vm0, %v7841_v35  ;;  %v3043_v34 = vmul.f32 %v6381_v40, %v7536_v31 }
 0x4a4   :  { %5959 = vmatprep.subr.bf16.mxu1 %v7841_v35  ;;  %v3074_v2 = vpack.c.bf16 %v3042_v23, %v3042_v23 }
 0x4a5   :  { %5944 = vmatmul.mubr.msk.bf16.vlgmr.msra.gmra.mrb[112].mxu0 %vm2698_vm3, %v3073_v39  ;;  %v6383_v26 = vpop.eup %6382  ;;  %v3075_v7 = vpack.c.bf16 %v3043_v34, %v3043_v34 }
 0x4a6   :  { %5954 = vmatpush3.bf16.msra.mxu0 %v7848_v58  ;;  %5955 = vmatprep.mubr.msk.bf16.mxu0 %vm6595_vm0, %v7841_v35  ;;  %v6385_v36 = vpop.eup %6384  ;;  %v3044_v15 = vmul.f32 %v6383_v26, %v7546_v13 }
 0x4a7   :  { %5965 = vmatprep.subr.bf16.mxu0 %v7841_v35  ;;  %v3045_v31 = vmul.f32 %v6385_v36, %v7544_v29 }
 0x4a9   :  { %v6387_v62 = vpop.eup %6386  ;;  %v3077_v13 = vpack.c.bf16 %v3045_v31, %v3045_v31 }
 0x4aa   :  { %5950 = vmatmul.mubr.msk.bf16.vlgmr.msra.gmra.mrb[144].mxu1 %vm2698_vm3, %v3074_v2  ;;  %v3046_v42 = vmul.f32 %v6387_v62, %v7552_v56 }
 0x4ab   :  { %5960 = vmatpush3.bf16.msra.mxu1 %v7514_v12  ;;  %5961 = vmatprep.mubr.msk.bf16.mxu1 %vm6595_vm0, %v7841_v35  ;;  %v3076_v12 = vpack.c.bf16 %v3044_v15, %v3044_v15 }
 0x4ac   :  { %5971 = vmatprep.subr.bf16.mxu1 %v7841_v35  ;;  %v3078_v29 = vpack.c.bf16 %v3046_v42, %v3046_v42 }
 0x4ad   :  { %5956 = vmatmul.mubr.msk.bf16.vlgmr.msra.gmra.mrb[116].mxu0 %vm2698_vm3, %v3075_v7 }
 0x4ae   :  { %5966 = vmatpush3.bf16.msra.mxu0 %v7510_v52  ;;  %5967 = vmatprep.mubr.msk.bf16.mxu0 %vm6595_vm0, %v7841_v35  ;;  %v1175_v52 = vpop.permute.xlu0 %1174 }
 0x4af   :  { %5977 = vmatprep.subr.bf16.mxu0 %v7841_v35 }
 0x4b2   :  { %5962 = vmatmul.mubr.msk.bf16.vlgmr.msra.gmra.mrb[148].mxu1 %vm2698_vm3, %v3076_v12  ;;  %v6238_v12 = vld [vmem:[#allocation13 + $0x60] ss:$8 sps:$4 sm:$0xff]  }
 0x4b3   :  { %5972 = vmatpush3.bf16.msra.mxu1 %v7512_v22  ;;  %5973 = vmatprep.mubr.msk.bf16.mxu1 %vm6595_vm0, %v7841_v35 }
 0x4b4   :  { %5983 = vmatprep.subr.bf16.mxu1 %v7841_v35 }
 0x4b5   :  { %5968 = vmatmul.mubr.msk.bf16.vlgmr.msra.gmra.mrb[120].mxu0 %vm2698_vm3, %v3077_v13 }
 0x4b6   :  { %5978 = vmatpush3.bf16.msra.mxu0 %v1175_v52  ;;  %5979 = vmatprep.mubr.msk.bf16.mxu0 %vm6595_vm0, %v7841_v35  ;;  %v6243_v52 = vld [vmem:[#allocation13 + $0x74] ss:$8 sps:$4 sm:$0xff]  }
 0x4b7   :  { %5989 = vmatprep.subr.bf16.mxu0 %v7841_v35 }
 0x4ba   :  { %5974 = vmatmul.mubr.msk.bf16.vlgmr.msra.gmra.mrb[152].mxu1 %vm2698_vm3, %v3078_v29 }
 0x4bb   :  { %5984 = vmatpush3.bf16.msra.mxu1 %v1177_v3  ;;  %5985 = vmatprep.mubr.msk.bf16.mxu1 %vm6595_vm0, %v7841_v35 }
 0x4bc   :  { %5995 = vmatprep.subr.bf16.mxu1 %v7841_v35 }
 0x4ce   :  { %v2977_v22 = vpop.xlane.xlu1 %2976 }
 0x4cf   :  { %6388 = vrcp.f32 %v2977_v22 }
 0x4d3   :  { %v2980_v56 = vpop.xlane.xlu0 %2979 }
 0x4d4   :  { %6390 = vrcp.f32 %v2980_v56  ;;  %v2983_v25 = vpop.xlane.xlu1 %2982  ;;  %v6241_v56 = vld [vmem:[#allocation13 + $0x70] ss:$8 sps:$4 sm:$0xff]  }
 0x4d5   :  { %6392 = vrcp.f32 %v2983_v25  ;;  %v6246_v25 = vld [vmem:[#allocation13 + $0x84] ss:$8 sps:$4 sm:$0xff]  }
 0x4d7   :  { %v2986_v48 = vpop.xlane.xlu0 %2985 }
 0x4d8   :  { %6394 = vrcp.f32 %v2986_v48  ;;  %v1181_v50 = vpop.permute.xlu1 %1180 }
 0x4d9   :  { %v6389_v8 = vpop.eup %6388 }
 0x4da   :  { %v3047_v54 = vmul.f32 %v6389_v8, %v7585_v11  ;;  %v6220_v11 = vld [vmem:[#allocation13] ss:$8 sps:$4 sm:$0xff]  }
 0x4db   :  { %v1179_v33 = vpop.permute.xlu0 %1178 }
 0x4dc   :  { %v3079_v63 = vpack.c.bf16 %v3047_v54, %v3047_v54 }
 0x4de   :  { %v6391_v28 = vpop.eup %6390  ;;  %5980 = vmatmul.mubr.msk.bf16.vlgmr.msra.gmra.mrb[124].mxu0 %vm2698_vm3, %v3079_v63 }
 0x4df   :  { %v6393_v4 = vpop.eup %6392  ;;  %v3048_v32 = vmul.f32 %v6391_v28, %v7600_v27  ;;  %5990 = vmatpush3.bf16.msra.mxu0 %v1179_v33  ;;  %5991 = vmatprep.mubr.msk.bf16.mxu0 %vm6595_vm0, %v7841_v35 }
 0x4e0   :  { %v3049_v20 = vmul.f32 %v6393_v4, %v7602_v45  ;;  %4533 = vmatprep.subr.bf16.mxu0 %v6222_v53  ;;  %v7849_v45 = vmov 0  }
 0x4e1   :  { %v3080_v18 = vpack.c.bf16 %v3048_v32, %v3048_v32 }
 0x4e2   :  { %v6395_v19 = vpop.eup %6394  ;;  %v3081_v60 = vpack.c.bf16 %v3049_v20, %v3049_v20 }
 0x4e3   :  { %5986 = vmatmul.mubr.msk.bf16.vlgmr.msra.gmra.mrb[156].mxu1 %vm2698_vm3, %v3080_v18  ;;  %v3050_v27 = vmul.f32 %v6395_v19, %v7609_v0  ;;  %v6234_v0 = vld [vmem:[#allocation13 + $0x44] ss:$8 sps:$4 sm:$0xff]  }
 0x4e4   :  { %5996 = vmatpush3.bf16.msra.mxu1 %v1181_v50  ;;  %5997 = vmatprep.mubr.msk.bf16.mxu1 %vm6595_vm0, %v7841_v35  ;;  %v6229_v35 = vld [vmem:[#allocation13 + $0x30] ss:$8 sps:$4 sm:$0xff]   ;;  %v6244_v50 = vld [vmem:[#allocation13 + $0x80] ss:$8 sps:$4 sm:$0xff]  }
 0x4e5   :  { %v3082_v30 = vpack.c.bf16 %v3050_v27, %v3050_v27  ;;  %v6249_v27 = vld [vmem:[#allocation13 + $0x94] ss:$8 sps:$4 sm:$0xff]  }
 0x4e6   :  { %5992 = vmatmul.mubr.msk.bf16.vlgmr.msra.gmra.mrb[128].mxu0 %vm2698_vm3, %v3081_v60 }
 0x4e7   :  { %4534 = vmatpush1.bf16.msra.mxu0 %v6220_v11  ;;  %4565 = vmatprep.mubr.bf16.mxu0 %v7849_v45 }
 0x4e8   :  { %4535 = vmatprep.subr.bf16.mxu0 %v6225_v9 }
 0x4eb   :  { %5998 = vmatmul.mubr.msk.bf16.vlgmr.msra.gmra.mrb[160].mxu1 %vm2698_vm3, %v3082_v30  ;;  %4536 = vmatpush1.bf16.msra.mxu0 %v6223_v49 }
 0x4ec   :  { %4612 = vmatprep.subr.bf16.mxu0 %v6228_v41 }
 0x4ee   :  { %5437 = vmatmul.mubr.msk.bf16.vlgmr.msra.gmra.mrb[132].mxu0 %vm1186_vm1, %v4459_v16 }
 0x4ef   :  { %4575 = vmatprep.mubr.bf16.mxu0 %v7849_v45  ;;  %4613 = vmatpush1.bf16.msra.mxu0 %v6226_v44  ;;  %v6247_v44 = vld [vmem:[#allocation13 + $0x90] ss:$8 sps:$4 sm:$0xff]  }
 0x4f0   :  { %4614 = vmatprep.subr.bf16.mxu0 %v6231_v55  ;;  %v6252_v55 = vld [vmem:[#allocation13 + $0xa4] ss:$8 sps:$4 sm:$0xff]  }
 0x4f3   :  { %4615 = vmatpush1.bf16.msra.mxu0 %v6229_v35 }
 0x4f4   :  { %4691 = vmatprep.subr.bf16.mxu0 %v6234_v0 }
 0x4f6   :  { %5438 = vmatmul.mubr.msk.bf16.gmra.mrb[136].mxu0 %vm1186_vm1, %v4460_v57 }
 0x4f7   :  { %v3292_v61 = vpop.f32.mrb[76].mxu0  ;;  %4644 = vmatprep.mubr.bf16.mxu0 %v7849_v45 }
 0x4f8   :  { %v5837_v47 = vpop.f32.mrb[77].mxu0 }
 0x4f9   :  { %v3295_v10 = vpop.f32.mrb[78].mxu0 }
 0x4fa   :  { %v5838_v51 = vpop.f32.mrb[79].mxu0 }
 0x4ff   :  { %v3335_v16 = vpop.f32.mrb[108].mxu1 }
 0x500   :  { %v4461_v24 = vpack.c.bf16 %v3335_v16, %v3292_v61  ;;  %v5843_v43 = vpop.f32.mrb[109].mxu1 }
 0x501   :  { %v3338_v17 = vpop.f32.mrb[110].mxu1 }
 0x502   :  { %v5844_v5 = vpop.f32.mrb[111].mxu1  ;;  %5443 = vmatmul.mubr.msk.bf16.vlgmr.msra.gmra.mrb[132].mxu0 %vm1186_vm1, %v4461_v24 }
 0x503   :  { %4654 = vmatprep.mubr.bf16.mxu0 %v7849_v45  ;;  %4692 = vmatpush1.bf16.msra.mxu0 %v6232_v6  ;;  %v6250_v5 = vld [vmem:[#allocation13 + $0xa0] ss:$8 sps:$4 sm:$0xff]  }
 0x504   :  { %4693 = vmatprep.subr.bf16.mxu0 %v6237_v1 }
 0x507   :  { %v3378_v57 = vpop.f32.mrb[80].mxu0  ;;  %4694 = vmatpush1.bf16.msra.mxu0 %v6235_v38 }
 0x508   :  { %v5849_v59 = vpop.f32.mrb[81].mxu0  ;;  %4770 = vmatprep.subr.bf16.mxu0 %v6240_v46 }
 0x509   :  { %v3381_v14 = vpop.f32.mrb[82].mxu0  ;;  %v6255_v59 = vld [vmem:[#allocation13 + $0xb4] ss:$8 sps:$4 sm:$0xff]  }
 0x50a   :  { %v5850_v21 = vpop.f32.mrb[83].mxu0 }
 0x50f   :  { %v3464_v39 = vpop.f32.mrb[84].mxu0 }
 0x510   :  { %v3421_v40 = vpop.f32.mrb[112].mxu1  ;;  %v5861_v23 = vpop.f32.mrb[85].mxu0 }
 0x511   :  { %v4462_v37 = vpack.c.bf16 %v3421_v40, %v3378_v57  ;;  %v5855_v58 = vpop.f32.mrb[113].mxu1  ;;  %v3467_v34 = vpop.f32.mrb[86].mxu0  ;;  %v6253_v40 = vld [vmem:[#allocation13 + $0xb0] ss:$8 sps:$4 sm:$0xff]   ;;  %v6258_v23 = vld [vmem:[#allocation13 + $0xc4] ss:$8 sps:$4 sm:$0xff]  }
 0x512   :  { %v3424_v2 = vpop.f32.mrb[114].mxu1  ;;  %v5862_v26 = vpop.f32.mrb[87].mxu0 }
 0x513   :  { %v5856_v7 = vpop.f32.mrb[115].mxu1  ;;  %5444 = vmatmul.mubr.msk.bf16.gmra.mrb[136].mxu0 %vm1186_vm1, %v4462_v37 }
 0x514   :  { %4723 = vmatprep.mubr.bf16.mxu0 %v7849_v45 }
 0x517   :  { %v3550_v36 = vpop.f32.mrb[88].mxu0 }
 0x518   :  { %v3507_v15 = vpop.f32.mrb[116].mxu1  ;;  %v5873_v31 = vpop.f32.mrb[89].mxu0 }
 0x519   :  { %v4463_v62 = vpack.c.bf16 %v3507_v15, %v3464_v39  ;;  %v5867_v13 = vpop.f32.mrb[117].mxu1  ;;  %v3553_v42 = vpop.f32.mrb[90].mxu0 }
 0x51a   :  { %v3510_v29 = vpop.f32.mrb[118].mxu1  ;;  %v5874_v3 = vpop.f32.mrb[91].mxu0 }
 0x51b   :  { %v5868_v22 = vpop.f32.mrb[119].mxu1  ;;  %5449 = vmatmul.mubr.msk.bf16.vlgmr.msra.gmra.mrb[132].mxu0 %vm1186_vm1, %v4463_v62  ;;  %v6256_v62 = vld [vmem:[#allocation13 + $0xc0] ss:$8 sps:$4 sm:$0xff]  }
 0x51c   :  { %4733 = vmatprep.mubr.bf16.mxu0 %v7849_v45  ;;  %4771 = vmatpush1.bf16.msra.mxu0 %v6238_v12 }
 0x51d   :  { %4772 = vmatprep.subr.bf16.mxu0 %v6243_v52  ;;  %v6261_v52 = vld [vmem:[#allocation13 + $0xd4] ss:$8 sps:$4 sm:$0xff]  }
 0x51f   :  { %v3636_v48 = vpop.f32.mrb[92].mxu0 }
 0x520   :  { %v3593_v8 = vpop.f32.mrb[120].mxu1  ;;  %v5885_v54 = vpop.f32.mrb[93].mxu0  ;;  %4773 = vmatpush1.bf16.msra.mxu0 %v6241_v56 }
 0x521   :  { %v4464_v63 = vpack.c.bf16 %v3593_v8, %v3550_v36  ;;  %v5879_v53 = vpop.f32.mrb[121].mxu1  ;;  %v3639_v28 = vpop.f32.mrb[94].mxu0  ;;  %4849 = vmatprep.subr.bf16.mxu0 %v6246_v25  ;;  %v6259_v25 = vld [vmem:[#allocation13 + $0xd0] ss:$8 sps:$4 sm:$0xff]   ;;  %v6264_v8 = vld [vmem:[#allocation13 + $0xe4] ss:$8 sps:$4 sm:$0xff]  }
 0x522   :  { %v3596_v33 = vpop.f32.mrb[122].mxu1  ;;  %v5886_v4 = vpop.f32.mrb[95].mxu0 }
 0x523   :  { %v5880_v32 = vpop.f32.mrb[123].mxu1  ;;  %5450 = vmatmul.mubr.msk.bf16.gmra.mrb[136].mxu0 %vm1186_vm1, %v4464_v63 }
 0x524   :  { %4802 = vmatprep.mubr.bf16.mxu0 %v7849_v45 }
 0x527   :  { %v3722_v20 = vpop.f32.mrb[96].mxu0 }
 0x528   :  { %v3679_v18 = vpop.f32.mrb[124].mxu1  ;;  %v5897_v19 = vpop.f32.mrb[97].mxu0 }
 0x529   :  { %v4465_v11 = vpack.c.bf16 %v3679_v18, %v3636_v48  ;;  %v5891_v60 = vpop.f32.mrb[125].mxu1  ;;  %v3725_v9 = vpop.f32.mrb[98].mxu0 }
 0x52a   :  { %v3682_v49 = vpop.f32.mrb[126].mxu1  ;;  %v5898_v41 = vpop.f32.mrb[99].mxu0 }
 0x52b   :  { %v5892_v30 = vpop.f32.mrb[127].mxu1  ;;  %5455 = vmatmul.mubr.msk.bf16.vlgmr.msra.gmra.mrb[132].mxu0 %vm1186_vm1, %v4465_v11  ;;  %v6262_v11 = vld [vmem:[#allocation13 + $0xe0] ss:$8 sps:$4 sm:$0xff]  }
 0x52c   :  { %4812 = vmatprep.mubr.bf16.mxu0 %v7849_v45  ;;  %4850 = vmatpush1.bf16.msra.mxu0 %v6244_v50 }
 0x52d   :  { %4851 = vmatprep.subr.bf16.mxu0 %v6249_v27  ;;  %v6267_v27 = vld [vmem:[#allocation13 + $0xf4] ss:$8 sps:$4 sm:$0xff]  }
 0x52f   :  { %v3808_v35 = vpop.f32.mrb[100].mxu0 }
 0x530   :  { %v3765_v0 = vpop.f32.mrb[128].mxu1  ;;  %v5909_v61 = vpop.f32.mrb[101].mxu0  ;;  %4852 = vmatpush1.bf16.msra.mxu0 %v6247_v44 }
 0x531   :  { %v4466_v47 = vpack.c.bf16 %v3765_v0, %v3722_v20  ;;  %v5903_v10 = vpop.f32.mrb[129].mxu1  ;;  %v3811_v51 = vpop.f32.mrb[102].mxu0  ;;  %4928 = vmatprep.subr.bf16.mxu0 %v6252_v55  ;;  %v6265_v55 = vld [vmem:[#allocation13 + $0xf0] ss:$8 sps:$4 sm:$0xff]  }
 0x532   :  { %v3768_v16 = vpop.f32.mrb[130].mxu1  ;;  %v5910_v6 = vpop.f32.mrb[103].mxu0 }
 0x533   :  { %v5904_v24 = vpop.f32.mrb[131].mxu1  ;;  %5456 = vmatmul.mubr.msk.bf16.gmra.mrb[136].mxu0 %vm1186_vm1, %v4466_v47 }
 0x534   :  { %4881 = vmatprep.mubr.bf16.mxu0 %v7849_v45 }
 0x537   :  { %v3894_v43 = vpop.f32.mrb[104].mxu0 }
 0x538   :  { %v3851_v1 = vpop.f32.mrb[132].mxu1  ;;  %v5921_v17 = vpop.f32.mrb[105].mxu0 }
 0x539   :  { %v4467_v38 = vpack.c.bf16 %v3851_v1, %v3808_v35  ;;  %v5915_v46 = vpop.f32.mrb[133].mxu1  ;;  %v3897_v57 = vpop.f32.mrb[106].mxu0 }
 0x53a   :  { %v3854_v14 = vpop.f32.mrb[134].mxu1  ;;  %v5922_v21 = vpop.f32.mrb[107].mxu0 }
 0x53b   :  { %v5916_v39 = vpop.f32.mrb[135].mxu1  ;;  %5461 = vmatmul.mubr.msk.bf16.vlgmr.msra.gmra.mrb[132].mxu0 %vm1186_vm1, %v4467_v38 }
 0x53c   :  { %4891 = vmatprep.mubr.bf16.mxu0 %v7849_v45  ;;  %4929 = vmatpush1.bf16.msra.mxu0 %v6250_v5 }
 0x53d   :  { %4930 = vmatprep.subr.bf16.mxu0 %v6255_v59 }
 0x540   :  { %v3937_v37 = vpop.f32.mrb[136].mxu1  ;;  %4931 = vmatpush1.bf16.msra.mxu0 %v6253_v40 }
 0x541   :  { %v4468_v58 = vpack.c.bf16 %v3937_v37, %v3894_v43  ;;  %v5927_v34 = vpop.f32.mrb[137].mxu1  ;;  %5007 = vmatprep.subr.bf16.mxu0 %v6258_v23 }
 0x542   :  { %v3940_v2 = vpop.f32.mrb[138].mxu1 }
 0x543   :  { %v5928_v26 = vpop.f32.mrb[139].mxu1  ;;  %5462 = vmatmul.mubr.msk.bf16.gmra.mrb[136].mxu0 %vm1186_vm1, %v4468_v58  ;;  %v5195_v2 = vld [vmem:[%s7818_s10] sm:$0x3]  ;;  %s6598_s10 = smov [#allocation14]  }
 0x544   :  { %4960 = vmatprep.mubr.bf16.mxu0 %v7849_v45  ;;  %v7850_v26 = vld [vmem:[#allocation20_spill] sm:$0xff]  ;;  %s5256_s30 = sshll.u32 %s6598_s10, 4  ;;  %s5257_s30 = int_to_ptr.vmem [resolvable:$true] %s5256_s30 }
 0x545   :  { %s6550_s12 = scalar_lea.vmem %s5257_s30, 512  ;;  %p6555_p1 = scmp.lt.s32.totalorder %s5257_s30, %s5257_s30 }
 0x546   :  { %p6551_p0 = scmp.ne.s32.totalorder %s5257_s30, %s6550_s12  ;;  %p6556_p2 = scmp.lt.s32.totalorder %s6550_s12, %s6550_s12 }
 0x548   :  { %p6557_p3 = por %p6556_p2, %p6555_p1 }
 0x54a   :  { %p6558_p4 = pnand %p6557_p3, %p6551_p0 }
 0x570   :  { %v3980_v7 = vpop.f32.mrb[108].mxu0 }
 0x571   :  { %v5933_v36 = vpop.f32.mrb[109].mxu0 }
 0x572   :  { %v3983_v15 = vpop.f32.mrb[110].mxu0  ;;  %v7851_v36 = vld [vmem:[#allocation21_spill] sm:$0xff] }
 0x573   :  { %v5934_v31 = vpop.f32.mrb[111].mxu0  ;;  %v5204_v15 = vrot.slane %v5195_v2, %v7851_v36 }
 0x575   :  { %v4023_v12 = vpop.f32.mrb[140].mxu1 }
 0x576   :  { %v4469_v13 = vpack.c.bf16 %v4023_v12, %v3980_v7  ;;  %v5939_v42 = vpop.f32.mrb[141].mxu1  ;;  %v5200_v7 = vrot.slane %v5195_v2, %v7850_v26 }
 0x577   :  { %v4026_v29 = vpop.f32.mrb[142].mxu1 }
 0x578   :  { %v5940_v3 = vpop.f32.mrb[143].mxu1  ;;  %5467 = vmatmul.mubr.msk.bf16.vlgmr.msra.gmra.mrb[132].mxu0 %vm1186_vm1, %v4469_v13  ;;  %v4066_v22 = vpop.f32.mrb[112].mxu0 }
 0x579   :  { %v5945_v56 = vpop.f32.mrb[113].mxu0  ;;  %4970 = vmatprep.mubr.bf16.mxu0 %v7849_v45  ;;  %5008 = vmatpush1.bf16.msra.mxu0 %v6256_v62 }
 0x57a   :  { %v4069_v48 = vpop.f32.mrb[114].mxu0  ;;  %5009 = vmatprep.subr.bf16.mxu0 %v6261_v52 }
 0x57b   :  { %v5946_v54 = vpop.f32.mrb[115].mxu0 }
 0x57d   :  { %v4109_v63 = vpop.f32.mrb[144].mxu1  ;;  %5010 = vmatpush1.bf16.msra.mxu0 %v6259_v25 }
 0x57e   :  { %v4470_v53 = vpack.c.bf16 %v4109_v63, %v4066_v22  ;;  %v5951_v28 = vpop.f32.mrb[145].mxu1  ;;  %5086 = vmatprep.subr.bf16.mxu0 %v6264_v8 }
 0x57f   :  { %v4112_v33 = vpop.f32.mrb[146].mxu1 }
 0x580   :  { %v5952_v4 = vpop.f32.mrb[147].mxu1  ;;  %5468 = vmatmul.mubr.msk.bf16.gmra.mrb[136].mxu0 %vm1186_vm1, %v4470_v53  ;;  %v4152_v32 = vpop.f32.mrb[116].mxu0 }
 0x581   :  { %v5957_v20 = vpop.f32.mrb[117].mxu0  ;;  %5039 = vmatprep.mubr.bf16.mxu0 %v7849_v45 }
 0x582   :  { %v4155_v18 = vpop.f32.mrb[118].mxu0 }
 0x583   :  { %v5958_v19 = vpop.f32.mrb[119].mxu0 }
 0x585   :  { %v4195_v50 = vpop.f32.mrb[148].mxu1 }
 0x586   :  { %v4471_v60 = vpack.c.bf16 %v4195_v50, %v4152_v32  ;;  %v5963_v9 = vpop.f32.mrb[149].mxu1 }
 0x587   :  { %v4198_v49 = vpop.f32.mrb[150].mxu1 }
 0x588   :  { %v5964_v41 = vpop.f32.mrb[151].mxu1  ;;  %5473 = vmatmul.mubr.msk.bf16.vlgmr.msra.gmra.mrb[132].mxu0 %vm1186_vm1, %v4471_v60  ;;  %v4238_v30 = vpop.f32.mrb[120].mxu0 }
 0x589   :  { %v5969_v44 = vpop.f32.mrb[121].mxu0  ;;  %5049 = vmatprep.mubr.bf16.mxu0 %v7849_v45  ;;  %5087 = vmatpush1.bf16.msra.mxu0 %v6262_v11 }
 0x58a   :  { %v4241_v35 = vpop.f32.mrb[122].mxu0  ;;  %5088 = vmatprep.subr.bf16.mxu0 %v6267_v27 }
 0x58b   :  { %v5970_v0 = vpop.f32.mrb[123].mxu0 }
 0x58d   :  { %v4281_v61 = vpop.f32.mrb[152].mxu1  ;;  %5089 = vmatpush1.bf16.msra.mxu0 %v6265_v55 }
 0x58e   :  { %v4472_v47 = vpack.c.bf16 %v4281_v61, %v4238_v30  ;;  %v5975_v10 = vpop.f32.mrb[153].mxu1 }
 0x58f   :  { %v4284_v51 = vpop.f32.mrb[154].mxu1 }
 0x590   :  { %v5976_v16 = vpop.f32.mrb[155].mxu1  ;;  %5474 = vmatmul.mubr.msk.bf16.gmra.mrb[136].mxu0 %vm1186_vm1, %v4472_v47 }
 0x591   :  { %5118 = vmatprep.mubr.bf16.mxu0 %v7849_v45 }
 0x5b1   :  { %v4324_v6 = vpop.f32.mrb[124].mxu0 }
 0x5b2   :  { %v5981_v24 = vpop.f32.mrb[125].mxu0 }
 0x5b3   :  { %v4327_v43 = vpop.f32.mrb[126].mxu0 }
 0x5b4   :  { %v5982_v1 = vpop.f32.mrb[127].mxu0 }
 0x5b6   :  { %v4367_v17 = vpop.f32.mrb[156].mxu1 }
 0x5b7   :  { %v4473_v5 = vpack.c.bf16 %v4367_v17, %v4324_v6  ;;  %v5987_v38 = vpop.f32.mrb[157].mxu1 }
 0x5b8   :  { %v4370_v46 = vpop.f32.mrb[158].mxu1 }
 0x5b9   :  { %v5988_v57 = vpop.f32.mrb[159].mxu1  ;;  %5479 = vmatmul.mubr.msk.bf16.vlgmr.msra.gmra.mrb[132].mxu0 %vm1186_vm1, %v4473_v5  ;;  %v4410_v59 = vpop.f32.mrb[128].mxu0 }
 0x5ba   :  { %v5993_v14 = vpop.f32.mrb[129].mxu0  ;;  %5128 = vmatprep.mubr.bf16.mxu0 %v7849_v45 }
 0x5bb   :  { %v4413_v21 = vpop.f32.mrb[130].mxu0 }
 0x5bc   :  { %v5994_v39 = vpop.f32.mrb[131].mxu0 }
 0x5be   :  { %v4453_v40 = vpop.f32.mrb[160].mxu1 }
 0x5bf   :  { %v4474_v23 = vpack.c.bf16 %v4453_v40, %v4410_v59  ;;  %v5999_v37 = vpop.f32.mrb[161].mxu1 }
 0x5c0   :  { %v4456_v58 = vpop.f32.mrb[162].mxu1 }
 0x5c1   :  { %v6000_v34 = vpop.f32.mrb[163].mxu1  ;;  %5480 = vmatmul.mubr.msk.bf16.gmra.mrb[136].mxu0 %vm1186_vm1, %v4474_v23 }
 0x68c   :  { %v5120_v31 = vpop.f32.mrb[132].mxu0 }
 0x68d   :  { %v5207_v12 = vadd.f32 %v5200_v7, %v5120_v31  ;;  %v5122_v45 = vpop.f32.mrb[133].mxu0 }
 0x68e   :  { %v5208_v62 = vadd.f32 %v5204_v15, %v5122_v45  ;;  %v5124_v13 = vpop.f32.mrb[134].mxu0 }
 0x68f   :  { %v5209_v42 = vadd.f32 %v5200_v7, %v5124_v13  ;;  %v5126_v52 = vpop.f32.mrb[135].mxu0 }
 0x690   :  { %v5485_v29 = vpack.c.bf16 %v5208_v62, %v5207_v12  ;;  %v5210_v3 = vadd.f32 %v5204_v15, %v5126_v52 }
 0x692   :  { %5247 = vst [vmem:[#allocation14] sm:$0xff] %v5485_v29  ;;  %v5486_v22 = vpack.c.bf16 %v5210_v3, %v5209_v42 }
 0x694   :  { %5248 = vst [vmem:[#allocation14 + $0x8] sm:$0xff] %v5486_v22  ;;  %v5130_v56 = vpop.f32.mrb[136].mxu0 }
 0x695   :  { %v5211_v25 = vadd.f32 %v5200_v7, %v5130_v56  ;;  %v5132_v48 = vpop.f32.mrb[137].mxu0 }
 0x696   :  { %v5212_v8 = vadd.f32 %v5204_v15, %v5132_v48  ;;  %v5134_v54 = vpop.f32.mrb[138].mxu0 }
 0x697   :  { %v5213_v63 = vadd.f32 %v5200_v7, %v5134_v54  ;;  %v5136_v53 = vpop.f32.mrb[139].mxu0 }
 0x698   :  { %v5487_v28 = vpack.c.bf16 %v5212_v8, %v5211_v25  ;;  %v5214_v33 = vadd.f32 %v5204_v15, %v5136_v53 }
 0x69a   :  { %5249 = vst [vmem:[#allocation14 + $0x10] sm:$0xff] %v5487_v28  ;;  %v5488_v4 = vpack.c.bf16 %v5214_v33, %v5213_v63 }
 0x69c   :  { %5250 = vst [vmem:[#allocation14 + $0x18] sm:$0xff] %v5488_v4 }
 0x69d   :  { %6561 = shalt.err (!%p6558_p4)
}
 0x69e   :  { %s6562_s14 = scalar_lea.hbm %s7819_s11, 512 }
 0x69f   :  { %p6563_p5 = scmp.ne.s32.totalorder %s7819_s11, %s6562_s14  ;;  %p6566_p6 = scmp.lt.u32.totalorder %s6562_s14, %s7819_s11 }
 0x6a1   :  { %p6568_p7 = pnand %p6566_p6, %p6563_p5 }
 0x6a3   :  { %6571 = shalt.err (!%p6568_p7)
}
 0x6a4   :  { %5262 = dma.vmem_to_hbm [thread:$0]  %s5257_s30, 512, %s7819_s11, [#allocation4], %s6583_s27, %s6583_s27, %s6584_s28  }
 0x6a5   :  { %6580 = dma.done.wait [#allocation4], 512  }
 0x6a6   :  { %6581 = vsyncadd [#allocation4], 4294966784 }
 0x6a7   :  { %5266 = vsyncpa [#allocation3], 1 }
 0x6a8   :  { %5267 = vsyncpa [#allocation6], 1 }
 0x6a9   :  { %5268 = vsyncpa [#allocation9], 1 }
 0x6aa   :  { %5269 = vsyncpa [#allocation12], 1 }
 0x6ab   :  { %5270 = vsyncpa [#allocation4], 1 }

</bundles_post_ra>
